<compile_context>
chip_gen: v7x
topology: tpu7x:2x2x1
jax: 0.10.0
libtpu: 0.0.40
codegen_flags: <defaults>
</compile_context>

<pallas_src>
import math
import jax
import jax.numpy as jnp
from jax.experimental import pallas as pl
from jax.experimental.pallas import tpu as pltpu

FEATURE_DIM = 128          # FEATURE_DIM constant of the original code base
DEPTH = 6
NHEAD = 4
DHEAD = FEATURE_DIM // NHEAD
DFF = 2048                 # PyTorch TransformerEncoderLayer default dim_feedforward
LN_EPS = 1e-5
RESNET_FEAT = 2048

D = FEATURE_DIM

# big weight pack: [ w_in (D,3D) | w_out (D,D) | w1 (D,DFF) ] along lanes
BIGW_COLS = 4 * D + DFF                     # 2560 (all offsets multiples of 128)
# small-vector pack (f32, per layer):
#  [ b_in(3D) | b_out(D) | ln1_w(D) | ln1_b(D) | ln2_w(D) | ln2_b(D) | b2(D) | b1(DFF) ]
S_B_IN, S_B_OUT = 0, 3 * D
S_LN1W, S_LN1B = 4 * D, 5 * D
S_LN2W, S_LN2B = 6 * D, 7 * D
S_B2, S_B1 = 8 * D, 9 * D
SMALL_COLS = 9 * D + DFF                    # 3200


# ---------------------------------------------------------------------------
# Fused Pallas kernel: to_low_dim head + 6x TransformerEncoderLayer
# ---------------------------------------------------------------------------
def _layernorm(x, gamma, beta):
    mean = jnp.mean(x, axis=-1, keepdims=True)
    xc = x - mean
    var = jnp.mean(xc * xc, axis=-1, keepdims=True)
    return xc * jax.lax.rsqrt(var + LN_EPS) * gamma + beta


def fused_encoder_kernel(
    x0_ref, gpre_ref, tlw_ref, tlb_ref,
    bigw_ref, w2_ref, small_ref,
    cls_ref, glob_ref, act_ref,
):
    """Grid axis 0 == encoder layer (serial, "arbitrary"). Activations stay
    resident in the f32 VMEM scratch; the per-layer bf16 weights are streamed
    (double-buffered) by the BlockSpec pipeline."""
    l = pl.program_id(0)

    @pl.when(l == 0)
    def _init():
        # seed the resident activation buffer
        act_ref[...] = x0_ref[...]
        # to_low_dim head: ReLU + Linear(2048 -> 128); weight pre-transposed
        # to (2048, 128) bf16, so no in-kernel transpose is needed.
        g = jnp.maximum(gpre_ref[...], 0.0).astype(jnp.bfloat16)
        glob_ref[...] = (
            jnp.dot(g, tlw_ref[...], preferred_element_type=jnp.float32)
            + tlb_ref[...])

    # ---- unpack the per-layer weights (lane-aligned static slices) ----
    w_in = bigw_ref[:, 0:3 * D]                    # (D, 3D)  bf16 (q pre-scaled)
    w_out = bigw_ref[:, 3 * D:4 * D]               # (D, D)   bf16
    w1 = bigw_ref[:, 4 * D:4 * D + DFF]            # (D, DFF) bf16
    w2 = w2_ref[...]                               # (DFF, D) bf16

    sm = small_ref[...]                            # (1, SMALL_COLS) f32
    b_in = sm[:, S_B_IN:S_B_IN + 3 * D]
    b_out = sm[:, S_B_OUT:S_B_OUT + D]
    ln1_w = sm[:, S_LN1W:S_LN1W + D]
    ln1_b = sm[:, S_LN1B:S_LN1B + D]
    ln2_w = sm[:, S_LN2W:S_LN2W + D]
    ln2_b = sm[:, S_LN2B:S_LN2B + D]
    b2 = sm[:, S_B2:S_B2 + D]
    b1 = sm[:, S_B1:S_B1 + DFF]

    x = act_ref[...]                               # (B, S1, D) f32
    xb = x.astype(jnp.bfloat16)

    # ---------------- self attention ----------------
    # QKV projection; q columns pre-scaled by 1/sqrt(DHEAD) on the host.
    qkv = jnp.einsum('bsd,df->bsf', xb, w_in,
                     preferred_element_type=jnp.float32) + b_in
    q = qkv[:, :, 0:D].astype(jnp.bfloat16)
    k = qkv[:, :, D:2 * D].astype(jnp.bfloat16)
    v = qkv[:, :, 2 * D:3 * D].astype(jnp.bfloat16)

    ctx_heads = []
    for h in range(NHEAD):
        sl = slice(h * DHEAD, (h + 1) * DHEAD)
        qh, kh, vh = q[:, :, sl], k[:, :, sl], v[:, :, sl]      # (B, S1, Dh)
        s = jnp.einsum('bqd,bkd->bqk', qh, kh,
                       preferred_element_type=jnp.float32)
        s = s - jnp.max(s, axis=-1, keepdims=True)
        p = jnp.exp(s)
        p = p * pl.reciprocal(jnp.sum(p, axis=-1, keepdims=True), approx=True)
        ctx_heads.append(jnp.einsum('bqk,bkd->bqd', p.astype(jnp.bfloat16), vh,
                                    preferred_element_type=jnp.float32))
    ctx = jnp.concatenate(ctx_heads, axis=-1)      # (B, S1, D) f32

    # single fused output projection on the concatenated heads
    attn = jnp.einsum('bsd,de->bse', ctx.astype(jnp.bfloat16), w_out,
                      preferred_element_type=jnp.float32) + b_out

    x1 = _layernorm(x + attn, ln1_w, ln1_b)

    # ---------------- feed forward ----------------
    h1 = jnp.einsum('bsd,df->bsf', x1.astype(jnp.bfloat16), w1,
                    preferred_element_type=jnp.float32) + b1
    h1 = jnp.maximum(h1, 0.0)
    h2 = jnp.einsum('bsf,fd->bsd', h1.astype(jnp.bfloat16), w2,
                    preferred_element_type=jnp.float32) + b2

    y = _layernorm(x1 + h2, ln2_w, ln2_b)
    act_ref[...] = y

    @pl.when(l == DEPTH - 1)
    def _final():
        cls_ref[...] = y[:, 0:1, :]                # CLS row only


# ---------------------------------------------------------------------------
# pallas_call wrapper
# ---------------------------------------------------------------------------
def fused_encoder(x0, gpre, pp):
    B, S1, _ = x0.shape
    lmap3 = lambda l: (l, 0, 0)     # per-layer weight block
    c2 = lambda l: (0, 0)           # constant block (fetched once)
    c3 = lambda l: (0, 0, 0)

    in_specs = [
        pl.BlockSpec((B, S1, D), c3),                 # x0 (initial activations)
        pl.BlockSpec((B, RESNET_FEAT), c2),           # global_embed_pre
        pl.BlockSpec((RESNET_FEAT, D), c2),           # to_low_dim W^T (bf16)
        pl.BlockSpec((1, D), c2),                     # to_low_dim b
        pl.BlockSpec((None, D, BIGW_COLS), lmap3),    # [w_in|w_out|w1] (bf16)
        pl.BlockSpec((None, DFF, D), lmap3),          # w2 (bf16)
        pl.BlockSpec((None, 1, SMALL_COLS), lmap3),   # bias / LN bundle (f32)
    ]
    out_specs = [
        pl.BlockSpec((B, 1, D), c3),                  # CLS activations
        pl.BlockSpec((B, D), c2),                     # global embedding
    ]

    args = (x0, gpre, pp['tl_w'], pp['tl_b'],
            pp['big_w'], pp['w2'], pp['small'])

    bytes_accessed = sum(int(a.size) * a.dtype.itemsize for a in args) \
        + B * D * 4 + B * D * 4
    flops = (DEPTH * (2 * B * S1 * D * (4 * D + 2 * DFF)
                      + 4 * B * NHEAD * S1 * S1 * DHEAD)
             + 2 * B * RESNET_FEAT * D)
    transc = DEPTH * (NHEAD * B * S1 * S1 + 2 * B * S1)

    cls_out, glob = pl.pallas_call(
        fused_encoder_kernel,
        out_shape=(jax.ShapeDtypeStruct((B, 1, D), jnp.float32),
                   jax.ShapeDtypeStruct((B, D), jnp.float32)),
        grid_spec=pltpu.PrefetchScalarGridSpec(
            num_scalar_prefetch=0,
            grid=(DEPTH,),
            in_specs=in_specs,
            out_specs=out_specs,
            scratch_shapes=[pltpu.VMEM((B, S1, D), jnp.float32)]),
        compiler_params=pltpu.CompilerParams(
            dimension_semantics=("arbitrary",)),
        cost_estimate=pl.CostEstimate(
            flops=int(flops), transcendentals=int(transc),
            bytes_accessed=int(bytes_accessed)),
    )(*args)
    return cls_out[:, 0, :], glob


# ---------------------------------------------------------------------------
# Parameter initialization (PyTorch convention) and kernel-layout packing
# ---------------------------------------------------------------------------
def init_params(vocab_size, key):
    keys = iter(jax.random.split(key, 64))

    def lin(out_f, in_f, zero_bias=False):
        bound = 1.0 / math.sqrt(in_f)
        w = jax.random.uniform(next(keys), (out_f, in_f), jnp.float32, -bound, bound)
        if zero_bias:
            b = jnp.zeros((1, out_f), jnp.float32)
        else:
            b = jax.random.uniform(next(keys), (1, out_f), jnp.float32, -bound, bound)
        return w, b

    layers = []
    for _ in range(DEPTH):
        # MultiheadAttention: in_proj_bias / out_proj.bias are zero-initialized
        w_in, _ = lin(3 * FEATURE_DIM, FEATURE_DIM, zero_bias=True)
        w_out, _ = lin(FEATURE_DIM, FEATURE_DIM, zero_bias=True)
        w1, b1 = lin(DFF, FEATURE_DIM)
        w2, b2 = lin(FEATURE_DIM, DFF)
        layers.append(dict(
            w_in=w_in, b_in=jnp.zeros((1, 3 * FEATURE_DIM), jnp.float32),
            w_out=w_out, b_out=jnp.zeros((1, FEATURE_DIM), jnp.float32),
            ln1_w=jnp.ones((1, FEATURE_DIM), jnp.float32),
            ln1_b=jnp.zeros((1, FEATURE_DIM), jnp.float32),
            ln2_w=jnp.ones((1, FEATURE_DIM), jnp.float32),
            ln2_b=jnp.zeros((1, FEATURE_DIM), jnp.float32),
            w1=w1, b1=b1, w2=w2, b2=b2,
        ))

    to_low_w, to_low_b = lin(FEATURE_DIM, RESNET_FEAT)

    return dict(
        to_low_dim_w=to_low_w,
        to_low_dim_b=to_low_b,
        query_extractor=dict(
            embedding=jax.random.normal(next(keys), (vocab_size, FEATURE_DIM),
                                        jnp.float32),
            pos_enc=jnp.zeros((1, 1000, FEATURE_DIM), jnp.float32),   # nn.Parameter zeros
            cls_token=jnp.zeros((1, 1, FEATURE_DIM), jnp.float32),    # nn.Parameter zeros
            layers=layers,
        ),
    )


def pack_params(params):
    """Pack PyTorch-layout params into the fused-kernel layout: weights
    transposed to (in, out), cast to bf16, lane-concatenated per layer,
    stacked over layers, and the 1/sqrt(d_head) attention scale folded
    into the q projection."""
    qe = params['query_extractor']
    qscale = 1.0 / math.sqrt(DHEAD)

    def stack(fn):
        return jnp.stack([fn(lp) for lp in qe['layers']], axis=0)

    def pack_bigw(lp):
        wi = lp['w_in'].at[:D].multiply(qscale).T          # (D, 3D), q cols scaled
        wo = lp['w_out'].T                                 # (D, D)
        w1 = lp['w1'].T                                    # (D, DFF)
        return jnp.concatenate([wi, wo, w1], axis=1).astype(jnp.bfloat16)

    def pack_small(lp):
        bi = lp['b_in'].at[:, :D].multiply(qscale)         # fold scale into q bias
        return jnp.concatenate(
            [bi, lp['b_out'], lp['ln1_w'], lp['ln1_b'],
             lp['ln2_w'], lp['ln2_b'], lp['b2'], lp['b1']], axis=1)   # (1, SMALL_COLS)

    return dict(
        embedding=qe['embedding'],
        pos_enc=qe['pos_enc'],
        cls_token=qe['cls_token'],
        tl_w=params['to_low_dim_w'].T.astype(jnp.bfloat16),           # (2048, D)
        tl_b=params['to_low_dim_b'],                                  # (1, D)
        big_w=stack(pack_bigw),                                       # (L, D, 2560) bf16
        w2=stack(lambda lp: lp['w2'].T.astype(jnp.bfloat16)),         # (L, DFF, D) bf16
        small=stack(pack_small),                                      # (L, 1, 3200) f32
    )


# ---------------------------------------------------------------------------
# Forward pass (glue in plain JAX: gather, pos add, CLS concat, CLS slice)
# ---------------------------------------------------------------------------
def disjoint_encoder_forward(packed, global_embed_pre, local_views, query):
    # TODO(synk): local_extractor (resnet.LatentWordEncoder) not available in
    #             the provided source -> local_embeds is None.
    local_embeds = None

    B, S = query.shape
    emb = packed['embedding'][query]                          # (B, S, D)
    emb = emb + packed['pos_enc'][:, :S, :]                   # pos on tokens only (as in spec)
    cls = jnp.broadcast_to(packed['cls_token'], (B, 1, FEATURE_DIM))
    x0 = jnp.concatenate([cls, emb], axis=1)                  # (B, S+1, D)

    query_embeddings, global_embed = fused_encoder(x0, global_embed_pre, packed)
    return global_embed, local_embeds, query_embeddings


# ---------------------------------------------------------------------------
if __name__ == "__main__":
    VOCAB_SIZE = 100
    B, S = 2, 8

    key = jax.random.PRNGKey(0)
    k_p, k_q, k_g, k_l = jax.random.split(key, 4)

    params = init_params(VOCAB_SIZE, k_p)
    packed = pack_params(params)

    query = jax.random.randint(k_q, (B, S), 0, VOCAB_SIZE, dtype=jnp.int32)
    # resnet50 pooled-feature stand-in (backbone itself is untranslatable).
    global_embed_pre = jax.random.normal(k_g, (B, RESNET_FEAT), jnp.float32)
    local_views = jax.random.normal(k_l, (B, 5, 3, 16, 16), jnp.float32)  # unused, TODO above

    fwd = jax.jit(disjoint_encoder_forward)
    global_embed, local_embeds, query_embeddings = fwd(
        packed, global_embed_pre, local_views, query)

    jax.block_until_ready(global_embed)
    jax.block_until_ready(query_embeddings)

    assert global_embed.shape == (B, FEATURE_DIM)
    assert query_embeddings.shape == (B, FEATURE_DIM)
    assert bool(jnp.all(jnp.isfinite(global_embed)))
    assert bool(jnp.all(jnp.isfinite(query_embeddings)))
    print("KERNEL_OK")
</pallas_src>

<mosaic_0001>
module attributes {stable_mosaic.version = 11 : i64} {
  func.func @fused_encoder_kernel(%arg0: i32, %arg1: memref<2x9x128xf32, #tpu.memory_space<vmem>>, %arg2: memref<2x2048xf32, #tpu.memory_space<vmem>>, %arg3: memref<2048x128xbf16, #tpu.memory_space<vmem>>, %arg4: memref<1x128xf32, #tpu.memory_space<vmem>>, %arg5: memref<1x128x2560xbf16, #tpu.memory_space<vmem>>, %arg6: memref<1x2048x128xbf16, #tpu.memory_space<vmem>>, %arg7: memref<1x1x3200xf32, #tpu.memory_space<vmem>>, %arg8: memref<2x1x128xf32, #tpu.memory_space<vmem>>, %arg9: memref<2x128xf32, #tpu.memory_space<vmem>>, %arg10: memref<2x9x128xf32, #tpu.memory_space<vmem>>) attributes {dimension_semantics = [#tpu.dimension_semantics<arbitrary>], iteration_bounds = array<i64: 6>, scalar_prefetch = 0 : i64, scratch_operands = 1 : i64, tpu.core_type = #tpu.core_type<tc>, window_params = [{pipeline_mode = #tpu.pipeline_mode<synchronous>, transform_indices = @transform_0, window_bounds = array<i64: 2, 9, 128>}, {pipeline_mode = #tpu.pipeline_mode<synchronous>, transform_indices = @transform_1, window_bounds = array<i64: 2, 2048>}, {pipeline_mode = #tpu.pipeline_mode<synchronous>, transform_indices = @transform_2, window_bounds = array<i64: 2048, 128>}, {pipeline_mode = #tpu.pipeline_mode<synchronous>, transform_indices = @transform_3, window_bounds = array<i64: 1, 128>}, {transform_indices = @transform_4, window_bounds = array<i64: 1, 128, 2560>}, {transform_indices = @transform_5, window_bounds = array<i64: 1, 2048, 128>}, {transform_indices = @transform_6, window_bounds = array<i64: 1, 1, 3200>}, {pipeline_mode = #tpu.pipeline_mode<synchronous>, transform_indices = @transform_7, window_bounds = array<i64: 2, 1, 128>}, {pipeline_mode = #tpu.pipeline_mode<synchronous>, transform_indices = @transform_8, window_bounds = array<i64: 2, 128>}]} {
    %c0_i32 = arith.constant 0 : i32
    %0 = arith.cmpi eq, %arg0, %c0_i32 : i32
    %1 = arith.extui %0 : i1 to i32
    %c0_i32_0 = arith.constant 0 : i32
    %2 = arith.cmpi ne, %1, %c0_i32_0 : i32
    scf.if %2 {
      %c0_50 = arith.constant 0 : index
      %c0_51 = arith.constant 0 : index
      %c0_52 = arith.constant 0 : index
      %165 = vector.load %arg1[%c0_50, %c0_51, %c0_52] : memref<2x9x128xf32, #tpu.memory_space<vmem>>, vector<2x9x128xf32>
      %c0_53 = arith.constant 0 : index
      %c0_54 = arith.constant 0 : index
      %c0_55 = arith.constant 0 : index
      %166 = vector.load %arg10[%c0_53, %c0_54, %c0_55] : memref<2x9x128xf32, #tpu.memory_space<vmem>>, vector<2x9x128xf32>
      tpu.vector_store %arg10[%c0_53, %c0_54, %c0_55], %165 {strides = array<i32>} : memref<2x9x128xf32, #tpu.memory_space<vmem>>, vector<2x9x128xf32>,
      %c0_56 = arith.constant 0 : index
      %c0_57 = arith.constant 0 : index
      %167 = vector.load %arg2[%c0_56, %c0_57] : memref<2x2048xf32, #tpu.memory_space<vmem>>, vector<2x2048xf32>
      %cst_58 = arith.constant 0.000000e+00 : f32
      %168 = vector.broadcast %cst_58 : f32 to vector<2x2048xf32>
      %169 = arith.maximumf %167, %168 : vector<2x2048xf32>
      %170 = arith.truncf %169 : vector<2x2048xf32> to vector<2x2048xbf16>
      %c0_59 = arith.constant 0 : index
      %c0_60 = arith.constant 0 : index
      %171 = vector.load %arg3[%c0_59, %c0_60] : memref<2048x128xbf16, #tpu.memory_space<vmem>>, vector<2048x128xbf16>
      %cst_61 = arith.constant dense<0.000000e+00> : vector<2x128xf32>
      %172 = tpu.matmul %170, %171, %cst_61 {dimension_numbers = #tpu.dot_dimension_numbers<[1], [0], [0], [1], [0, 0, 1, 1], [], []>} : vector<2x2048xbf16>, vector<2048x128xbf16>, vector<2x128xf32> -> vector<2x128xf32>
      %c0_62 = arith.constant 0 : index
      %c0_63 = arith.constant 0 : index
      %173 = vector.load %arg4[%c0_62, %c0_63] : memref<1x128xf32, #tpu.memory_space<vmem>>, vector<1x128xf32>
      %174 = vector.broadcast %173 : vector<1x128xf32> to vector<2x128xf32>
      %175 = arith.addf %172, %174 : vector<2x128xf32>
      %c0_64 = arith.constant 0 : index
      %c0_65 = arith.constant 0 : index
      %176 = vector.load %arg9[%c0_64, %c0_65] : memref<2x128xf32, #tpu.memory_space<vmem>>, vector<2x128xf32>
      tpu.vector_store %arg9[%c0_64, %c0_65], %175 {strides = array<i32>} : memref<2x128xf32, #tpu.memory_space<vmem>>, vector<2x128xf32>,
    } else {
    }
    %c0 = arith.constant 0 : index
    %c0_1 = arith.constant 0 : index
    %c0_2 = arith.constant 0 : index
    %3 = vector.load %arg5[%c0, %c0_1, %c0_2] : memref<1x128x2560xbf16, #tpu.memory_space<vmem>>, vector<1x128x384xbf16>
    %4 = vector.shape_cast %3 : vector<1x128x384xbf16> to vector<128x384xbf16>
    %c0_3 = arith.constant 0 : index
    %c0_4 = arith.constant 0 : index
    %c384 = arith.constant 384 : index
    %5 = vector.load %arg5[%c0_3, %c0_4, %c384] : memref<1x128x2560xbf16, #tpu.memory_space<vmem>>, vector<1x128x128xbf16>
    %6 = vector.shape_cast %5 : vector<1x128x128xbf16> to vector<128x128xbf16>
    %c0_5 = arith.constant 0 : index
    %c0_6 = arith.constant 0 : index
    %c512 = arith.constant 512 : index
    %7 = vector.load %arg5[%c0_5, %c0_6, %c512] : memref<1x128x2560xbf16, #tpu.memory_space<vmem>>, vector<1x128x2048xbf16>
    %8 = vector.shape_cast %7 : vector<1x128x2048xbf16> to vector<128x2048xbf16>
    %c0_7 = arith.constant 0 : index
    %c0_8 = arith.constant 0 : index
    %c0_9 = arith.constant 0 : index
    %9 = vector.load %arg6[%c0_7, %c0_8, %c0_9] : memref<1x2048x128xbf16, #tpu.memory_space<vmem>>, vector<1x2048x128xbf16>
    %10 = vector.shape_cast %9 : vector<1x2048x128xbf16> to vector<2048x128xbf16>
    %c0_10 = arith.constant 0 : index
    %c0_11 = arith.constant 0 : index
    %c0_12 = arith.constant 0 : index
    %11 = vector.load %arg7[%c0_10, %c0_11, %c0_12] : memref<1x1x3200xf32, #tpu.memory_space<vmem>>, vector<1x1x3200xf32>
    %12 = vector.shape_cast %11 : vector<1x1x3200xf32> to vector<1x3200xf32>
    %13 = vector.extract_strided_slice %12 {offsets = [0, 0], sizes = [1, 384], strides = [1, 1]} : vector<1x3200xf32> to vector<1x384xf32>
    %14 = vector.extract_strided_slice %12 {offsets = [0, 384], sizes = [1, 128], strides = [1, 1]} : vector<1x3200xf32> to vector<1x128xf32>
    %15 = vector.extract_strided_slice %12 {offsets = [0, 512], sizes = [1, 128], strides = [1, 1]} : vector<1x3200xf32> to vector<1x128xf32>
    %16 = vector.extract_strided_slice %12 {offsets = [0, 640], sizes = [1, 128], strides = [1, 1]} : vector<1x3200xf32> to vector<1x128xf32>
    %17 = vector.extract_strided_slice %12 {offsets = [0, 768], sizes = [1, 128], strides = [1, 1]} : vector<1x3200xf32> to vector<1x128xf32>
    %18 = vector.extract_strided_slice %12 {offsets = [0, 896], sizes = [1, 128], strides = [1, 1]} : vector<1x3200xf32> to vector<1x128xf32>
    %19 = vector.extract_strided_slice %12 {offsets = [0, 1024], sizes = [1, 128], strides = [1, 1]} : vector<1x3200xf32> to vector<1x128xf32>
    %20 = vector.extract_strided_slice %12 {offsets = [0, 1152], sizes = [1, 2048], strides = [1, 1]} : vector<1x3200xf32> to vector<1x2048xf32>
    %c0_13 = arith.constant 0 : index
    %c0_14 = arith.constant 0 : index
    %c0_15 = arith.constant 0 : index
    %21 = vector.load %arg10[%c0_13, %c0_14, %c0_15] : memref<2x9x128xf32, #tpu.memory_space<vmem>>, vector<2x9x128xf32>
    %22 = arith.truncf %21 : vector<2x9x128xf32> to vector<2x9x128xbf16>
    "tpu.trace_start"() <{level = 10 : i32, message = "bsd,df->bsf"}> : () -> ()
    %cst = arith.constant dense<0.000000e+00> : vector<2x9x384xf32>
    %23 = tpu.matmul %22, %4, %cst {dimension_numbers = #tpu.dot_dimension_numbers<[2], [0], [0, 1], [1], [0, 0, 0, 1, 1, 1], [], []>} : vector<2x9x128xbf16>, vector<128x384xbf16>, vector<2x9x384xf32> -> vector<2x9x384xf32>
    "tpu.trace_stop"() : () -> ()
    %24 = vector.shape_cast %13 : vector<1x384xf32> to vector<1x1x384xf32>
    %25 = vector.broadcast %24 : vector<1x1x384xf32> to vector<2x9x384xf32>
    %26 = arith.addf %23, %25 : vector<2x9x384xf32>
    %27 = vector.extract_strided_slice %26 {offsets = [0, 0, 0], sizes = [2, 9, 128], strides = [1, 1, 1]} : vector<2x9x384xf32> to vector<2x9x128xf32>
    %28 = arith.truncf %27 : vector<2x9x128xf32> to vector<2x9x128xbf16>
    %29 = vector.extract_strided_slice %26 {offsets = [0, 0, 128], sizes = [2, 9, 128], strides = [1, 1, 1]} : vector<2x9x384xf32> to vector<2x9x128xf32>
    %30 = arith.truncf %29 : vector<2x9x128xf32> to vector<2x9x128xbf16>
    %31 = vector.extract_strided_slice %26 {offsets = [0, 0, 256], sizes = [2, 9, 128], strides = [1, 1, 1]} : vector<2x9x384xf32> to vector<2x9x128xf32>
    %32 = arith.truncf %31 : vector<2x9x128xf32> to vector<2x9x128xbf16>
    %33 = vector.extract_strided_slice %28 {offsets = [0, 0, 0], sizes = [2, 9, 32], strides = [1, 1, 1]} : vector<2x9x128xbf16> to vector<2x9x32xbf16>
    %34 = vector.extract_strided_slice %30 {offsets = [0, 0, 0], sizes = [2, 9, 32], strides = [1, 1, 1]} : vector<2x9x128xbf16> to vector<2x9x32xbf16>
    %35 = vector.extract_strided_slice %32 {offsets = [0, 0, 0], sizes = [2, 9, 32], strides = [1, 1, 1]} : vector<2x9x128xbf16> to vector<2x9x32xbf16>
    "tpu.trace_start"() <{level = 10 : i32, message = "bqd,bkd->bqk"}> : () -> ()
    %cst_16 = arith.constant dense<0.000000e+00> : vector<2x9x9xf32>
    %36 = tpu.matmul %33, %34, %cst_16 {dimension_numbers = #tpu.dot_dimension_numbers<[2], [2], [1], [1], [0, 0, 0, 1, 1, 1], [0], [0]>} : vector<2x9x32xbf16>, vector<2x9x32xbf16>, vector<2x9x9xf32> -> vector<2x9x9xf32>
    "tpu.trace_stop"() : () -> ()
    %cst_17 = arith.constant dense<0xFF800000> : vector<2x9xf32>
    %37 = vector.multi_reduction <maximumf>, %36, %cst_17 [2] : vector<2x9x9xf32> to vector<2x9xf32>
    %38 = vector.shape_cast %37 : vector<2x9xf32> to vector<2x9x1xf32>
    %39 = vector.broadcast %38 : vector<2x9x1xf32> to vector<2x9x9xf32>
    %40 = arith.subf %36, %39 : vector<2x9x9xf32>
    %41 = math.exp %40 : vector<2x9x9xf32>
    %cst_18 = arith.constant dense<0.000000e+00> : vector<2x9xf32>
    %42 = vector.multi_reduction <add>, %41, %cst_18 [2] : vector<2x9x9xf32> to vector<2x9xf32>
    %43 = vector.shape_cast %42 : vector<2x9xf32> to vector<2x9x1xf32>
    %44 = tpu.reciprocal %43 {approx = true} : vector<2x9x1xf32> -> vector<2x9x1xf32>
    %45 = vector.broadcast %44 : vector<2x9x1xf32> to vector<2x9x9xf32>
    %46 = arith.mulf %41, %45 : vector<2x9x9xf32>
    %47 = arith.truncf %46 : vector<2x9x9xf32> to vector<2x9x9xbf16>
    "tpu.trace_start"() <{level = 10 : i32, message = "bqk,bkd->bqd"}> : () -> ()
    %cst_19 = arith.constant dense<0.000000e+00> : vector<2x9x32xf32>
    %48 = tpu.matmul %47, %35, %cst_19 {dimension_numbers = #tpu.dot_dimension_numbers<[2], [1], [1], [2], [0, 0, 0, 1, 1, 2], [0], [0]>} : vector<2x9x9xbf16>, vector<2x9x32xbf16>, vector<2x9x32xf32> -> vector<2x9x32xf32>
    "tpu.trace_stop"() : () -> ()
    %49 = vector.extract_strided_slice %28 {offsets = [0, 0, 32], sizes = [2, 9, 32], strides = [1, 1, 1]} : vector<2x9x128xbf16> to vector<2x9x32xbf16>
    %50 = vector.extract_strided_slice %30 {offsets = [0, 0, 32], sizes = [2, 9, 32], strides = [1, 1, 1]} : vector<2x9x128xbf16> to vector<2x9x32xbf16>
    %51 = vector.extract_strided_slice %32 {offsets = [0, 0, 32], sizes = [2, 9, 32], strides = [1, 1, 1]} : vector<2x9x128xbf16> to vector<2x9x32xbf16>
    "tpu.trace_start"() <{level = 10 : i32, message = "bqd,bkd->bqk"}> : () -> ()
    %cst_20 = arith.constant dense<0.000000e+00> : vector<2x9x9xf32>
    %52 = tpu.matmul %49, %50, %cst_20 {dimension_numbers = #tpu.dot_dimension_numbers<[2], [2], [1], [1], [0, 0, 0, 1, 1, 1], [0], [0]>} : vector<2x9x32xbf16>, vector<2x9x32xbf16>, vector<2x9x9xf32> -> vector<2x9x9xf32>
    "tpu.trace_stop"() : () -> ()
    %cst_21 = arith.constant dense<0xFF800000> : vector<2x9xf32>
    %53 = vector.multi_reduction <maximumf>, %52, %cst_21 [2] : vector<2x9x9xf32> to vector<2x9xf32>
    %54 = vector.shape_cast %53 : vector<2x9xf32> to vector<2x9x1xf32>
    %55 = vector.broadcast %54 : vector<2x9x1xf32> to vector<2x9x9xf32>
    %56 = arith.subf %52, %55 : vector<2x9x9xf32>
    %57 = math.exp %56 : vector<2x9x9xf32>
    %cst_22 = arith.constant dense<0.000000e+00> : vector<2x9xf32>
    %58 = vector.multi_reduction <add>, %57, %cst_22 [2] : vector<2x9x9xf32> to vector<2x9xf32>
    %59 = vector.shape_cast %58 : vector<2x9xf32> to vector<2x9x1xf32>
    %60 = tpu.reciprocal %59 {approx = true} : vector<2x9x1xf32> -> vector<2x9x1xf32>
    %61 = vector.broadcast %60 : vector<2x9x1xf32> to vector<2x9x9xf32>
    %62 = arith.mulf %57, %61 : vector<2x9x9xf32>
    %63 = arith.truncf %62 : vector<2x9x9xf32> to vector<2x9x9xbf16>
    "tpu.trace_start"() <{level = 10 : i32, message = "bqk,bkd->bqd"}> : () -> ()
    %cst_23 = arith.constant dense<0.000000e+00> : vector<2x9x32xf32>
    %64 = tpu.matmul %63, %51, %cst_23 {dimension_numbers = #tpu.dot_dimension_numbers<[2], [1], [1], [2], [0, 0, 0, 1, 1, 2], [0], [0]>} : vector<2x9x9xbf16>, vector<2x9x32xbf16>, vector<2x9x32xf32> -> vector<2x9x32xf32>
    "tpu.trace_stop"() : () -> ()
    %65 = vector.extract_strided_slice %28 {offsets = [0, 0, 64], sizes = [2, 9, 32], strides = [1, 1, 1]} : vector<2x9x128xbf16> to vector<2x9x32xbf16>
    %66 = vector.extract_strided_slice %30 {offsets = [0, 0, 64], sizes = [2, 9, 32], strides = [1, 1, 1]} : vector<2x9x128xbf16> to vector<2x9x32xbf16>
    %67 = vector.extract_strided_slice %32 {offsets = [0, 0, 64], sizes = [2, 9, 32], strides = [1, 1, 1]} : vector<2x9x128xbf16> to vector<2x9x32xbf16>
    "tpu.trace_start"() <{level = 10 : i32, message = "bqd,bkd->bqk"}> : () -> ()
    %cst_24 = arith.constant dense<0.000000e+00> : vector<2x9x9xf32>
    %68 = tpu.matmul %65, %66, %cst_24 {dimension_numbers = #tpu.dot_dimension_numbers<[2], [2], [1], [1], [0, 0, 0, 1, 1, 1], [0], [0]>} : vector<2x9x32xbf16>, vector<2x9x32xbf16>, vector<2x9x9xf32> -> vector<2x9x9xf32>
    "tpu.trace_stop"() : () -> ()
    %cst_25 = arith.constant dense<0xFF800000> : vector<2x9xf32>
    %69 = vector.multi_reduction <maximumf>, %68, %cst_25 [2] : vector<2x9x9xf32> to vector<2x9xf32>
    %70 = vector.shape_cast %69 : vector<2x9xf32> to vector<2x9x1xf32>
    %71 = vector.broadcast %70 : vector<2x9x1xf32> to vector<2x9x9xf32>
    %72 = arith.subf %68, %71 : vector<2x9x9xf32>
    %73 = math.exp %72 : vector<2x9x9xf32>
    %cst_26 = arith.constant dense<0.000000e+00> : vector<2x9xf32>
    %74 = vector.multi_reduction <add>, %73, %cst_26 [2] : vector<2x9x9xf32> to vector<2x9xf32>
    %75 = vector.shape_cast %74 : vector<2x9xf32> to vector<2x9x1xf32>
    %76 = tpu.reciprocal %75 {approx = true} : vector<2x9x1xf32> -> vector<2x9x1xf32>
    %77 = vector.broadcast %76 : vector<2x9x1xf32> to vector<2x9x9xf32>
    %78 = arith.mulf %73, %77 : vector<2x9x9xf32>
    %79 = arith.truncf %78 : vector<2x9x9xf32> to vector<2x9x9xbf16>
    "tpu.trace_start"() <{level = 10 : i32, message = "bqk,bkd->bqd"}> : () -> ()
    %cst_27 = arith.constant dense<0.000000e+00> : vector<2x9x32xf32>
    %80 = tpu.matmul %79, %67, %cst_27 {dimension_numbers = #tpu.dot_dimension_numbers<[2], [1], [1], [2], [0, 0, 0, 1, 1, 2], [0], [0]>} : vector<2x9x9xbf16>, vector<2x9x32xbf16>, vector<2x9x32xf32> -> vector<2x9x32xf32>
    "tpu.trace_stop"() : () -> ()
    %81 = vector.extract_strided_slice %28 {offsets = [0, 0, 96], sizes = [2, 9, 32], strides = [1, 1, 1]} : vector<2x9x128xbf16> to vector<2x9x32xbf16>
    %82 = vector.extract_strided_slice %30 {offsets = [0, 0, 96], sizes = [2, 9, 32], strides = [1, 1, 1]} : vector<2x9x128xbf16> to vector<2x9x32xbf16>
    %83 = vector.extract_strided_slice %32 {offsets = [0, 0, 96], sizes = [2, 9, 32], strides = [1, 1, 1]} : vector<2x9x128xbf16> to vector<2x9x32xbf16>
    "tpu.trace_start"() <{level = 10 : i32, message = "bqd,bkd->bqk"}> : () -> ()
    %cst_28 = arith.constant dense<0.000000e+00> : vector<2x9x9xf32>
    %84 = tpu.matmul %81, %82, %cst_28 {dimension_numbers = #tpu.dot_dimension_numbers<[2], [2], [1], [1], [0, 0, 0, 1, 1, 1], [0], [0]>} : vector<2x9x32xbf16>, vector<2x9x32xbf16>, vector<2x9x9xf32> -> vector<2x9x9xf32>
    "tpu.trace_stop"() : () -> ()
    %cst_29 = arith.constant dense<0xFF800000> : vector<2x9xf32>
    %85 = vector.multi_reduction <maximumf>, %84, %cst_29 [2] : vector<2x9x9xf32> to vector<2x9xf32>
    %86 = vector.shape_cast %85 : vector<2x9xf32> to vector<2x9x1xf32>
    %87 = vector.broadcast %86 : vector<2x9x1xf32> to vector<2x9x9xf32>
    %88 = arith.subf %84, %87 : vector<2x9x9xf32>
    %89 = math.exp %88 : vector<2x9x9xf32>
    %cst_30 = arith.constant dense<0.000000e+00> : vector<2x9xf32>
    %90 = vector.multi_reduction <add>, %89, %cst_30 [2] : vector<2x9x9xf32> to vector<2x9xf32>
    %91 = vector.shape_cast %90 : vector<2x9xf32> to vector<2x9x1xf32>
    %92 = tpu.reciprocal %91 {approx = true} : vector<2x9x1xf32> -> vector<2x9x1xf32>
    %93 = vector.broadcast %92 : vector<2x9x1xf32> to vector<2x9x9xf32>
    %94 = arith.mulf %89, %93 : vector<2x9x9xf32>
    %95 = arith.truncf %94 : vector<2x9x9xf32> to vector<2x9x9xbf16>
    "tpu.trace_start"() <{level = 10 : i32, message = "bqk,bkd->bqd"}> : () -> ()
    %cst_31 = arith.constant dense<0.000000e+00> : vector<2x9x32xf32>
    %96 = tpu.matmul %95, %83, %cst_31 {dimension_numbers = #tpu.dot_dimension_numbers<[2], [1], [1], [2], [0, 0, 0, 1, 1, 2], [0], [0]>} : vector<2x9x9xbf16>, vector<2x9x32xbf16>, vector<2x9x32xf32> -> vector<2x9x32xf32>
    "tpu.trace_stop"() : () -> ()
    %97 = tpu.concatenate %48, %64, %80, %96 in 2 : vector<2x9x32xf32>, vector<2x9x32xf32>, vector<2x9x32xf32>, vector<2x9x32xf32> -> vector<2x9x128xf32>
    %98 = arith.truncf %97 : vector<2x9x128xf32> to vector<2x9x128xbf16>
    "tpu.trace_start"() <{level = 10 : i32, message = "bsd,de->bse"}> : () -> ()
    %cst_32 = arith.constant dense<0.000000e+00> : vector<2x9x128xf32>
    %99 = tpu.matmul %98, %6, %cst_32 {dimension_numbers = #tpu.dot_dimension_numbers<[2], [0], [0, 1], [1], [0, 0, 0, 1, 1, 1], [], []>} : vector<2x9x128xbf16>, vector<128x128xbf16>, vector<2x9x128xf32> -> vector<2x9x128xf32>
    "tpu.trace_stop"() : () -> ()
    %100 = vector.shape_cast %14 : vector<1x128xf32> to vector<1x1x128xf32>
    %101 = vector.broadcast %100 : vector<1x1x128xf32> to vector<2x9x128xf32>
    %102 = arith.addf %99, %101 : vector<2x9x128xf32>
    %103 = arith.addf %21, %102 : vector<2x9x128xf32>
    %cst_33 = arith.constant dense<0.000000e+00> : vector<2x9xf32>
    %104 = vector.multi_reduction <add>, %103, %cst_33 [2] : vector<2x9x128xf32> to vector<2x9xf32>
    %105 = vector.shape_cast %104 : vector<2x9xf32> to vector<2x9x1xf32>
    %cst_34 = arith.constant 1.280000e+02 : f32
    %106 = vector.broadcast %cst_34 : f32 to vector<2x9x1xf32>
    %107 = arith.divf %105, %106 : vector<2x9x1xf32>
    %108 = vector.broadcast %107 : vector<2x9x1xf32> to vector<2x9x128xf32>
    %109 = arith.subf %103, %108 : vector<2x9x128xf32>
    %110 = arith.mulf %109, %109 : vector<2x9x128xf32>
    %cst_35 = arith.constant dense<0.000000e+00> : vector<2x9xf32>
    %111 = vector.multi_reduction <add>, %110, %cst_35 [2] : vector<2x9x128xf32> to vector<2x9xf32>
    %112 = vector.shape_cast %111 : vector<2x9xf32> to vector<2x9x1xf32>
    %cst_36 = arith.constant 1.280000e+02 : f32
    %113 = vector.broadcast %cst_36 : f32 to vector<2x9x1xf32>
    %114 = arith.divf %112, %113 : vector<2x9x1xf32>
    %cst_37 = arith.constant 9.99999974E-6 : f32
    %115 = vector.broadcast %cst_37 : f32 to vector<2x9x1xf32>
    %116 = arith.addf %114, %115 : vector<2x9x1xf32>
    %117 = math.rsqrt %116 : vector<2x9x1xf32>
    %118 = vector.broadcast %117 : vector<2x9x1xf32> to vector<2x9x128xf32>
    %119 = arith.mulf %109, %118 : vector<2x9x128xf32>
    %120 = vector.shape_cast %15 : vector<1x128xf32> to vector<1x1x128xf32>
    %121 = vector.broadcast %120 : vector<1x1x128xf32> to vector<2x9x128xf32>
    %122 = arith.mulf %119, %121 : vector<2x9x128xf32>
    %123 = vector.shape_cast %16 : vector<1x128xf32> to vector<1x1x128xf32>
    %124 = vector.broadcast %123 : vector<1x1x128xf32> to vector<2x9x128xf32>
    %125 = arith.addf %122, %124 : vector<2x9x128xf32>
    %126 = arith.truncf %125 : vector<2x9x128xf32> to vector<2x9x128xbf16>
    "tpu.trace_start"() <{level = 10 : i32, message = "bsd,df->bsf"}> : () -> ()
    %cst_38 = arith.constant dense<0.000000e+00> : vector<2x9x2048xf32>
    %127 = tpu.matmul %126, %8, %cst_38 {dimension_numbers = #tpu.dot_dimension_numbers<[2], [0], [0, 1], [1], [0, 0, 0, 1, 1, 1], [], []>} : vector<2x9x128xbf16>, vector<128x2048xbf16>, vector<2x9x2048xf32> -> vector<2x9x2048xf32>
    "tpu.trace_stop"() : () -> ()
    %128 = vector.shape_cast %20 : vector<1x2048xf32> to vector<1x1x2048xf32>
    %129 = vector.broadcast %128 : vector<1x1x2048xf32> to vector<2x9x2048xf32>
    %130 = arith.addf %127, %129 : vector<2x9x2048xf32>
    %cst_39 = arith.constant 0.000000e+00 : f32
    %131 = vector.broadcast %cst_39 : f32 to vector<2x9x2048xf32>
    %132 = arith.maximumf %130, %131 : vector<2x9x2048xf32>
    %133 = arith.truncf %132 : vector<2x9x2048xf32> to vector<2x9x2048xbf16>
    "tpu.trace_start"() <{level = 10 : i32, message = "bsf,fd->bsd"}> : () -> ()
    %cst_40 = arith.constant dense<0.000000e+00> : vector<2x9x128xf32>
    %134 = tpu.matmul %133, %10, %cst_40 {dimension_numbers = #tpu.dot_dimension_numbers<[2], [0], [0, 1], [1], [0, 0, 0, 1, 1, 1], [], []>} : vector<2x9x2048xbf16>, vector<2048x128xbf16>, vector<2x9x128xf32> -> vector<2x9x128xf32>
    "tpu.trace_stop"() : () -> ()
    %135 = vector.shape_cast %19 : vector<1x128xf32> to vector<1x1x128xf32>
    %136 = vector.broadcast %135 : vector<1x1x128xf32> to vector<2x9x128xf32>
    %137 = arith.addf %134, %136 : vector<2x9x128xf32>
    %138 = arith.addf %125, %137 : vector<2x9x128xf32>
    %cst_41 = arith.constant dense<0.000000e+00> : vector<2x9xf32>
    %139 = vector.multi_reduction <add>, %138, %cst_41 [2] : vector<2x9x128xf32> to vector<2x9xf32>
    %140 = vector.shape_cast %139 : vector<2x9xf32> to vector<2x9x1xf32>
    %cst_42 = arith.constant 1.280000e+02 : f32
    %141 = vector.broadcast %cst_42 : f32 to vector<2x9x1xf32>
    %142 = arith.divf %140, %141 : vector<2x9x1xf32>
    %143 = vector.broadcast %142 : vector<2x9x1xf32> to vector<2x9x128xf32>
    %144 = arith.subf %138, %143 : vector<2x9x128xf32>
    %145 = arith.mulf %144, %144 : vector<2x9x128xf32>
    %cst_43 = arith.constant dense<0.000000e+00> : vector<2x9xf32>
    %146 = vector.multi_reduction <add>, %145, %cst_43 [2] : vector<2x9x128xf32> to vector<2x9xf32>
    %147 = vector.shape_cast %146 : vector<2x9xf32> to vector<2x9x1xf32>
    %cst_44 = arith.constant 1.280000e+02 : f32
    %148 = vector.broadcast %cst_44 : f32 to vector<2x9x1xf32>
    %149 = arith.divf %147, %148 : vector<2x9x1xf32>
    %cst_45 = arith.constant 9.99999974E-6 : f32
    %150 = vector.broadcast %cst_45 : f32 to vector<2x9x1xf32>
    %151 = arith.addf %149, %150 : vector<2x9x1xf32>
    %152 = math.rsqrt %151 : vector<2x9x1xf32>
    %153 = vector.broadcast %152 : vector<2x9x1xf32> to vector<2x9x128xf32>
    %154 = arith.mulf %144, %153 : vector<2x9x128xf32>
    %155 = vector.shape_cast %17 : vector<1x128xf32> to vector<1x1x128xf32>
    %156 = vector.broadcast %155 : vector<1x1x128xf32> to vector<2x9x128xf32>
    %157 = arith.mulf %154, %156 : vector<2x9x128xf32>
    %158 = vector.shape_cast %18 : vector<1x128xf32> to vector<1x1x128xf32>
    %159 = vector.broadcast %158 : vector<1x1x128xf32> to vector<2x9x128xf32>
    %160 = arith.addf %157, %159 : vector<2x9x128xf32>
    %c0_46 = arith.constant 0 : index
    %c0_47 = arith.constant 0 : index
    %c0_48 = arith.constant 0 : index
    %161 = vector.load %arg10[%c0_46, %c0_47, %c0_48] : memref<2x9x128xf32, #tpu.memory_space<vmem>>, vector<2x9x128xf32>
    tpu.vector_store %arg10[%c0_46, %c0_47, %c0_48], %160 {strides = array<i32>} : memref<2x9x128xf32, #tpu.memory_space<vmem>>, vector<2x9x128xf32>,
    %c5_i32 = arith.constant 5 : i32
    %162 = arith.cmpi eq, %arg0, %c5_i32 : i32
    %163 = arith.extui %162 : i1 to i32
    %c0_i32_49 = arith.constant 0 : i32
    %164 = arith.cmpi ne, %163, %c0_i32_49 : i32
    scf.if %164 {
      %165 = vector.extract_strided_slice %160 {offsets = [0, 0, 0], sizes = [2, 1, 128], strides = [1, 1, 1]} : vector<2x9x128xf32> to vector<2x1x128xf32>
      %c0_50 = arith.constant 0 : index
      %c0_51 = arith.constant 0 : index
      %c0_52 = arith.constant 0 : index
      %166 = vector.load %arg8[%c0_50, %c0_51, %c0_52] : memref<2x1x128xf32, #tpu.memory_space<vmem>>, vector<2x1x128xf32>
      tpu.vector_store %arg8[%c0_50, %c0_51, %c0_52], %165 {strides = array<i32>} : memref<2x1x128xf32, #tpu.memory_space<vmem>>, vector<2x1x128xf32>,
    } else {
    }
    return
  }
  func.func @transform_0(%arg0: i32) -> (i32, i32, i32) {
    %c0_i32 = arith.constant 0 : i32
    %c0_i32_0 = arith.constant 0 : i32
    %c0_i32_1 = arith.constant 0 : i32
    %c0_i32_2 = arith.constant 0 : i32
    return %c0_i32, %c0_i32_0, %c0_i32_1 : i32, i32, i32
  }
  func.func @transform_1(%arg0: i32) -> (i32, i32) {
    %c0_i32 = arith.constant 0 : i32
    %c0_i32_0 = arith.constant 0 : i32
    %c0_i32_1 = arith.constant 0 : i32
    return %c0_i32, %c0_i32_0 : i32, i32
  }
  func.func @transform_2(%arg0: i32) -> (i32, i32) {
    %c0_i32 = arith.constant 0 : i32
    %c0_i32_0 = arith.constant 0 : i32
    %c0_i32_1 = arith.constant 0 : i32
    return %c0_i32, %c0_i32_0 : i32, i32
  }
  func.func @transform_3(%arg0: i32) -> (i32, i32) {
    %c0_i32 = arith.constant 0 : i32
    %c0_i32_0 = arith.constant 0 : i32
    %c0_i32_1 = arith.constant 0 : i32
    return %c0_i32, %c0_i32_0 : i32, i32
  }
  func.func @transform_4(%arg0: i32) -> (i32, i32, i32) {
    %c0_i32 = arith.constant 0 : i32
    %c0_i32_0 = arith.constant 0 : i32
    %c0_i32_1 = arith.constant 0 : i32
    return %arg0, %c0_i32, %c0_i32_0 : i32, i32, i32
  }
  func.func @transform_5(%arg0: i32) -> (i32, i32, i32) {
    %c0_i32 = arith.constant 0 : i32
    %c0_i32_0 = arith.constant 0 : i32
    %c0_i32_1 = arith.constant 0 : i32
    return %arg0, %c0_i32, %c0_i32_0 : i32, i32, i32
  }
  func.func @transform_6(%arg0: i32) -> (i32, i32, i32) {
    %c0_i32 = arith.constant 0 : i32
    %c0_i32_0 = arith.constant 0 : i32
    %c0_i32_1 = arith.constant 0 : i32
    return %arg0, %c0_i32, %c0_i32_0 : i32, i32, i32
  }
  func.func @transform_7(%arg0: i32) -> (i32, i32, i32) {
    %c0_i32 = arith.constant 0 : i32
    %c0_i32_0 = arith.constant 0 : i32
    %c0_i32_1 = arith.constant 0 : i32
    %c0_i32_2 = arith.constant 0 : i32
    return %c0_i32, %c0_i32_0, %c0_i32_1 : i32, i32, i32
  }
  func.func @transform_8(%arg0: i32) -> (i32, i32) {
    %c0_i32 = arith.constant 0 : i32
    %c0_i32_0 = arith.constant 0 : i32
    %c0_i32_1 = arith.constant 0 : i32
    return %c0_i32, %c0_i32_0 : i32, i32
  }
}

</mosaic_0001>

<bundles_post_ra>
// kernel: disjoint_encoder_forward.1
= control target key start
LH: loop header
LB: loop body
LE: loop exit
PB: predicated region body
PF: predicated region fallthrough
CT: control target
= control target key end

     0   :  { %s16829_s0 = inlined_call_operand.vmem [shape: f32[2,9,128], index: 0, kind: input, shape index: {}]   ;;  %s16830_s1 = inlined_call_operand.hbm [shape: f32[2,2048], index: 1, kind: input, shape index: {}]   ;;  %s16831_s2 = inlined_call_operand.hbm [shape: bf16[2048,128], index: 2, kind: input, shape index: {}]   ;;  %s16832_s3 = inlined_call_operand.hbm [shape: f32[1,128], index: 3, kind: input, shape index: {}]   ;;  %s16833_s4 = inlined_call_operand.hbm [shape: bf16[6,128,2560], index: 4, kind: input, shape index: {}]   ;;  %s16834_s5 = inlined_call_operand.hbm [shape: bf16[6,2048,128], index: 5, kind: input, shape index: {}]   ;;  %s16835_s6 = inlined_call_operand.hbm [shape: f32[6,1,3200], index: 6, kind: input, shape index: {}]   ;;  %s16836_s7 = inlined_call_operand.hbm [shape: f32[2,1,128], index: 7, kind: output, shape index: {0}]   ;;  %s16837_s8 = inlined_call_operand.hbm [shape: f32[2,128], index: 8, kind: output, shape index: {1}]  }
   0x1   :  { %16872 = sst [smem:[#allocation39_spill]] %s16831_s2 }
   0x2   :  { %16873 = sst [smem:[#allocation40_spill]] %s16833_s4 }
   0x3   :  { %16874 = sst [smem:[#allocation41_spill]] %s16837_s8 }
   0x4   :  { %14 = vsyncpa [#allocation4], 0 }
   0x5   :  { %15 = vsyncpa [#allocation7], 0 }
   0x6   :  { %16 = vsyncpa [#allocation10], 0 }
   0x7   :  { %18 = vsyncpa [#allocation10 + $0x1], 0 }
   0x8   :  { %19 = vsyncpa [#allocation13], 0 }
   0x9   :  { %21 = vsyncpa [#allocation13 + $0x1], 0 }
   0xa   :  { %22 = vsyncpa [#allocation5], 0 }
   0xb   :  { %23 = vsyncpa [#allocation16], 0  ;;  %s14109_s27 = smov 0   ;;  %s14111_s28 = smov 0  }
   0xc   :  { %s14113_s29 = smov 0   ;;  %s14115_s30 = smov 0  }
   0xd LB: > { %16875 = sst [smem:[#allocation23_spill]] %s14035_s29  ;;  %s14128_s9 = sadd.s32 4294967295, %s14039_s30   ;;  %s14039_s30 = sphi %s14115_s30, %s16970_s30   ;;  %s14035_s29 = sphi %s14113_s29, %s16972_s29   ;;  %s14031_s28 = sphi %s14111_s28, %s16974_s28   ;;  %s14027_s27 = sphi %s14109_s27, %s16973_s27  }
   0xe   : > { %s14131_s10 = sadd.s32 1, %s14039_s30   ;;  %s120_s12 = sadd.s32 1, %s14035_s29 }
   0xf   : > { %16876 = sst [smem:[#allocation24_spill]] %s14131_s10  ;;  %s117_s11 = ssub.s32 %s14039_s30, %s14131_s10 }
  0x10   : > { %p118_p0 = scmp.eq.s32.totalorder %s117_s11, 0  ;;  %p127_p1 = scmp.ne.s32.totalorder %s14035_s29, %s14031_s28 }
  0x11   : > { %p128_p2 = scmp.eq.s32.totalorder %s14039_s30, 0  ;;  %p133_p3 = scmp.ne.s32.totalorder %s14031_s28, %s14027_s27 }
  0x12   : > { %s14141_s13 = scalar_select %p118_p0, %s14035_s29, %s120_s12  }
  0x13   : > { %p14143_p4 = por %p128_p2, %p127_p1  ;;  %p16838_p5 = scmp.eq.s32.totalorder %s14128_s9, 0 }
  0x14   : > { %16877 = sst [smem:[#allocation25_spill]] %s14141_s13  ;;  %p11872_p6 = scmp.ge.s32.totalorder %s14039_s30, 1 }
  0x15   : > { %s16878_s14 = scalar_select %p14143_p4, 1, 0 }
  0x16   : > { %p238_p7 = scmp.lt.s32.totalorder %s14039_s30, 7  ;;  %p14152_p8 = por %p16838_p5, %p133_p3 }
  0x17   : > { %s14041_s17 = smov [#allocation6]   ;;  %s289_s20 = sand.u32 1, %s14039_s30  }
  0x18   : > { %s16879_s15 = scalar_select %p14152_p8, 1, 0 }
  0x19   : > { %p14157_p10 = pnand %p11872_p6, %p238_p7  ;;  %s264_s18 = sshll.u32 %s14041_s17, 4  ;;  %s265_s18 = int_to_ptr.vmem [resolvable:$true] %s264_s18 }
  0x1a   : > { %s14172_s21 = sand.u32 1, %s14035_s29   ;;  %s16882_s2 = sld [smem:[#allocation39_spill]] }
  0x1b   : > { %s16880_s16 = scalar_select %p14157_p10, 1, 0 }
  0x1c   : > { %p13071_p11 = pneg %p14157_p10 }
  0x1e   : > { %p14165_p12 = pnand %p13071_p11, %p16838_p5 }
  0x20   : > { %s16881_s19 = scalar_select %p14165_p12, 1, 0 }
  0x21   : > { %s13759_s24 = scalar_lea.hbm %s16882_s2, 16384  ;;  %p14182_p1 = pneg %p14165_p12 }
  0x22   : > { %p13760_p0 = scmp.ne.s32.totalorder %s16882_s2, %s13759_s24  ;;  %p13766_p6 = scmp.lt.u32.totalorder %s13759_s24, %s16882_s2 }
  0x23   : > { %s16883_s27 = scalar_select %p14182_p1, 1, 0 }
  0x24   : > { %p13762_p2 = pnand %p14182_p1, %p13760_p0 }
  0x26   : > { %p13763_p3 = pneg %p13762_p2 }
  0x28   : > { %p13768_p7 = pnand %p13766_p6, %p13763_p3 }
  0x2a   : > { %13771 = shalt.err (!%p13768_p7)
}
  0x2b   : > { %s13772_s17 = scalar_lea.vmem %s265_s18, 16384  ;;  %p13780_p13 = scmp.lt.s32.totalorder %s265_s18, %s265_s18 }
  0x2c   : > { %p13773_p11 = scmp.ne.s32.totalorder %s265_s18, %s13772_s17  ;;  %p13781_p8 = scmp.lt.s32.totalorder %s13772_s17, %s13772_s17 }
  0x2e   : > { %p13775_p9 = pnand %p13773_p11, %p14182_p1  ;;  %p13782_p10 = por %p13781_p8, %p13780_p13 }
  0x30   : > { %p13776_p5 = pneg %p13775_p9 }
  0x32   : > { %p13783_p4 = pnand %p13782_p10, %p13776_p5 }
  0x34   : > { %13786 = shalt.err (!%p13783_p4)
}
  0x35   : > { %s16842_s22 = smov 64   ;;  %s16847_s23 = smov 4  }
  0x36   : > { %13077 = dma.hbm_to_vmem [thread:$0]  (!%p14165_p12), %s16882_s2, 16384, %s265_s18, [#allocation7], %s16842_s22, %s16842_s22, %s16847_s23  }
  0x37   : > { %s13039_s26 = smul.u32 1280, %s14172_s21  ;;  %p16884_p9 = scmp.ne.s32.totalorder %s16878_s14, 0 }
  0x38   : > { %p16885_p8 = scmp.lt.s32.totalorder %s14039_s30, 6  ;;  %s13040_s12 = smul.u32 20480, %s14039_s30 }
  0x39   : > { %s16887_s4 = sld [smem:[#allocation40_spill]]  ;;  %s293_s24 = scalar_lea.vmem [#allocation9], %s13039_s26 }
  0x3a   : > { %p14206_p5 = pnand %p16885_p8, %p16884_p9  ;;  %s300_s18 = sshll.u32 %s293_s24, 4  ;;  %s14216_s18 = int_to_ptr.vmem [resolvable:$true] %s300_s18 }
  0x3b   : > { %s14218_s14 = scalar_lea.sflag [#allocation10], %s289_s20 }
  0x3c   : > { %s16886_s11 = scalar_select %p14206_p5, 1, 0 }
  0x3d   : > { %p14224_p10 = pneg %p14206_p5 }
  0x3f   : > { %s14214_s29 = scalar_lea.hbm %s16887_s4, %s13040_s12  ;;  %s13792_s26 = scalar_lea.hbm %s16887_s4, 122880 }
  0x40   : > { %s13787_s25 = scalar_lea.hbm %s14214_s29, 20480  ;;  %p13793_p2 = scmp.lt.u32.totalorder %s14214_s29, %s16887_s4 }
  0x41   : > { %p13788_p4 = scmp.ne.s32.totalorder %s14214_s29, %s13787_s25  ;;  %p13794_p3 = scmp.lt.u32.totalorder %s13792_s26, %s13787_s25 }
  0x42   : > { %p13796_p7 = scmp.lt.u32.totalorder %s13787_s25, %s14214_s29 }
  0x43   : > { %p13790_p13 = pnand %p14224_p10, %p13788_p4  ;;  %p13795_p6 = por %p13794_p3, %p13793_p2 }
  0x45   : > { %p13791_p0 = pneg %p13790_p13  ;;  %p13797_p11 = por %p13796_p7, %p13795_p6 }
  0x47   : > { %p13798_p9 = pnand %p13797_p11, %p13791_p0 }
  0x49   : > { %13801 = shalt.err (!%p13798_p9)
}
  0x4a   : > { %s13802_s20 = scalar_lea.vmem %s14216_s18, 20480  ;;  %s14044_s13 = smov [#allocation9]  }
  0x4b   : > { %p13803_p8 = scmp.ne.s32.totalorder %s14216_s18, %s13802_s20  ;;  %s13807_s12 = sshll.u32 %s14044_s13, 4  ;;  %s13808_s12 = int_to_ptr.vmem [resolvable:$false] %s13807_s12 }
  0x4c   : > { %s13809_s17 = scalar_lea.vmem %s13808_s12, 40960  ;;  %p13810_p12 = scmp.lt.s32.totalorder %s14216_s18, %s13808_s12 }
  0x4d   : > { %p13805_p4 = pnand %p13803_p8, %p14224_p10  ;;  %p13811_p1 = scmp.lt.s32.totalorder %s13809_s17, %s13802_s20 }
  0x4f   : > { %p13806_p13 = pneg %p13805_p4  ;;  %p13812_p2 = por %p13811_p1, %p13810_p12 }
  0x51   : > { %p13813_p3 = pnand %p13812_p2, %p13806_p13 }
  0x53   : > { %13816 = shalt.err (!%p13813_p3)
}
  0x54   : > { %s14045_s25 = smov 1280   ;;  %s14046_s26 = smov 80  }
  0x55   : > { %13084 = dma.hbm_to_vmem [thread:$0]  (!%p14206_p5), %s14214_s29, 20480, %s14216_s18, %s14218_s14, %s14045_s25, %s14045_s25, %s14046_s26  }
  0x56   : > { %s14047_s24 = smov [#allocation3]   ;;  %s14048_s2 = smov [#allocation8]  }
  0x57   : > { %s254_s23 = sshll.u32 %s14047_s24, 4  ;;  %s278_s13 = sshll.u32 %s14048_s2, 4  ;;  %s255_s23 = int_to_ptr.vmem [resolvable:$true] %s254_s23  ;;  %s14248_s13 = int_to_ptr.vmem [resolvable:$true] %s278_s13 }
  0x58   : > { %s13817_s17 = scalar_lea.hbm %s16830_s1, 512  ;;  %p16889_p1 = scmp.ne.s32.totalorder %s16883_s27, 0 }
  0x59   : > { %p13818_p12 = scmp.ne.s32.totalorder %s16830_s1, %s13817_s17  ;;  %p13824_p7 = scmp.lt.u32.totalorder %s13817_s17, %s16830_s1 }
  0x5b   : > { %p13820_p0 = pnand %p13818_p12, %p16889_p1 }
  0x5d   : > { %p13821_p6 = pneg %p13820_p0 }
  0x5f   : > { %p13826_p11 = pnand %p13824_p7, %p13821_p6 }
  0x61   : > { %13829 = shalt.err (!%p13826_p11)
}
  0x62   : > { %s13830_s2 = scalar_lea.vmem %s255_s23, 512  ;;  %p13838_p13 = scmp.lt.s32.totalorder %s255_s23, %s255_s23 }
  0x63   : > { %p13831_p9 = scmp.ne.s32.totalorder %s255_s23, %s13830_s2  ;;  %p13839_p2 = scmp.lt.s32.totalorder %s13830_s2, %s13830_s2 }
  0x65   : > { %p13833_p8 = pnand %p13831_p9, %p16889_p1  ;;  %p13840_p3 = por %p13839_p2, %p13838_p13 }
  0x67   : > { %p13834_p4 = pneg %p13833_p8 }
  0x69   : > { %p13841_p5 = pnand %p13840_p3, %p13834_p4 }
  0x6b   : > { %13844 = shalt.err (!%p13841_p5)
}
  0x6c   : > { %p16890_p12 = scmp.ne.s32.totalorder %s16881_s19, 0  ;;  %s13845_s25 = scalar_lea.hbm %s16832_s3, 16 }
  0x6d   : > { %p13846_p0 = scmp.ne.s32.totalorder %s16832_s3, %s13845_s25  ;;  %p13852_p5 = scmp.lt.u32.totalorder %s13845_s25, %s16832_s3 }
  0x6e   : > { %13074 = dma.hbm_to_vmem [thread:$0]  (!%p16890_p12), %s16830_s1, 512, %s255_s23, [#allocation4]  }
  0x6f   : > { %p13848_p6 = pnand %p13846_p0, %p16889_p1 }
  0x71   : > { %p13849_p7 = pneg %p13848_p6 }
  0x73   : > { %p13854_p11 = pnand %p13852_p5, %p13849_p7 }
  0x75   : > { %13857 = shalt.err (!%p13854_p11)
}
  0x76   : > { %s13858_s23 = scalar_lea.vmem %s14248_s13, 16  ;;  %s13865_s17 = scalar_lea.vmem %s14248_s13, 32 }
  0x77   : > { %p13859_p9 = scmp.ne.s32.totalorder %s14248_s13, %s13858_s23  ;;  %p13866_p13 = scmp.lt.s32.totalorder %s14248_s13, %s14248_s13 }
  0x78   : > { %p13867_p2 = scmp.lt.s32.totalorder %s13865_s17, %s13858_s23 }
  0x79   : > { %p13861_p8 = pnand %p13859_p9, %p16889_p1 }
  0x7a   : > { %p13868_p3 = por %p13867_p2, %p13866_p13 }
  0x7b   : > { %p13862_p4 = pneg %p13861_p8 }
  0x7d   : > { %p13869_p0 = pnand %p13868_p3, %p13862_p4 }
  0x7f   : > { %13872 = shalt.err (!%p13869_p0)
}
  0x80   : > { %13080 = dma.hbm_to_vmem [thread:$0]  (!%p16890_p12), %s16832_s3, 16, %s14248_s13, [#allocation7]  }
  0x81   : > { %s11878_s27 = sshll.u32 %s14172_s21, 10  ;;  %s12450_s4 = sshll.u32 %s14039_s30, 14 }
  0x82   : > { %s14297_s18 = scalar_lea.hbm %s16834_s5, %s12450_s4  ;;  %s314_s19 = scalar_lea.vmem [#allocation11], %s11878_s27 }
  0x83   : > { %s321_s25 = sshll.u32 %s314_s19, 4  ;;  %s13041_s26 = smul.u32 25, %s14172_s21  ;;  %s14299_s25 = int_to_ptr.vmem [resolvable:$true] %s321_s25 }
  0x84   : > { %s13873_s24 = scalar_lea.hbm %s14297_s18, 16384  ;;  %s13878_s12 = scalar_lea.hbm %s16834_s5, 98304 }
  0x85   : > { %p13874_p1 = scmp.ne.s32.totalorder %s14297_s18, %s13873_s24  ;;  %p13879_p7 = scmp.lt.u32.totalorder %s14297_s18, %s16834_s5 }
  0x86   : > { %p13880_p5 = scmp.lt.u32.totalorder %s13878_s12, %s13873_s24  ;;  %p13882_p9 = scmp.lt.u32.totalorder %s13873_s24, %s14297_s18 }
  0x87   : > { %p13876_p12 = pnand %p13874_p1, %p14224_p10 }
  0x88   : > { %p13881_p11 = por %p13880_p5, %p13879_p7 }
  0x89   : > { %p13877_p6 = pneg %p13876_p12 }
  0x8a   : > { %p13883_p8 = por %p13882_p9, %p13881_p11 }
  0x8c   : > { %p13884_p4 = pnand %p13883_p8, %p13877_p6 }
  0x8e   : > { %13887 = shalt.err (!%p13884_p4)
}
  0x8f   : > { %s13888_s29 = scalar_lea.vmem %s14299_s25, 16384  ;;  %s14049_s2 = smov [#allocation11]  }
  0x90   : > { %p13889_p13 = scmp.ne.s32.totalorder %s14299_s25, %s13888_s29  ;;  %s13893_s27 = sshll.u32 %s14049_s2, 4  ;;  %s13894_s27 = int_to_ptr.vmem [resolvable:$false] %s13893_s27 }
  0x91   : > { %s13895_s4 = scalar_lea.vmem %s13894_s27, 32768  ;;  %p13896_p0 = scmp.lt.s32.totalorder %s14299_s25, %s13894_s27 }
  0x92   : > { %p13891_p2 = pnand %p13889_p13, %p14224_p10  ;;  %p13897_p1 = scmp.lt.s32.totalorder %s13895_s4, %s13888_s29 }
  0x94   : > { %p13892_p3 = pneg %p13891_p2  ;;  %p13898_p12 = por %p13897_p1, %p13896_p0 }
  0x96   : > { %p13899_p7 = pnand %p13898_p12, %p13892_p3 }
  0x98   : > { %13902 = shalt.err (!%p13899_p7)
}
  0x99   : > { %p16891_p6 = scmp.ne.s32.totalorder %s16886_s11, 0  ;;  %s16892_s10 = smov 4  }
  0x9a   : > { %s16893_s8 = smov 64   ;;  %s13042_s19 = smul.u32 400, %s14039_s30 }
  0x9b   : > { %13087 = dma.hbm_to_vmem [thread:$0]  (!%p16891_p6), %s14297_s18, 16384, %s14299_s25, %s14218_s14, %s16893_s8, %s16893_s8, %s16892_s10  }
  0x9c   : > { %s335_s24 = scalar_lea.vmem [#allocation12], %s13041_s26  ;;  %s14333_s23 = scalar_lea.hbm %s16835_s6, %s13042_s19 }
  0x9d   : > { %s343_s13 = sshll.u32 %s335_s24, 4  ;;  %s332_s17 = scalar_lea.sflag [#allocation13], %s14172_s21  ;;  %s344_s13 = int_to_ptr.vmem [resolvable:$true] %s343_s13 }
  0x9e   : > { %s13903_s29 = scalar_lea.hbm %s14333_s23, 400  ;;  %s13908_s18 = scalar_lea.hbm %s16835_s6, 2400 }
  0x9f   : > { %p13904_p5 = scmp.ne.s32.totalorder %s14333_s23, %s13903_s29  ;;  %p13909_p8 = scmp.lt.u32.totalorder %s14333_s23, %s16835_s6 }
  0xa0   : > { %p13910_p4 = scmp.lt.u32.totalorder %s13908_s18, %s13903_s29  ;;  %p13912_p2 = scmp.lt.u32.totalorder %s13903_s29, %s14333_s23 }
  0xa1   : > { %p13906_p11 = pnand %p13904_p5, %p14224_p10 }
  0xa2   : > { %p13911_p13 = por %p13910_p4, %p13909_p8 }
  0xa3   : > { %p13907_p9 = pneg %p13906_p11 }
  0xa4   : > { %p13913_p3 = por %p13912_p2, %p13911_p13 }
  0xa6   : > { %p13914_p0 = pnand %p13913_p3, %p13907_p9 }
  0xa8   : > { %13917 = shalt.err (!%p13914_p0)
}
  0xa9   : > { %s13918_s21 = scalar_lea.vmem %s344_s13, 400  ;;  %s14050_s2 = smov [#allocation12]  }
  0xaa   : > { %p13919_p1 = scmp.ne.s32.totalorder %s344_s13, %s13918_s21  ;;  %s13923_s27 = sshll.u32 %s14050_s2, 4  ;;  %s13924_s27 = int_to_ptr.vmem [resolvable:$false] %s13923_s27 }
  0xab   : > { %s13925_s4 = scalar_lea.vmem %s13924_s27, 800  ;;  %p13926_p5 = scmp.lt.s32.totalorder %s344_s13, %s13924_s27 }
  0xac   : > { %p13921_p12 = pnand %p13919_p1, %p14224_p10  ;;  %p13927_p11 = scmp.lt.s32.totalorder %s13925_s4, %s13918_s21 }
  0xae   : > { %p13922_p7 = pneg %p13921_p12  ;;  %p13928_p6 = por %p13927_p11, %p13926_p5 }
  0xb0   : > { %p13929_p4 = pnand %p13928_p6, %p13922_p7 }
  0xb2   : > { %13932 = shalt.err (!%p13929_p4)
}
  0xb3   : > { %p16894_p8 = scmp.ne.s32.totalorder %s16886_s11, 0  ;;  %p16895_p9 = scmp.ne.s32.totalorder %s16880_s16, 0 }
  0xb5   : > { %13090 = dma.hbm_to_vmem [thread:$0]  (!%p16894_p8), %s14333_s23, 400, %s344_s13, %s332_s17  }
  0xb6   : > { %352 = sbr.rel (%p16895_p9) target bundleno = 5148 (0x141c), region = 48 }
  0xbd   : > { %p16896_p13 = scmp.eq.s32.totalorder %s14128_s9, 0 }
  0xbf   : > { %14002 = dma.done.wait (%p16896_p13), [#allocation4], 512   ;;  %p16897_p10 = pmov %p16896_p13 }
  0xc1   : > { %14004 = vsyncadd (%p16897_p10), [#allocation4], 4294966784  ;;  %p16898_p2 = pmov %p16897_p10 }
  0xc3   : > { %14006 = dma.done.wait (%p16898_p2), [#allocation7], 16400   ;;  %p16899_p3 = pmov %p16898_p2 }
  0xc4   : > { %s366_s22 = sand.u32 1, %s14128_s9   ;;  %s368_s11 = sand.u32 1, %s14031_s28  }
  0xc5   : > { %14008 = vsyncadd (%p16899_p3), [#allocation7], 4294950896  ;;  %s13043_s10 = smul.u32 1280, %s368_s11  ;;  %s367_s16 = scalar_lea.sflag [#allocation10], %s366_s22 }
  0xc6   : > { %p16900_p6 = scmp.ne.s32.totalorder %s16879_s15, 0 }
  0xc7   : > { %s14365_s8 = scalar_lea.vmem [#allocation9], %s13043_s10 }
  0xc8   : > { %14010 = dma.done.wait (%p16900_p6), %s367_s16, 36864  }
  0xc9   : > { %14012 = vsyncadd (%p16900_p6), %s367_s16, 4294930432  ;;  %s11886_s19 = sshll.u32 %s368_s11, 10  ;;  %s13044_s24 = smul.u32 25, %s368_s11 }
  0xca   : > { %s14371_s13 = scalar_lea.vmem [#allocation11], %s11886_s19  ;;  %s385_s20 = scalar_lea.sflag [#allocation13], %s368_s11 }
  0xcb   : > { %s14373_s12 = scalar_lea.vmem [#allocation12], %s13044_s24 }
  0xcc   : > { %14014 = dma.done.wait (%p16900_p6), %s385_s20, 400  }
  0xcd   : > { %14016 = vsyncadd (%p16900_p6), %s385_s20, 4294966896  ;;  %p16901_p0 = scmp.ne.s32.totalorder %s14128_s9, 0 }
  0xce   : > { %v431_v0 = vld [vmem:[%s16829_s0] sm:$0xff] (!%p16901_p0)  ;;  %v432_v1 = vld [vmem:[%s16829_s0 + $0x8] sm:$0x1] (!%p16901_p0)  ;;  %v433_v2 = vld [vmem:[%s16829_s0 + $0x10] sm:$0xff] (!%p16901_p0)  ;;  %v14051_v27 = vmov (!%p16901_p0), 1983009808   ;;  %v455_v29 = vlaneseq (!%p16901_p0) }
  0xcf   : > { %430 = sbr.rel (%p16901_p0) target bundleno = 558 (0x22e), region = 76  ;;  %v434_v3 = vld [vmem:[%s16829_s0 + $0x18] sm:$0x1] (!%p16901_p0)  ;;  %435 = vst [vmem:[#allocation2] sm:$0xff] (!%p16901_p0), %v431_v0  ;;  %436 = vst [vmem:[#allocation2 + $0x8] sm:$0x1] (!%p16901_p0), %v432_v1  ;;  %v453_v28 = vunpack.c.l.s4 (!%p16901_p0), %v14051_v27 }
  0xd0   : > { %437 = vst [vmem:[#allocation2 + $0x10] sm:$0xff] (!%p16901_p0), %v433_v2  ;;  %438 = vst [vmem:[#allocation2 + $0x18] sm:$0x1] (!%p16901_p0), %v434_v3  ;;  %v13154_v4 = vld [vmem:[#allocation6 + $0x40] sm:$0xff] (!%p16901_p0)   ;;  %v13158_v8 = vld [vmem:[#allocation6 + $0x48] sm:$0xff] (!%p16901_p0)   ;;  %v456_v35 = vshrl.u32 (!%p16901_p0), %v455_v29, 7 }
  0xd1   : > { %v13155_v5 = vld [vmem:[#allocation6 + $0xc0] sm:$0xff] (!%p16901_p0)   ;;  %12451 = vmatprep.subr.bf16.mxu0 (!%p16901_p0), %v13154_v4  ;;  %v13159_v9 = vld [vmem:[#allocation6 + $0xc8] sm:$0xff] (!%p16901_p0)   ;;  %v13162_v12 = vld [vmem:[#allocation6 + $0x50] sm:$0xff] (!%p16901_p0)   ;;  %v454_v34 = vunpack.c.0.s8 (!%p16901_p0), %v453_v28 }
  0xd2   : > { %v13156_v6 = vld [vmem:[#allocation6] sm:$0xff] (!%p16901_p0)   ;;  %12473 = vmatprep.subr.bf16.mxu1 (!%p16901_p0), %v13155_v5  ;;  %v13160_v10 = vld [vmem:[#allocation6 + $0x8] sm:$0xff] (!%p16901_p0)   ;;  %v13163_v13 = vld [vmem:[#allocation6 + $0xd0] sm:$0xff] (!%p16901_p0)  }
  0xd3   : > { %v13157_v7 = vld [vmem:[#allocation6 + $0x80] sm:$0xff] (!%p16901_p0)   ;;  %12452 = vmatpush3.bf16.msra.mxu0 (!%p16901_p0), %v13156_v6  ;;  %v13161_v11 = vld [vmem:[#allocation6 + $0x88] sm:$0xff] (!%p16901_p0)   ;;  %v13164_v14 = vld [vmem:[#allocation6 + $0x10] sm:$0xff] (!%p16901_p0)   ;;  %v14393_v40 = vsub.s32 (!%p16901_p0), %v454_v34, %v456_v35 }
  0xd4   : > { %12474 = vmatpush3.bf16.msra.mxu1 (!%p16901_p0), %v13157_v7  ;;  %12453 = vmatprep.subr.bf16.mxu0 (!%p16901_p0), %v13158_v8  ;;  %v13165_v15 = vld [vmem:[#allocation6 + $0x90] sm:$0xff] (!%p16901_p0)   ;;  %v13166_v16 = vld [vmem:[#allocation6 + $0x58] sm:$0xff] (!%p16901_p0)   ;;  %v13170_v20 = vld [vmem:[#allocation6 + $0x60] sm:$0xff] (!%p16901_p0)  }
  0xd5   : > { %12475 = vmatprep.subr.bf16.mxu1 (!%p16901_p0), %v13159_v9  ;;  %v13167_v17 = vld [vmem:[#allocation6 + $0xd8] sm:$0xff] (!%p16901_p0)   ;;  %v13171_v21 = vld [vmem:[#allocation6 + $0xe0] sm:$0xff] (!%p16901_p0)   ;;  %v13174_v24 = vld [vmem:[#allocation6 + $0x68] sm:$0xff] (!%p16901_p0)  }
  0xd6   : > { %v13168_v18 = vld [vmem:[#allocation6 + $0x18] sm:$0xff]   ;;  %v13172_v22 = vld [vmem:[#allocation6 + $0x20] sm:$0xff]   ;;  %v13175_v25 = vld [vmem:[#allocation6 + $0xe8] sm:$0xff]  }
  0xd7   : > { %12454 = vmatpush3.bf16.msra.mxu0 %v13160_v10  ;;  %v13169_v19 = vld [vmem:[#allocation6 + $0x98] sm:$0xff]   ;;  %v13173_v23 = vld [vmem:[#allocation6 + $0xa0] sm:$0xff]   ;;  %v13176_v26 = vld [vmem:[#allocation6 + $0x28] sm:$0xff]  }
  0xd8   : > { %12476 = vmatpush3.bf16.msra.mxu1 %v13161_v11  ;;  %12455 = vmatprep.subr.bf16.mxu0 %v13162_v12  ;;  %v13177_v30 = vld [vmem:[#allocation6 + $0xa8] sm:$0xff]   ;;  %v13178_v31 = vld [vmem:[#allocation6 + $0x70] sm:$0xff]   ;;  %v13182_v37 = vld [vmem:[#allocation6 + $0x78] sm:$0xff]  }
  0xd9   : > { %12477 = vmatprep.subr.bf16.mxu1 %v13163_v13  ;;  %v13179_v32 = vld [vmem:[#allocation6 + $0xf0] sm:$0xff]   ;;  %v13183_v38 = vld [vmem:[#allocation6 + $0xf8] sm:$0xff]   ;;  %v439_v42 = vld [vmem:[#allocation3] sm:$0xff] }
  0xda   : > { %v13180_v33 = vld [vmem:[#allocation6 + $0x30] sm:$0xff]   ;;  %v13184_v39 = vld [vmem:[#allocation6 + $0x38] sm:$0xff]   ;;  %v443_v43 = vmax.f32 %v439_v42, 0.0  ;;  %v13186_v44 = vld [vmem:[#allocation6 + $0x140] sm:$0xff]  }
  0xdb   : > { %12456 = vmatpush3.bf16.msra.mxu0 %v13164_v14  ;;  %v13181_v36 = vld [vmem:[#allocation6 + $0xb0] sm:$0xff]   ;;  %v13185_v41 = vld [vmem:[#allocation6 + $0xb8] sm:$0xff]   ;;  %v13187_v45 = vld [vmem:[#allocation6 + $0x1c0] sm:$0xff]  }
  0xdc   : > { %12478 = vmatpush3.bf16.msra.mxu1 %v13165_v15  ;;  %12457 = vmatprep.subr.bf16.mxu0 %v13166_v16  ;;  %v458_v46 = vrot.slane %v443_v43, %v14393_v40  ;;  %v451_v47 = vcombine.high %v443_v43, %v443_v43  ;;  %v13188_v51 = vld [vmem:[#allocation6 + $0x100] sm:$0xff]   ;;  %v13190_v56 = vld [vmem:[#allocation6 + $0x148] sm:$0xff]   ;;  %v13194_v61 = vld [vmem:[#allocation6 + $0x150] sm:$0xff]  }
  0xdd   : > { %12479 = vmatprep.subr.bf16.mxu1 %v13167_v17  ;;  %v13189_v54 = vld [vmem:[#allocation6 + $0x180] sm:$0xff]   ;;  %v13191_v58 = vld [vmem:[#allocation6 + $0x1c8] sm:$0xff]   ;;  %v13195_v62 = vld [vmem:[#allocation6 + $0x1d0] sm:$0xff]  }
  0xde   : > { %v466_v48 = vcombine.high %v458_v46, %v458_v46  ;;  %v465_v49 = vrot.slane %v451_v47, %v14393_v40  ;;  %v535_v50 = vpack.c.bf16 %v458_v46, %v458_v46  ;;  %v13192_v59 = vld [vmem:[#allocation6 + $0x108] sm:$0xff]   ;;  %v13196_v63 = vld [vmem:[#allocation6 + $0x110] sm:$0xff]   ;;  %v13198_v1 = vld [vmem:[#allocation6 + $0x158] sm:$0xff]  }
  0xdf   : > { %12458 = vmatpush3.bf16.msra.mxu0 %v13168_v18  ;;  %v13193_v60 = vld [vmem:[#allocation6 + $0x188] sm:$0xff]   ;;  %v13197_v0 = vld [vmem:[#allocation6 + $0x190] sm:$0xff]   ;;  %v13199_v2 = vld [vmem:[#allocation6 + $0x1d8] sm:$0xff]  }
  0xe0   : > { %12480 = vmatpush3.bf16.msra.mxu1 %v13169_v19  ;;  %12459 = vmatprep.subr.bf16.mxu0 %v13170_v20  ;;  %v536_v52 = vpack.c.bf16 %v466_v48, %v466_v48  ;;  %v467_v53 = vcombine.high %v465_v49, %v465_v49  ;;  %v537_v55 = vpack.c.bf16 %v465_v49, %v465_v49  ;;  %v13200_v3 = vld [vmem:[#allocation6 + $0x118] sm:$0xff]   ;;  %v13202_v5 = vld [vmem:[#allocation6 + $0x160] sm:$0xff]   ;;  %v13206_v9 = vld [vmem:[#allocation6 + $0x168] sm:$0xff]  }
  0xe1   : > { %12481 = vmatprep.subr.bf16.mxu1 %v13171_v21  ;;  %v13201_v4 = vld [vmem:[#allocation6 + $0x198] sm:$0xff]   ;;  %v13203_v6 = vld [vmem:[#allocation6 + $0x1e0] sm:$0xff]   ;;  %v13207_v10 = vld [vmem:[#allocation6 + $0x1e8] sm:$0xff]  }
  0xe2   : > { %1614 = vmatprep.mubr.bf16.mxu0 %v536_v52  ;;  %v538_v57 = vpack.c.bf16 %v467_v53, %v467_v53  ;;  %v13204_v7 = vld [vmem:[#allocation6 + $0x120] sm:$0xff]   ;;  %v13208_v11 = vld [vmem:[#allocation6 + $0x128] sm:$0xff]   ;;  %v13210_v13 = vld [vmem:[#allocation6 + $0x170] sm:$0xff]  }
  0xe3   : > { %12460 = vmatpush3.bf16.msra.mxu0 %v13172_v22  ;;  %v13205_v8 = vld [vmem:[#allocation6 + $0x1a0] sm:$0xff]   ;;  %v13209_v12 = vld [vmem:[#allocation6 + $0x1a8] sm:$0xff]   ;;  %v13211_v14 = vld [vmem:[#allocation6 + $0x1f0] sm:$0xff]  }
  0xe4   : > { %12482 = vmatpush3.bf16.msra.mxu1 %v13173_v23  ;;  %12461 = vmatprep.subr.bf16.mxu0 %v13174_v24  ;;  %v13212_v15 = vld [vmem:[#allocation6 + $0x130] sm:$0xff]   ;;  %v13214_v17 = vld [vmem:[#allocation6 + $0x178] sm:$0xff]   ;;  %v440_v18 = vld [vmem:[#allocation3 + $0x8] sm:$0xff] }
  0xe5   : > { %12483 = vmatprep.subr.bf16.mxu1 %v13175_v25  ;;  %1654 = vmatprep.mubr.bf16.mxu1 %v538_v57  ;;  %v13213_v16 = vld [vmem:[#allocation6 + $0x1b0] sm:$0xff]   ;;  %v13215_v19 = vld [vmem:[#allocation6 + $0x1f8] sm:$0xff]   ;;  %v444_v20 = vmax.f32 %v440_v18, 0.0  ;;  %v13218_v25 = vld [vmem:[#allocation6 + $0x240] sm:$0xff]  }
  0xe6   : > { %v13216_v21 = vld [vmem:[#allocation6 + $0x138] sm:$0xff]   ;;  %v13219_v28 = vld [vmem:[#allocation6 + $0x2c0] sm:$0xff]   ;;  %v13222_v35 = vld [vmem:[#allocation6 + $0x248] sm:$0xff]  }
  0xe7   : > { %12462 = vmatpush3.bf16.msra.mxu0 %v13176_v26  ;;  %v13217_v22 = vld [vmem:[#allocation6 + $0x1b8] sm:$0xff]   ;;  %v475_v23 = vrot.slane %v444_v20, %v14393_v40  ;;  %v468_v24 = vcombine.high %v444_v20, %v444_v20  ;;  %v13227_v42 = vld [vmem:[#allocation6 + $0x2d0] sm:$0xff]   ;;  %v13234_v49 = vld [vmem:[#allocation6 + $0x260] sm:$0xff]  }
  0xe8   : > { %12484 = vmatpush3.bf16.msra.mxu1 %v13177_v30  ;;  %12463 = vmatprep.subr.bf16.mxu0 %v13178_v31  ;;  %v13220_v30 = vld [vmem:[#allocation6 + $0x200] sm:$0xff]   ;;  %v13228_v43 = vld [vmem:[#allocation6 + $0x210] sm:$0xff]   ;;  %v13231_v46 = vld [vmem:[#allocation6 + $0x2d8] sm:$0xff]  }
  0xe9   : > { %12485 = vmatprep.subr.bf16.mxu1 %v13179_v32  ;;  %v483_v26 = vcombine.high %v475_v23, %v475_v23  ;;  %v482_v27 = vrot.slane %v468_v24, %v14393_v40  ;;  %v539_v29 = vpack.c.bf16 %v475_v23, %v475_v23  ;;  %v13232_v47 = vld [vmem:[#allocation6 + $0x218] sm:$0xff]   ;;  %v13237_v52 = vld [vmem:[#allocation6 + $0x2a0] sm:$0xff]   ;;  %v13238_v53 = vld [vmem:[#allocation6 + $0x268] sm:$0xff]  }
  0xea   : > { %v13233_v48 = vld [vmem:[#allocation6 + $0x298] sm:$0xff]   ;;  %v13242_v57 = vld [vmem:[#allocation6 + $0x270] sm:$0xff]   ;;  %v13256_v18 = vld [vmem:[#allocation6 + $0x308] sm:$0xff]  }
  0xeb   : > { %12464 = vmatpush3.bf16.msra.mxu0 %v13180_v33  ;;  %v540_v31 = vpack.c.bf16 %v483_v26, %v483_v26  ;;  %v484_v32 = vcombine.high %v482_v27, %v482_v27  ;;  %v13221_v33 = vld [vmem:[#allocation6 + $0x280] sm:$0xff]   ;;  %v541_v34 = vpack.c.bf16 %v482_v27, %v482_v27  ;;  %v13257_v20 = vld [vmem:[#allocation6 + $0x388] sm:$0xff]   ;;  %v13262_v23 = vld [vmem:[#allocation6 + $0x358] sm:$0xff]  }
  0xec   : > { %12486 = vmatpush3.bf16.msra.mxu1 %v13181_v36  ;;  %12465 = vmatprep.subr.bf16.mxu0 %v13182_v37  ;;  %v13223_v37 = vld [vmem:[#allocation6 + $0x2c8] sm:$0xff]   ;;  %v13261_v24 = vld [vmem:[#allocation6 + $0x390] sm:$0xff]   ;;  %v13264_v26 = vld [vmem:[#allocation6 + $0x318] sm:$0xff]  }
  0xed   : > { %12487 = vmatprep.subr.bf16.mxu1 %v13183_v38  ;;  %v542_v36 = vpack.c.bf16 %v484_v32, %v484_v32  ;;  %v13224_v38 = vld [vmem:[#allocation6 + $0x208] sm:$0xff]   ;;  %v13266_v27 = vld [vmem:[#allocation6 + $0x360] sm:$0xff]  }
  0xee   : > { %v13269_v32 = vld [vmem:[#allocation6 + $0x3a0] sm:$0xff]  }
  0xef   : > { %12466 = vmatpush3.bf16.msra.mxu0 %v13184_v39  ;;  %v13225_v39 = vld [vmem:[#allocation6 + $0x288] sm:$0xff]  }
  0xf0   : > { %12488 = vmatpush3.bf16.msra.mxu1 %v13185_v41  ;;  %12495 = vmatprep.subr.bf16.mxu0 %v13186_v44  ;;  %v13226_v41 = vld [vmem:[#allocation6 + $0x250] sm:$0xff]  }
  0xf1   : > { %12517 = vmatprep.subr.bf16.mxu1 %v13187_v45  ;;  %v13229_v44 = vld [vmem:[#allocation6 + $0x290] sm:$0xff]   ;;  %v13230_v45 = vld [vmem:[#allocation6 + $0x258] sm:$0xff]  }
  0xf2   : > { %1615 = vmatmul.mubr.bf16.vlgmr.msra.gmra.mrb[0].mxu0 %v535_v50  ;;  %v13235_v50 = vld [vmem:[#allocation6 + $0x2e0] sm:$0xff]  }
  0xf3   : > { %12496 = vmatpush3.bf16.msra.mxu0 %v13188_v51  ;;  %1655 = vmatmul.mubr.bf16.vlgmr.msra.gmra.mrb[0].mxu1 %v537_v55  ;;  %v13236_v51 = vld [vmem:[#allocation6 + $0x220] sm:$0xff]   ;;  %v13240_v55 = vld [vmem:[#allocation6 + $0x228] sm:$0xff]  }
  0xf4   : > { %12497 = vmatprep.subr.bf16.mxu0 %v13190_v56  ;;  %12518 = vmatpush3.bf16.msra.mxu1 %v13189_v54  ;;  %v13239_v54 = vld [vmem:[#allocation6 + $0x2e8] sm:$0xff]  }
  0xf5   : > { %12519 = vmatprep.subr.bf16.mxu1 %v13191_v58  ;;  %1694 = vmatprep.mubr.bf16.mxu0 %v540_v31  ;;  %v13241_v56 = vld [vmem:[#allocation6 + $0x2a8] sm:$0xff]   ;;  %v13243_v58 = vld [vmem:[#allocation6 + $0x2f0] sm:$0xff]  }
  0xf6   : > { %1734 = vmatprep.mubr.bf16.mxu1 %v542_v36  ;;  %v13270_v31 = vld [vmem:[#allocation6 + $0x368] sm:$0xff]  }
  0xf7   : > { %12498 = vmatpush3.bf16.msra.mxu0 %v13192_v59  ;;  %v13244_v59 = vld [vmem:[#allocation6 + $0x230] sm:$0xff]   ;;  %v13273_v36 = vld [vmem:[#allocation6 + $0x3a8] sm:$0xff]  }
  0xf8   : > { %12499 = vmatprep.subr.bf16.mxu0 %v13194_v61  ;;  %12520 = vmatpush3.bf16.msra.mxu1 %v13193_v60  ;;  %v13245_v60 = vld [vmem:[#allocation6 + $0x2b0] sm:$0xff]   ;;  %v13246_v61 = vld [vmem:[#allocation6 + $0x278] sm:$0xff]  }
  0xf9   : > { %12521 = vmatprep.subr.bf16.mxu1 %v13195_v62  ;;  %v441_v62 = vld [vmem:[#allocation3 + $0x10] sm:$0xff] }
  0xfb   : > { %12500 = vmatpush3.bf16.msra.mxu0 %v13196_v63  ;;  %v13247_v63 = vld [vmem:[#allocation6 + $0x2f8] sm:$0xff]  }
  0xfc   : > { %12501 = vmatprep.subr.bf16.mxu0 %v13198_v1  ;;  %12522 = vmatpush3.bf16.msra.mxu1 %v13197_v0  ;;  %v445_v0 = vmax.f32 %v441_v62, 0.0  ;;  %v13248_v1 = vld [vmem:[#allocation6 + $0x238] sm:$0xff]  }
  0xfd   : > { %12523 = vmatprep.subr.bf16.mxu1 %v13199_v2 }
  0xfe   : > { %v492_v2 = vrot.slane %v445_v0, %v14393_v40 }
  0xff   : > { %12502 = vmatpush3.bf16.msra.mxu0 %v13200_v3  ;;  %v485_v3 = vcombine.high %v445_v0, %v445_v0 }
 0x100   : > { %12503 = vmatprep.subr.bf16.mxu0 %v13202_v5  ;;  %12524 = vmatpush3.bf16.msra.mxu1 %v13201_v4  ;;  %v13250_v4 = vld [vmem:[#allocation6 + $0x340] sm:$0xff]   ;;  %v13249_v5 = vld [vmem:[#allocation6 + $0x2b8] sm:$0xff]  }
 0x101   : > { %12525 = vmatprep.subr.bf16.mxu1 %v13203_v6  ;;  %v500_v6 = vcombine.high %v492_v2, %v492_v2 }
 0x103   : > { %12504 = vmatpush3.bf16.msra.mxu0 %v13204_v7  ;;  %v499_v7 = vrot.slane %v485_v3, %v14393_v40 }
 0x104   : > { %12505 = vmatprep.subr.bf16.mxu0 %v13206_v9  ;;  %12526 = vmatpush3.bf16.msra.mxu1 %v13205_v8  ;;  %v13251_v8 = vld [vmem:[#allocation6 + $0x3c0] sm:$0xff]   ;;  %v543_v9 = vpack.c.bf16 %v492_v2, %v492_v2 }
 0x105   : > { %12527 = vmatprep.subr.bf16.mxu1 %v13207_v10  ;;  %v544_v10 = vpack.c.bf16 %v500_v6, %v500_v6 }
 0x107   : > { %12506 = vmatpush3.bf16.msra.mxu0 %v13208_v11  ;;  %v501_v11 = vcombine.high %v499_v7, %v499_v7 }
 0x108   : > { %12507 = vmatprep.subr.bf16.mxu0 %v13210_v13  ;;  %12528 = vmatpush3.bf16.msra.mxu1 %v13209_v12  ;;  %v13252_v12 = vld [vmem:[#allocation6 + $0x300] sm:$0xff]   ;;  %v545_v13 = vpack.c.bf16 %v499_v7, %v499_v7 }
 0x109   : > { %12529 = vmatprep.subr.bf16.mxu1 %v13211_v14  ;;  %v13254_v14 = vld [vmem:[#allocation6 + $0x348] sm:$0xff]  }
 0x10b   : > { %12508 = vmatpush3.bf16.msra.mxu0 %v13212_v15  ;;  %v546_v15 = vpack.c.bf16 %v501_v11, %v501_v11 }
 0x10c   : > { %12509 = vmatprep.subr.bf16.mxu0 %v13214_v17  ;;  %12530 = vmatpush3.bf16.msra.mxu1 %v13213_v16  ;;  %v13253_v16 = vld [vmem:[#allocation6 + $0x380] sm:$0xff]   ;;  %v13255_v17 = vld [vmem:[#allocation6 + $0x3c8] sm:$0xff]  }
 0x10d   : > { %12531 = vmatprep.subr.bf16.mxu1 %v13215_v19  ;;  %v13258_v19 = vld [vmem:[#allocation6 + $0x350] sm:$0xff]  }
 0x10f   : > { %12510 = vmatpush3.bf16.msra.mxu0 %v13216_v21  ;;  %v13259_v21 = vld [vmem:[#allocation6 + $0x3d0] sm:$0xff]  }
 0x110   : > { %12539 = vmatprep.subr.bf16.mxu0 %v13218_v25  ;;  %12532 = vmatpush3.bf16.msra.mxu1 %v13217_v22  ;;  %v13260_v22 = vld [vmem:[#allocation6 + $0x310] sm:$0xff]   ;;  %v13263_v25 = vld [vmem:[#allocation6 + $0x3d8] sm:$0xff]  }
 0x111   : > { %12561 = vmatprep.subr.bf16.mxu1 %v13219_v28  ;;  %v13265_v28 = vld [vmem:[#allocation6 + $0x398] sm:$0xff]  }
 0x112   : > { %1695 = vmatmul.mubr.bf16.vlgmr.msra.gmra.mrb[4].mxu0 %v539_v29  ;;  %v13267_v29 = vld [vmem:[#allocation6 + $0x3e0] sm:$0xff]  }
 0x113   : > { %12540 = vmatpush3.bf16.msra.mxu0 %v13220_v30  ;;  %1735 = vmatmul.mubr.bf16.vlgmr.msra.gmra.mrb[4].mxu1 %v541_v34  ;;  %v13268_v30 = vld [vmem:[#allocation6 + $0x320] sm:$0xff]   ;;  %v13272_v34 = vld [vmem:[#allocation6 + $0x328] sm:$0xff]  }
 0x114   : > { %12541 = vmatprep.subr.bf16.mxu0 %v13222_v35  ;;  %12562 = vmatpush3.bf16.msra.mxu1 %v13221_v33  ;;  %v13271_v33 = vld [vmem:[#allocation6 + $0x3e8] sm:$0xff]   ;;  %v13274_v35 = vld [vmem:[#allocation6 + $0x370] sm:$0xff]  }
 0x115   : > { %12563 = vmatprep.subr.bf16.mxu1 %v13223_v37  ;;  %1774 = vmatprep.mubr.bf16.mxu0 %v544_v10  ;;  %v13275_v37 = vld [vmem:[#allocation6 + $0x3f0] sm:$0xff]  }
 0x116   : > { %1814 = vmatprep.mubr.bf16.mxu1 %v546_v15 }
 0x117   : > { %12542 = vmatpush3.bf16.msra.mxu0 %v13224_v38  ;;  %v13276_v38 = vld [vmem:[#allocation6 + $0x330] sm:$0xff]  }
 0x118   : > { %12543 = vmatprep.subr.bf16.mxu0 %v13226_v41  ;;  %12564 = vmatpush3.bf16.msra.mxu1 %v13225_v39  ;;  %v13278_v39 = vld [vmem:[#allocation6 + $0x378] sm:$0xff]  }
 0x119   : > { %12565 = vmatprep.subr.bf16.mxu1 %v13227_v42  ;;  %v442_v41 = vld [vmem:[#allocation3 + $0x18] sm:$0xff]  ;;  %v13277_v42 = vld [vmem:[#allocation6 + $0x3b0] sm:$0xff]  }
 0x11b   : > { %12544 = vmatpush3.bf16.msra.mxu0 %v13228_v43  ;;  %v446_v43 = vmax.f32 %v442_v41, 0.0 }
 0x11c   : > { %12545 = vmatprep.subr.bf16.mxu0 %v13230_v45  ;;  %12566 = vmatpush3.bf16.msra.mxu1 %v13229_v44  ;;  %v13279_v44 = vld [vmem:[#allocation6 + $0x3f8] sm:$0xff]  }
 0x11d   : > { %12567 = vmatprep.subr.bf16.mxu1 %v13231_v46  ;;  %v13280_v45 = vld [vmem:[#allocation6 + $0x338] sm:$0xff]   ;;  %v509_v46 = vrot.slane %v446_v43, %v14393_v40 }
 0x11f   : > { %12546 = vmatpush3.bf16.msra.mxu0 %v13232_v47  ;;  %v502_v47 = vcombine.high %v446_v43, %v446_v43 }
 0x120   : > { %12547 = vmatprep.subr.bf16.mxu0 %v13234_v49  ;;  %12568 = vmatpush3.bf16.msra.mxu1 %v13233_v48  ;;  %v13281_v48 = vld [vmem:[#allocation6 + $0x3b8] sm:$0xff]   ;;  %v517_v49 = vcombine.high %v509_v46, %v509_v46 }
 0x121   : > { %12569 = vmatprep.subr.bf16.mxu1 %v13235_v50  ;;  %v516_v50 = vrot.slane %v502_v47, %v14393_v40 }
 0x123   : > { %12548 = vmatpush3.bf16.msra.mxu0 %v13236_v51  ;;  %v547_v51 = vpack.c.bf16 %v509_v46, %v509_v46 }
 0x124   : > { %12549 = vmatprep.subr.bf16.mxu0 %v13238_v53  ;;  %12570 = vmatpush3.bf16.msra.mxu1 %v13237_v52  ;;  %v548_v52 = vpack.c.bf16 %v517_v49, %v517_v49  ;;  %v518_v53 = vcombine.high %v516_v50, %v516_v50 }
 0x125   : > { %12571 = vmatprep.subr.bf16.mxu1 %v13239_v54  ;;  %v549_v54 = vpack.c.bf16 %v516_v50, %v516_v50 }
 0x127   : > { %12550 = vmatpush3.bf16.msra.mxu0 %v13240_v55  ;;  %v550_v55 = vpack.c.bf16 %v518_v53, %v518_v53 }
 0x128   : > { %12551 = vmatprep.subr.bf16.mxu0 %v13242_v57  ;;  %12572 = vmatpush3.bf16.msra.mxu1 %v13241_v56  ;;  %v11888_v57 = vld [vmem:[#allocation8] ss:$0 sm:$0xff] }
 0x129   : > { %12573 = vmatprep.subr.bf16.mxu1 %v13243_v58 }
 0x12b   : > { %12552 = vmatpush3.bf16.msra.mxu0 %v13244_v59 }
 0x12c   : > { %12553 = vmatprep.subr.bf16.mxu0 %v13246_v61  ;;  %12574 = vmatpush3.bf16.msra.mxu1 %v13245_v60 }
 0x12d   : > { %12575 = vmatprep.subr.bf16.mxu1 %v13247_v63 }
 0x12f   : > { %12554 = vmatpush3.bf16.msra.mxu0 %v13248_v1 }
 0x130   : > { %12583 = vmatprep.subr.bf16.mxu0 %v13250_v4  ;;  %12576 = vmatpush3.bf16.msra.mxu1 %v13249_v5 }
 0x131   : > { %12605 = vmatprep.subr.bf16.mxu1 %v13251_v8 }
 0x132   : > { %1775 = vmatmul.mubr.bf16.vlgmr.msra.gmra.mrb[8].mxu0 %v543_v9 }
 0x133   : > { %12584 = vmatpush3.bf16.msra.mxu0 %v13252_v12  ;;  %1815 = vmatmul.mubr.bf16.vlgmr.msra.gmra.mrb[8].mxu1 %v545_v13 }
 0x134   : > { %12585 = vmatprep.subr.bf16.mxu0 %v13254_v14  ;;  %12606 = vmatpush3.bf16.msra.mxu1 %v13253_v16 }
 0x135   : > { %12607 = vmatprep.subr.bf16.mxu1 %v13255_v17  ;;  %1854 = vmatprep.mubr.bf16.mxu0 %v548_v52 }
 0x136   : > { %1894 = vmatprep.mubr.bf16.mxu1 %v550_v55 }
 0x137   : > { %12586 = vmatpush3.bf16.msra.mxu0 %v13256_v18 }
 0x138   : > { %12587 = vmatprep.subr.bf16.mxu0 %v13258_v19  ;;  %12608 = vmatpush3.bf16.msra.mxu1 %v13257_v20 }
 0x139   : > { %12609 = vmatprep.subr.bf16.mxu1 %v13259_v21 }
 0x13b   : > { %12588 = vmatpush3.bf16.msra.mxu0 %v13260_v22 }
 0x13c   : > { %12589 = vmatprep.subr.bf16.mxu0 %v13262_v23  ;;  %12610 = vmatpush3.bf16.msra.mxu1 %v13261_v24 }
 0x13d   : > { %12611 = vmatprep.subr.bf16.mxu1 %v13263_v25 }
 0x13f   : > { %12590 = vmatpush3.bf16.msra.mxu0 %v13264_v26 }
 0x140   : > { %12591 = vmatprep.subr.bf16.mxu0 %v13266_v27  ;;  %12612 = vmatpush3.bf16.msra.mxu1 %v13265_v28 }
 0x141   : > { %12613 = vmatprep.subr.bf16.mxu1 %v13267_v29 }
 0x143   : > { %12592 = vmatpush3.bf16.msra.mxu0 %v13268_v30 }
 0x144   : > { %12593 = vmatprep.subr.bf16.mxu0 %v13270_v31  ;;  %12614 = vmatpush3.bf16.msra.mxu1 %v13269_v32 }
 0x145   : > { %12615 = vmatprep.subr.bf16.mxu1 %v13271_v33 }
 0x147   : > { %12594 = vmatpush3.bf16.msra.mxu0 %v13272_v34 }
 0x148   : > { %12595 = vmatprep.subr.bf16.mxu0 %v13274_v35  ;;  %12616 = vmatpush3.bf16.msra.mxu1 %v13273_v36 }
 0x149   : > { %12617 = vmatprep.subr.bf16.mxu1 %v13275_v37 }
 0x14b   : > { %12596 = vmatpush3.bf16.msra.mxu0 %v13276_v38 }
 0x14c   : > { %12597 = vmatprep.subr.bf16.mxu0 %v13278_v39  ;;  %12618 = vmatpush3.bf16.msra.mxu1 %v13277_v42 }
 0x14d   : > { %12619 = vmatprep.subr.bf16.mxu1 %v13279_v44 }
 0x14f   : > { %12598 = vmatpush3.bf16.msra.mxu0 %v13280_v45 }
 0x150   : > { %12620 = vmatpush3.bf16.msra.mxu1 %v13281_v48 }
 0x152   : > { %1855 = vmatmul.mubr.bf16.vlgmr.msra.gmra.mrb[12].mxu0 %v547_v51 }
 0x153   : > { %1895 = vmatmul.mubr.bf16.vlgmr.msra.gmra.mrb[12].mxu1 %v549_v54 }
 0x1c5   : > { %v12467_v56 = vpop.f32.mrb[0].mxu0 }
 0x1c6   : > { %v12468_v58 = vpop.f32.mrb[1].mxu0  ;;  %v12489_v59 = vpop.f32.mrb[0].mxu1 }
 0x1c7   : > { %v12469_v60 = vadd.f32 %v12468_v58, %v12467_v56  ;;  %v12470_v61 = vpop.f32.mrb[2].mxu0  ;;  %v12490_v62 = vpop.f32.mrb[1].mxu1 }
 0x1c8   : > { %v12471_v40 = vpop.f32.mrb[3].mxu0  ;;  %v12491_v0 = vadd.f32 %v12490_v62, %v12489_v59  ;;  %v12492_v1 = vpop.f32.mrb[2].mxu1 }
 0x1c9   : > { %v1617_v63 = vadd.f32 %v12469_v60, %v11888_v57  ;;  %v12493_v2 = vpop.f32.mrb[3].mxu1 }
 0x1cb   : > { %v1657_v3 = vadd.f32 %v12491_v0, %v1617_v63 }
 0x1e5   : > { %v12511_v4 = vpop.f32.mrb[4].mxu0 }
 0x1e6   : > { %v12512_v5 = vpop.f32.mrb[5].mxu0  ;;  %v12533_v6 = vpop.f32.mrb[4].mxu1 }
 0x1e7   : > { %v12513_v7 = vadd.f32 %v12512_v5, %v12511_v4  ;;  %v12514_v8 = vpop.f32.mrb[6].mxu0  ;;  %v12534_v9 = vpop.f32.mrb[5].mxu1 }
 0x1e8   : > { %v12515_v10 = vpop.f32.mrb[7].mxu0  ;;  %v12535_v12 = vadd.f32 %v12534_v9, %v12533_v6  ;;  %v12536_v13 = vpop.f32.mrb[6].mxu1 }
 0x1e9   : > { %v1697_v11 = vadd.f32 %v12513_v7, %v1657_v3  ;;  %v12537_v14 = vpop.f32.mrb[7].mxu1 }
 0x1eb   : > { %v1737_v15 = vadd.f32 %v12535_v12, %v1697_v11 }
 0x205   : > { %v12555_v16 = vpop.f32.mrb[8].mxu0 }
 0x206   : > { %v12556_v17 = vpop.f32.mrb[9].mxu0  ;;  %v12577_v18 = vpop.f32.mrb[8].mxu1 }
 0x207   : > { %v12557_v19 = vadd.f32 %v12556_v17, %v12555_v16  ;;  %v12558_v20 = vpop.f32.mrb[10].mxu0  ;;  %v12578_v21 = vpop.f32.mrb[9].mxu1 }
 0x208   : > { %v12559_v22 = vpop.f32.mrb[11].mxu0  ;;  %v12579_v24 = vadd.f32 %v12578_v21, %v12577_v18  ;;  %v12580_v25 = vpop.f32.mrb[10].mxu1 }
 0x209   : > { %v1777_v23 = vadd.f32 %v12557_v19, %v1737_v15  ;;  %v12581_v26 = vpop.f32.mrb[11].mxu1 }
 0x20b   : > { %v1817_v27 = vadd.f32 %v12579_v24, %v1777_v23 }
 0x225   : > { %v12599_v28 = vpop.f32.mrb[12].mxu0 }
 0x226   : > { %v12600_v29 = vpop.f32.mrb[13].mxu0  ;;  %v12621_v30 = vpop.f32.mrb[12].mxu1 }
 0x227   : > { %v12601_v31 = vadd.f32 %v12600_v29, %v12599_v28  ;;  %v12602_v32 = vpop.f32.mrb[14].mxu0  ;;  %v12622_v33 = vpop.f32.mrb[13].mxu1 }
 0x228   : > { %v12603_v34 = vpop.f32.mrb[15].mxu0  ;;  %v12623_v36 = vadd.f32 %v12622_v33, %v12621_v30  ;;  %v12624_v37 = vpop.f32.mrb[14].mxu1 }
 0x229   : > { %v1857_v35 = vadd.f32 %v12601_v31, %v1817_v27  ;;  %v12625_v38 = vpop.f32.mrb[15].mxu1 }
 0x22b   : > { %v1897_v39 = vadd.f32 %v12623_v36, %v1857_v35 }
 0x22d   : > { %1902 = vst [vmem:[#allocation15] sm:$0x3] %v1897_v39 }
 0x22e PF: > { %v13312_v41 = vld [vmem:[%s14365_s8 + $0x4] ss:$80 sps:$4 sm:$0xff]   ;;  %v13314_v42 = vld [vmem:[%s14365_s8 + $0x8] ss:$80 sps:$4 sm:$0xff]   ;;  %v14052_v43 = vmov 0   ;;  %v2346_v53 = vlaneseq  ;;  %vm14055_vm0 = vmmov 0  }
 0x22f   : > { %2924 = vmatprep.mubr.bf16.mxu0 %v14052_v43  ;;  %2892 = vmatprep.subr.bf16.mxu0 %v13312_v41  ;;  %v13315_v44 = vld [vmem:[%s14365_s8] ss:$80 sps:$4 sm:$0xff]   ;;  %v13316_v45 = vld [vmem:[%s14365_s8 + $0xa4] ss:$80 sps:$4 sm:$0xff]   ;;  %v13318_v46 = vld [vmem:[%s14365_s8 + $0xa8] ss:$80 sps:$4 sm:$0xff]  }
 0x230   : > { %12903 = vmatprep.subr.bf16.mxu1 %v13314_v42  ;;  %2893 = vmatpush1.bf16.msra.mxu0 %v13315_v44  ;;  %v13319_v47 = vld [vmem:[%s14365_s8 + $0xa0] ss:$80 sps:$4 sm:$0xff]   ;;  %v13320_v48 = vld [vmem:[%s14365_s8 + $0x144] ss:$80 sps:$4 sm:$0xff]   ;;  %v13322_v49 = vld [vmem:[%s14365_s8 + $0x148] ss:$80 sps:$4 sm:$0xff]  }
 0x231   : > { %12904 = vmatpush3.bf16.msra.mxu1 %v13314_v42  ;;  %2894 = vmatprep.subr.bf16.mxu0 %v13316_v45  ;;  %v13323_v50 = vld [vmem:[%s14365_s8 + $0x140] ss:$80 sps:$4 sm:$0xff]   ;;  %v13324_v51 = vld [vmem:[%s14365_s8 + $0x1e4] ss:$80 sps:$4 sm:$0xff]   ;;  %v13326_v52 = vld [vmem:[%s14365_s8 + $0x1e8] ss:$80 sps:$4 sm:$0xff]  }
 0x232   : > { %12905 = vmatprep.subr.bf16.mxu1 %v13318_v46  ;;  %v14053_v54 = vmov 1966171168   ;;  %v13327_v56 = vld [vmem:[%s14365_s8 + $0x1e0] ss:$80 sps:$4 sm:$0xff]   ;;  %v13328_v57 = vld [vmem:[%s14365_s8 + $0x284] ss:$80 sps:$4 sm:$0xff]  }
 0x233   : > { %v2362_v55 = vunpack.c.l.s4 %v14053_v54  ;;  %v13330_v58 = vld [vmem:[%s14365_s8 + $0x288] ss:$80 sps:$4 sm:$0xff]   ;;  %v14418_v59 = vshrl.u32 %v2346_v53, 7  ;;  %v13331_v61 = vld [vmem:[%s14365_s8 + $0x280] ss:$80 sps:$4 sm:$0xff]   ;;  %vm3509_vm1 = vcmask 1043456  }
 0x234   : > { %2895 = vmatpush1.bf16.msra.mxu0 %v13319_v47  ;;  %v13332_v62 = vld [vmem:[%s14365_s8 + $0x324] ss:$80 sps:$4 sm:$0xff]   ;;  %v13334_v40 = vld [vmem:[%s14365_s8 + $0x328] ss:$80 sps:$4 sm:$0xff]   ;;  %v13335_v63 = vld [vmem:[%s14365_s8 + $0x320] ss:$80 sps:$4 sm:$0xff]  }
 0x235   : > { %12906 = vmatpush3.bf16.msra.mxu1 %v13318_v46  ;;  %2896 = vmatprep.subr.bf16.mxu0 %v13320_v48  ;;  %v2363_v60 = vunpack.c.0.s8 %v2362_v55  ;;  %v2339_v0 = vld [vmem:[#allocation2] sm:$0xff]  ;;  %v2340_v3 = vld [vmem:[#allocation2 + $0x8] sm:$0x1]  ;;  %v2341_v4 = vld [vmem:[#allocation2 + $0x10] sm:$0xff]  ;;  %v14054_v55 = vmov 0.0   ;;  %vm3510_vm2 = vcmask 1044480  }
 0x236   : > { %12907 = vmatprep.subr.bf16.mxu1 %v13322_v49  ;;  %v13336_v2 = vld [vmem:[%s14365_s8 + $0x3c4] ss:$80 sps:$4 sm:$0xff]   ;;  %v13338_v6 = vld [vmem:[%s14365_s8 + $0x3c8] ss:$80 sps:$4 sm:$0xff]   ;;  %v2343_v7 = vpack.c.bf16 %v2340_v3, %v2339_v0  ;;  %v12017_v9 = vpack.c.bf16 %v2340_v3, %v2340_v3  ;;  %v13339_v11 = vld [vmem:[%s14365_s8 + $0x3c0] ss:$80 sps:$4 sm:$0xff]  }
 0x237   : > { %v14425_v1 = vsub.s32 %v2363_v60, %v14418_v59  ;;  %v2342_v5 = vld [vmem:[#allocation2 + $0x18] sm:$0x1]  ;;  %v13342_v16 = vld [vmem:[%s14365_s8 + $0x468] ss:$80 sps:$4 sm:$0xff]   ;;  %v13343_v23 = vld [vmem:[%s14365_s8 + $0x460] ss:$80 sps:$4 sm:$0xff]  }
 0x238   : > { %2897 = vmatpush1.bf16.msra.mxu0 %v13323_v50  ;;  %v2344_v8 = vpack.c.bf16 %v2342_v5, %v2341_v4  ;;  %v12018_v10 = vpack.c.bf16 %v2342_v5, %v2342_v5  ;;  %v13340_v15 = vld [vmem:[%s14365_s8 + $0x464] ss:$80 sps:$4 sm:$0xff]   ;;  %vm3363_vm3 = vcmask 261120   ;;  %vm3458_vm4 = vcmask 72704   ;;  %s14057_s15 = smov 96   ;;  %s14058_s21 = smov 64  }
 0x239   : > { %12908 = vmatpush3.bf16.msra.mxu1 %v13322_v49  ;;  %2898 = vmatprep.subr.bf16.mxu0 %v13324_v51  ;;  %v2367_v12 = vrot.slane %v2343_v7, %v14425_v1  ;;  %v2374_v13 = vrot.slane %v12017_v9, %v14425_v1  ;;  %v2335_v60 = vld [vmem:[%s14373_s12] sm:$0xff]  ;;  %vm3462_vm5 = vcmask 65536   ;;  %s14059_s2 = smov 32   ;;  %vm4400_vm6 = vcmask 523264   ;;  %p12443_p1 = scmp.ne.s32.totalorder %s14128_s9, 5 }
 0x23a   : > { %12909 = vmatprep.subr.bf16.mxu1 %v13326_v52  ;;  %v2406_v14 = vrot.slane %v2344_v8, %v14425_v1  ;;  %v2413_v17 = vrot.slane %v12018_v10, %v14425_v1  ;;  %vm4405_vm7 = vcmask 785408   ;;  %vm5109_vm8 = vcmask 1040384  }
 0x23b   : > { %v2375_v18 = vcombine.high %v2367_v12, %v2367_v12  ;;  %v2382_v19 = vrot.slane %v2367_v12, %v14425_v1  ;;  %v2389_v20 = vrot.slane %v2374_v13, %v14425_v1  ;;  %vm5185_vm9 = vcmask 1046528  }
 0x23c   : > { %2899 = vmatpush1.bf16.msra.mxu0 %v13327_v56  ;;  %v2414_v21 = vcombine.high %v2406_v14, %v2406_v14  ;;  %v2421_v22 = vrot.slane %v2406_v14, %v14425_v1  ;;  %v2428_v31 = vrot.slane %v2413_v17, %v14425_v1  ;;  %v14459_v56 = vsub.s32 0, %v14418_v59 }
 0x23d   : > { %12910 = vmatpush3.bf16.msra.mxu1 %v13326_v52  ;;  %2900 = vmatprep.subr.bf16.mxu0 %v13328_v57  ;;  %v2396_v24 = vrot.slane %v2375_v18, %v14425_v1  ;;  %v14462_v57 = vsub.s32 1, %v14418_v59 }
 0x23e   : > { %12911 = vmatprep.subr.bf16.mxu1 %v13330_v58  ;;  %v2435_v25 = vrot.slane %v2414_v21, %v14425_v1  ;;  %v2436_v26 = vcombine.high %v2421_v22, %v2421_v22  ;;  %v2448_v27 = vunpack.i.h.s16 %v2421_v22  ;;  %v12019_v28 = vpack.i.b16 %v2421_v22, %v2389_v20  ;;  %16902 = vst [vmem:[#allocation26_spill] sm:$0xff] %v14459_v56 }
 0x23f   : > { %v2532_v29 = vcombine.low %v2382_v19, %v2396_v24  ;;  %v12024_v30 = vcombine.high %v2382_v19, %v2396_v24 }
 0x240   : > { %2901 = vmatpush1.bf16.msra.mxu0 %v13331_v61  ;;  %v2437_v32 = vcombine.high %v2435_v25, %v2435_v25  ;;  %v2450_v33 = vunpack.i.h.s16 %v2435_v25  ;;  %v2452_v34 = vunpack.i.h.s16 %v2436_v26  ;;  %v12020_v35 = vpack.i.b16 %v2435_v25, %v2448_v27 }
 0x241   : > { %12912 = vmatpush3.bf16.msra.mxu1 %v13330_v58  ;;  %2902 = vmatprep.subr.bf16.mxu0 %v13332_v62  ;;  %v2542_v36 = vrot.slane %v2532_v29, %v14425_v1  ;;  %v2549_v37 = vrot.slane %v12024_v30, %v14425_v1  ;;  %v14465_v58 = vsub.s32 2, %v14418_v59  ;;  %v2349_v61 = vrot.slane %v2335_v60, %v14459_v56 }
 0x242   : > { %12913 = vmatprep.subr.bf16.mxu1 %v13334_v40  ;;  %v12021_v38 = vpack.i.b16 %v2436_v26, %v2450_v33  ;;  %v12022_v39 = vpack.i.b16 %v2437_v32, %v2452_v34  ;;  %v2534_v41 = vcombine.low %v12019_v28, %v12020_v35  ;;  %v2454_v42 = vunpack.i.h.s16 %v2437_v32 }
 0x243   : > { %v2564_v46 = vcombine.low %v2542_v36, %v2549_v37  ;;  %v2353_v62 = vrot.slane %v2335_v60, %v14462_v57 }
 0x244   : > { %2903 = vmatpush1.bf16.msra.mxu0 %v13335_v63  ;;  %v2535_v44 = vcombine.low %v12021_v38, %v12022_v39  ;;  %v2556_v45 = vrot.slane %v2534_v41, %v14425_v1  ;;  %v12023_v47 = vpack.i.b16 %v2428_v31, %v2454_v42 }
 0x245   : > { %12914 = vmatpush3.bf16.msra.mxu1 %v13334_v40  ;;  %2904 = vmatprep.subr.bf16.mxu0 %v13336_v2  ;;  %v2572_v51 = vrot.slane %v2564_v46, %v14425_v1  ;;  %v2357_v40 = vrot.slane %v2335_v60, %v14465_v58  ;;  %v2456_v63 = vcombine.low %v2349_v61, %v2353_v62 }
 0x246   : > { %12915 = vmatprep.subr.bf16.mxu1 %v13338_v6  ;;  %v2563_v48 = vrot.slane %v2535_v44, %v14425_v1  ;;  %v2587_v49 = vrot.slane %v12023_v47, %v14425_v1  ;;  %v2457_v0 = vcombine.high %v2349_v61, %v2353_v62 }
 0x247   : > { %v2458_v2 = vcombine.high %v2357_v40, %v2357_v40  ;;  %v2465_v3 = vrot.slane %v2456_v63, %v14425_v1  ;;  %v2479_v5 = vrot.slane %v2357_v40, %v14425_v1 }
 0x248   : > { %2905 = vmatpush1.bf16.msra.mxu0 %v13339_v11  ;;  %v2565_v50 = vcombine.low %v2556_v45, %v2563_v48  ;;  %v2594_v53 = vrot.slane %v2587_v49, %v14425_v1  ;;  %v2472_v4 = vrot.slane %v2457_v0, %v14425_v1 }
 0x249   : > { %12916 = vmatpush3.bf16.msra.mxu1 %v13338_v6  ;;  %2906 = vmatprep.subr.bf16.mxu0 %v13340_v15  ;;  %v2486_v6 = vrot.slane %v2458_v2, %v14425_v1  ;;  %v2487_v7 = vcombine.low %v2465_v3, %v2479_v5  ;;  %v2488_v8 = vcombine.high %v2465_v3, %v2479_v5 }
 0x24a   : > { %12917 = vmatprep.subr.bf16.mxu1 %v13342_v16  ;;  %v2579_v52 = vrot.slane %v2565_v50, %v14425_v1 }
 0x24b   : > { %v2489_v9 = vcombine.low %v2472_v4, %v2486_v6  ;;  %v2490_v10 = vcombine.high %v2472_v4, %v2486_v6  ;;  %v2497_v11 = vrot.slane %v2487_v7, %v14425_v1  ;;  %v2511_v13 = vrot.slane %v2488_v8, %v14425_v1 }
 0x24c   : > { %2907 = vmatpush1.bf16.msra.mxu0 %v13343_v23  ;;  %v2580_v54 = vcombine.low %v2572_v51, %v2579_v52 }
 0x24d   : > { %12918 = vmatpush3.bf16.msra.mxu1 %v13342_v16  ;;  %12923 = vmatprep.subr.bf16.mxu0 %v14054_v55  ;;  %v2504_v12 = vrot.slane %v2489_v9, %v14425_v1  ;;  %v2518_v14 = vrot.slane %v2490_v10, %v14425_v1  ;;  %v2519_v15 = vcombine.high %v2497_v11, %v2497_v11 }
 0x24e   : > { %12919 = vmatprep.mubr.bf16.mxu1 %v2580_v54  ;;  %12935 = vmatprep.subr.bf16.mxu1 %v14054_v55  ;;  %v2521_v17 = vcombine.high %v2511_v13, %v2511_v13  ;;  %v2725_v18 = vcombine.low %v2497_v11, %v2511_v13  ;;  %v12049_v19 = vcombine.high %v2497_v11, %v2511_v13 }
 0x24f   : > { %2925 = vmatmul.mubr.bf16.vlgmr.msra.gmra.mrb[0].mxu0 %v2580_v54  ;;  %v2520_v16 = vcombine.high %v2504_v12, %v2504_v12  ;;  %v2727_v20 = vcombine.low %v2504_v12, %v2518_v14  ;;  %v12050_v21 = vcombine.high %v2504_v12, %v2518_v14  ;;  %v2792_v22 = vcombine.low %v2497_v11, %v2497_v11 }
 0x250   : > { %12920 = vmatmul.mubr.bf16.vlgmr.msra.gmra.mrb[0].mxu1 %v2594_v53  ;;  %2934 = vmatprep.mubr.bf16.mxu0 %v14052_v43  ;;  %v2793_v23 = vcombine.low %v2511_v13, %v2519_v15  ;;  %v2794_v24 = vcombine.low %v2521_v17, %v2504_v12  ;;  %v2735_v26 = vrot.slane %v2725_v18, %v14425_v1 }
 0x251   : > { %12937 = vmatprep.mubr.msk.bf16.mxu1 %vm14055_vm0, %v14054_v55  ;;  %v2795_v25 = vcombine.low %v2518_v14, %v2520_v16  ;;  %v2742_v27 = vrot.slane %v12049_v19, %v14425_v1  ;;  %v2749_v28 = vrot.slane %v2727_v20, %v14425_v1  ;;  %v2756_v29 = vrot.slane %v12050_v21, %v14425_v1 }
 0x252   : > { %v2802_v30 = vrot.slane %v2792_v22, %v14425_v1  ;;  %v2809_v31 = vrot.slane %v2793_v23, %v14425_v1  ;;  %v2816_v32 = vrot.slane %v2794_v24, %v14425_v1  ;;  %v2522_v36 = vcombine.high %v2518_v14, %v2518_v14 }
 0x253   : > { %v2823_v33 = vrot.slane %v2795_v25, %v14425_v1  ;;  %v2757_v34 = vcombine.low %v2735_v26, %v2742_v27  ;;  %v2759_v35 = vcombine.low %v2749_v28, %v2756_v29  ;;  %v2758_v37 = vcombine.high %v2735_v26, %v2742_v27 }
 0x254   : > { %v2760_v38 = vcombine.high %v2749_v28, %v2756_v29  ;;  %v2824_v39 = vcombine.low %v2802_v30, %v2809_v31  ;;  %v2825_v42 = vcombine.high %v2802_v30, %v2809_v31  ;;  %v2859_v47 = vcombine.low %v2522_v36, %v2497_v11 }
 0x255   : > { %v2826_v41 = vcombine.low %v2816_v32, %v2823_v33  ;;  %v2827_v44 = vcombine.high %v2816_v32, %v2823_v33  ;;  %v2767_v45 = vrot.slane %v2757_v34, %v14425_v1  ;;  %v2781_v46 = vrot.slane %v2759_v35, %v14425_v1 }
 0x256   : > { %v2774_v48 = vrot.slane %v2758_v37, %v14425_v1  ;;  %v2788_v49 = vrot.slane %v2760_v38, %v14425_v1  ;;  %v2834_v50 = vrot.slane %v2824_v39, %v14425_v1  ;;  %v2841_v52 = vrot.slane %v2825_v42, %v14425_v1 }
 0x257   : > { %2935 = vmatmul.mubr.bf16.gmra.mrb[4].mxu0 %v2594_v53  ;;  %v2848_v51 = vrot.slane %v2826_v41, %v14425_v1  ;;  %v2855_v53 = vrot.slane %v2827_v44, %v14425_v1  ;;  %v2789_v54 = vcombine.low %v2767_v45, %v2781_v46  ;;  %v2866_v60 = vrot.slane %v2859_v47, %v14425_v1 }
 0x258   : > { %12925 = vmatprep.mubr.msk.bf16.mxu0 %vm14055_vm0, %v14054_v55  ;;  %v2791_v61 = vcombine.low %v2774_v48, %v2788_v49  ;;  %v2790_v62 = vcombine.high %v2767_v45, %v2781_v46 }
 0x259   : > { %v2856_v40 = vcombine.low %v2834_v50, %v2848_v51  ;;  %v2858_v0 = vcombine.low %v2841_v52, %v2855_v53  ;;  %v14497_v3 = vrot.slane %v2866_v60, %v14425_v1  ;;  %v2857_v6 = vcombine.high %v2834_v50, %v2848_v51 }
 0x25a   : > { %v2867_v14 = vcombine.high %v2866_v60, %v2866_v60 }
 0x25b   : > { %v2882_v19 = vcombine.high %v14497_v3, %v14497_v3 }
 0x25c   : > { %v2881_v30 = vrot.slane %v2867_v14, %v14425_v1 }
 0x322   : > { %v2926_v63 = vpop.f32.mrb[0].mxu0 }
 0x323   : > { %v2927_v2 = vadd.f32 %v2926_v63, %v2789_v54  ;;  %v14499_v4 = vpop.f32.mrb[0].mxu1  ;;  %v2928_v5 = vpop.f32.mrb[1].mxu0 }
 0x324   : > { %v2929_v7 = vadd.f32 %v2928_v5, %v2791_v61  ;;  %v2977_v8 = vpop.f32.mrb[1].mxu1  ;;  %v2930_v9 = vpop.f32.mrb[2].mxu0 }
 0x325   : > { %v2978_v10 = vadd.f32 %v2977_v8, %v2790_v62  ;;  %v2931_v11 = vadd.f32 %v2930_v9, %v2856_v40  ;;  %v12922_v12 = vpop.f32.mrb[2].mxu1  ;;  %v2932_v13 = vpop.f32.mrb[3].mxu0 }
 0x326   : > { %v3000_v15 = vcombine.low %v2927_v2, %v2929_v7  ;;  %v3001_v16 = vcombine.high %v2927_v2, %v2929_v7  ;;  %v2933_v17 = vadd.f32 %v2932_v13, %v2858_v0  ;;  %v2980_v18 = vpop.f32.mrb[3].mxu1 }
 0x327   : > { %v3002_v20 = vcombine.high %v2978_v10, %v2978_v10  ;;  %v3023_v21 = vrot.slane %v2978_v10, %v14425_v1  ;;  %v2981_v22 = vadd.f32 %v2980_v18, %v2857_v6 }
 0x328   : > { %v3009_v23 = vrot.slane %v3000_v15, %v14425_v1  ;;  %v3016_v24 = vrot.slane %v3001_v16, %v14425_v1  ;;  %v3067_v25 = vcombine.low %v2931_v11, %v2933_v17  ;;  %v3068_v26 = vcombine.high %v2931_v11, %v2933_v17 }
 0x329   : > { %v3030_v27 = vrot.slane %v3002_v20, %v14425_v1  ;;  %v3069_v28 = vcombine.high %v2981_v22, %v2981_v22  ;;  %v3090_v29 = vrot.slane %v2981_v22, %v14425_v1 }
 0x32a   : > { %v3031_v31 = vcombine.low %v3009_v23, %v3023_v21  ;;  %v3032_v32 = vcombine.high %v3009_v23, %v3023_v21  ;;  %v3076_v33 = vrot.slane %v3067_v25, %v14425_v1  ;;  %v3083_v34 = vrot.slane %v3068_v26, %v14425_v1  ;;  %v2936_v35 = vpop.f32.mrb[4].mxu0 }
 0x32b   : > { %v3033_v36 = vcombine.low %v3016_v24, %v3030_v27  ;;  %v3034_v37 = vcombine.high %v3016_v24, %v3030_v27  ;;  %v3097_v38 = vrot.slane %v3069_v28, %v14425_v1  ;;  %v2938_v39 = vpop.f32.mrb[5].mxu0  ;;  %v2937_v63 = vadd.f32 %v2936_v35, %v14497_v3 }
 0x32c   : > { %v3041_v41 = vrot.slane %v3031_v31, %v14425_v1  ;;  %v3055_v42 = vrot.slane %v3032_v32, %v14425_v1  ;;  %v3098_v44 = vcombine.low %v3076_v33, %v3090_v29  ;;  %v3099_v45 = vcombine.high %v3076_v33, %v3090_v29  ;;  %v2940_v46 = vpop.f32.mrb[6].mxu0 }
 0x32d   : > { %v3048_v47 = vrot.slane %v3033_v36, %v14425_v1  ;;  %v3062_v48 = vrot.slane %v3034_v37, %v14425_v1  ;;  %v3100_v49 = vcombine.low %v3083_v34, %v3097_v38  ;;  %v3101_v50 = vcombine.high %v3083_v34, %v3097_v38  ;;  %v2941_v51 = vpop.f32.mrb[7].mxu0 }
 0x32e   : > { %v3165_v52 = vcombine.low %v3041_v41, %v3055_v42  ;;  %v12051_v53 = vcombine.high %v3041_v41, %v3055_v42  ;;  %v3108_v54 = vrot.slane %v3098_v44, %v14425_v1  ;;  %v3122_v60 = vrot.slane %v3099_v45, %v14425_v1 }
 0x32f   : > { %v3167_v61 = vcombine.low %v3048_v47, %v3062_v48  ;;  %v12052_v62 = vcombine.high %v3048_v47, %v3062_v48  ;;  %v3115_v40 = vrot.slane %v3100_v49, %v14425_v1  ;;  %v3129_v9 = vrot.slane %v3101_v50, %v14425_v1 }
 0x330   : > { %v3175_v0 = vrot.slane %v3165_v52, %v14425_v1  ;;  %v3182_v2 = vrot.slane %v12051_v53, %v14425_v1  ;;  %v3130_v5 = vcombine.high %v3108_v54, %v3108_v54  ;;  %v3132_v6 = vcombine.high %v3122_v60, %v3122_v60 }
 0x331   : > { %v3189_v7 = vrot.slane %v3167_v61, %v14425_v1  ;;  %v3196_v8 = vrot.slane %v12052_v62, %v14425_v1  ;;  %v3131_v10 = vcombine.high %v3115_v40, %v3115_v40  ;;  %v3220_v13 = vrot.slane %v3108_v54, %v14425_v1 }
 0x332   : > { %v3197_v11 = vcombine.low %v3175_v0, %v3182_v2  ;;  %v3297_v12 = vcombine.high %v3175_v0, %v3182_v2  ;;  %v3228_v14 = vcombine.low %v3122_v60, %v3130_v5  ;;  %v3229_v17 = vcombine.low %v3132_v6, %v3115_v40 }
 0x333   : > { %v3198_v15 = vcombine.low %v3189_v7, %v3196_v8  ;;  %v3298_v16 = vcombine.high %v3189_v7, %v3196_v8  ;;  %v3230_v18 = vcombine.low %v3129_v9, %v3131_v10  ;;  %v3227_v22 = vrot.slane %v3220_v13, %v14425_v1 }
 0x334   : > { %v3205_v20 = vrot.slane %v3197_v11, %v14425_v1  ;;  %v3305_v21 = vrot.slane %v3297_v12, %v14425_v1  ;;  %v3238_v23 = vrot.slane %v3228_v14, %v14425_v1  ;;  %v3245_v25 = vrot.slane %v3229_v17, %v14425_v1 }
 0x335   : > { %v3212_v24 = vrot.slane %v3198_v15, %v14425_v1  ;;  %v3314_v26 = vcombine.high %v3220_v13, %v3220_v13  ;;  %v2986_v27 = vadd.f32 %v14499_v4, %v2882_v19  ;;  %v2939_v28 = vadd.f32 %v2938_v39, %v2881_v30 }
 0x336   : > { %v3312_v29 = vrot.slane %v3298_v16, %v14425_v1  ;;  %v14056_v31 = vmov 65535   ;;  %v3260_v34 = vcombine.low %v3238_v23, %v3245_v25  ;;  %v3322_v35 = vcombine.high %v3238_v23, %v3245_v25 }
 0x337   : > { %v3511_v32 = vsel %vm3509_vm1, 4294967295, %v14056_v31  ;;  %v3213_v33 = vcombine.low %v3205_v20, %v3212_v24  ;;  %v3354_v36 = vcombine.high %v3227_v22, %v3227_v22  ;;  %v3321_v37 = vrot.slane %v3314_v26, %v14425_v1 }
 0x338   : > { %v3353_v38 = vcombine.high %v3205_v20, %v3212_v24  ;;  %v3134_v41 = vcombine.low %v2937_v63, %v2939_v28  ;;  %v3313_v42 = vcombine.low %v3305_v21, %v3312_v29  ;;  %v14542_v3 = vsel %vm3510_vm2, %v3511_v32, 0 }
 0x339   : > { %v14539_v44 = vpack.c.bf16 %v3227_v22, %v3213_v33  ;;  %v3148_v4 = vrot.slane %v2986_v27, %v14425_v1  ;;  %v3133_v49 = vcombine.high %v3129_v9, %v3129_v9  ;;  %v3252_v54 = vrot.slane %v3230_v18, %v14425_v1 }
 0x33a   : > { %v14545_v19 = vpack.c.bf16 %v3354_v36, %v3353_v38  ;;  %v3141_v30 = vrot.slane %v3134_v41, %v14425_v1  ;;  %v14548_v39 = vpack.c.bf16 %v3321_v37, %v3313_v42  ;;  %v3268_v0 = vrot.slane %v3260_v34, %v14425_v1 }
 0x33b   : > { %v3330_v2 = vrot.slane %v3322_v35, %v14425_v1 }
 0x33c   : > { %v3149_v45 = vcombine.low %v3141_v30, %v3148_v4  ;;  %v3150_v46 = vcombine.high %v3141_v30, %v3148_v4  ;;  %v3368_v47 = vsel %vm3363_vm3, %v14548_v39, 0  ;;  %v3514_v48 = vand.u32 %v14542_v3, %v14545_v19 }
 0x33d   : > { %12924 = vmatpush3.bf16.xpose.msra.mxu0 %v3368_v47 }
 0x33e   : > { %v3157_v50 = vrot.slane %v3149_v45, %v14425_v1  ;;  %v3164_v51 = vrot.slane %v3150_v46, %v14425_v1  ;;  %12936 = vmatpush3.bf16.msra.mxu1 %v3514_v48  ;;  %12929 = vmatprep.subr.bf16.mxu0 %v14054_v55 }
 0x33f   : > { %12947 = vmatprep.subr.bf16.mxu1 %v14054_v55 }
 0x340   : > { %v3231_v52 = vcombine.low %v3133_v49, %v3157_v50  ;;  %v3283_v53 = vrot.slane %v3164_v51, %v14425_v1 }
 0x342   : > { %v3259_v60 = vrot.slane %v3231_v52, %v14425_v1  ;;  %v3290_v61 = vrot.slane %v3283_v53, %v14425_v1  ;;  %v3339_v63 = vcombine.high %v3283_v53, %v3283_v53 }
 0x344   : > { %v3261_v62 = vcombine.low %v3252_v54, %v3259_v60  ;;  %v3323_v40 = vcombine.high %v3252_v54, %v3259_v60  ;;  %12926 = vmatmul.mubr.msk.bf16.vlgmr.msra.gmra.mrb[8].mxu0 %vm3363_vm3, %v14539_v44  ;;  %v3356_v7 = vcombine.high %v3290_v61, %v3290_v61  ;;  %v3346_v9 = vrot.slane %v3339_v63, %v14425_v1 }
 0x345   : > { %12931 = vmatprep.mubr.msk.bf16.mxu0 %vm14055_vm0, %v14054_v55 }
 0x346   : > { %v3337_v5 = vrot.slane %v3323_v40, %v14425_v1  ;;  %v3275_v6 = vrot.slane %v3261_v62, %v14425_v1 }
 0x348   : > { %v3338_v8 = vcombine.low %v3330_v2, %v3337_v5  ;;  %v3276_v10 = vcombine.low %v3268_v0, %v3275_v6  ;;  %v3355_v11 = vcombine.high %v3268_v0, %v3275_v6 }
 0x34a   : > { %v14571_v12 = vpack.c.bf16 %v3346_v9, %v3338_v8  ;;  %v14573_v13 = vpack.c.bf16 %v3290_v61, %v3276_v10  ;;  %v14575_v14 = vpack.c.bf16 %v3356_v7, %v3355_v11 }
 0x34c   : > { %v3415_v15 = vsel %vm3363_vm3, %v14571_v12, 0  ;;  %v3561_v16 = vand.u32 %v14542_v3, %v14575_v14 }
 0x34d   : > { %12930 = vmatpush3.bf16.xpose.msra.mxu0 %v3415_v15 }
 0x34e   : > { %12941 = vmatprep.subr.bf16.mxu0 %v14054_v55 }
 0x354   : > { %12932 = vmatmul.mubr.msk.bf16.vlgmr.msra.gmra.mrb[12].mxu0 %vm3363_vm3, %v14573_v13 }
 0x355   : > { %12942 = vmatpush3.bf16.msra.mxu0 %v3561_v16  ;;  %12943 = vmatprep.mubr.msk.bf16.mxu0 %vm14055_vm0, %v14054_v55 }
 0x356   : > { %12953 = vmatprep.subr.bf16.mxu0 %v14054_v55 }
 0x417   : > { %v3404_v17 = vpop.f32.mrb[8].mxu0 }
 0x418   : > { %v12927_v18 = vpop.f32.mrb[9].mxu0  ;;  %v3459_v20 = vsel %vm3458_vm4, %v3404_v17, -inf }
 0x419   : > { %3460 = vmax.xlane.f32.xlu1 %v3459_v20  ;;  %v3407_v21 = vpop.f32.mrb[10].mxu0 }
 0x41a   : > { %v12928_v22 = vpop.f32.mrb[11].mxu0  ;;  %v3463_v23 = vsel %vm3462_vm5, %v3407_v21, -inf }
 0x41d   : > { %3464 = vmax.xlane.f32.xlu1 %v3463_v23 }
 0x427   : > { %v3451_v24 = vpop.f32.mrb[12].mxu0 }
 0x428   : > { %v12933_v25 = vpop.f32.mrb[13].mxu0  ;;  %v3466_v26 = vsel %vm3458_vm4, %v3451_v24, -inf }
 0x429   : > { %3467 = vmax.xlane.f32.xlu0 %v3466_v26  ;;  %v3454_v27 = vpop.f32.mrb[14].mxu0 }
 0x42a   : > { %v12934_v28 = vpop.f32.mrb[15].mxu0  ;;  %v3469_v29 = vsel %vm3462_vm5, %v3454_v27, -inf }
 0x42d   : > { %3470 = vmax.xlane.f32.xlu0 %v3469_v29 }
 0x4a6   : > { %v3461_v31 = vpop.xlane.xlu1 %3460 }
 0x4a7   : > { %v3472_v32 = vsub.f32 %v3404_v17, %v3461_v31 }
 0x4a9   : > { %v3476_v33 = vmul.f32 1.442695, %v3472_v32 }
 0x4aa   : > { %v3465_v34 = vpop.xlane.xlu1 %3464 }
 0x4ab   : > { %13672 = vpow2.f32 %v3476_v33  ;;  %v3473_v35 = vsub.f32 %v3407_v21, %v3465_v34 }
 0x4ad   : > { %v3478_v36 = vmul.f32 1.442695, %v3473_v35 }
 0x4af   : > { %13674 = vpow2.f32 %v3478_v36 }
 0x4b5   : > { %v13673_v37 = vpop.eup %13672 }
 0x4b6   : > { %v3468_v38 = vpop.xlane.xlu0 %3467  ;;  %v3484_v41 = vsel %vm3458_vm4, %v13673_v37, 0.0 }
 0x4b7   : > { %v3474_v42 = vsub.f32 %v3451_v24, %v3468_v38  ;;  %3485 = vadd.xlane.f32.xlu0 %v3484_v41 }
 0x4b9   : > { %v13675_v4 = vpop.eup %13674  ;;  %v3480_v30 = vmul.f32 1.442695, %v3474_v42 }
 0x4ba   : > { %v3471_v45 = vpop.xlane.xlu0 %3470  ;;  %v3487_v46 = vsel %vm3462_vm5, %v13675_v4, 0.0 }
 0x4bb   : > { %13676 = vpow2.f32 %v3480_v30  ;;  %v3475_v47 = vsub.f32 %v3454_v27, %v3471_v45  ;;  %3488 = vadd.xlane.f32.xlu1 %v3487_v46 }
 0x4bd   : > { %v3482_v48 = vmul.f32 1.442695, %v3475_v47 }
 0x4bf   : > { %13678 = vpow2.f32 %v3482_v48 }
 0x4c5   : > { %v13677_v49 = vpop.eup %13676 }
 0x4c6   : > { %v3490_v50 = vsel %vm3458_vm4, %v13677_v49, 0.0 }
 0x4c7   : > { %3491 = vadd.xlane.f32.xlu0 %v3490_v50 }
 0x4c9   : > { %v13679_v51 = vpop.eup %13678 }
 0x4ca   : > { %v3493_v52 = vsel %vm3462_vm5, %v13679_v51, 0.0 }
 0x4cb   : > { %3494 = vadd.xlane.f32.xlu1 %v3493_v52 }
 0x4dc   : > { %3608 = vrot.lane.b32.xlu1 %v14548_v39, %s14057_s15 }
 0x4dd   : > { %3661 = vrot.lane.b32.xlu0 %v14571_v12, %s14057_s15 }
 0x4e0   : > { %3658 = vrot.lane.b32.xlu1 %v14573_v13, %s14057_s15 }
 0x4e4   : > { %3605 = vrot.lane.b32.xlu1 %v14539_v44, %s14057_s15 }
 0x544   : > { %v3486_v53 = vpop.xlane.xlu0 %3485 }
 0x545   : > { %13680 = vrcp.f32 %v3486_v53 }
 0x548   : > { %v3489_v54 = vpop.xlane.xlu1 %3488 }
 0x549   : > { %13682 = vrcp.f32 %v3489_v54 }
 0x54f   : > { %v13681_v60 = vpop.eup %13680 }
 0x550   : > { %v3500_v62 = vmul.f32 %v13681_v60, %v13673_v37 }
 0x553   : > { %v13683_v61 = vpop.eup %13682 }
 0x554   : > { %v3501_v40 = vmul.f32 %v13683_v61, %v13675_v4  ;;  %v3492_v63 = vpop.xlane.xlu0 %3491 }
 0x555   : > { %13684 = vrcp.f32 %v3492_v63 }
 0x556   : > { %v3504_v0 = vpack.c.bf16 %v3501_v40, %v3500_v62 }
 0x558   : > { %v3495_v2 = vpop.xlane.xlu1 %3494  ;;  %12938 = vmatmul.mubr.msk.bf16.vlgmr.msra.gmra.mrb[4].mxu1 %vm3458_vm4, %v3504_v0  ;;  %v3662_v16 = vpop.permute.xlu0 %3661 }
 0x559   : > { %13686 = vrcp.f32 %v3495_v2  ;;  %12949 = vmatprep.mubr.msk.bf16.mxu1 %vm14055_vm0, %v14054_v55  ;;  %v3667_v18 = vsel %vm3363_vm3, %v3662_v16, 0 }
 0x55c   : > { %v3609_v5 = vpop.permute.xlu1 %3608 }
 0x55d   : > { %v3614_v6 = vsel %vm3363_vm3, %v3609_v5, 0 }
 0x55e   : > { %12948 = vmatpush3.bf16.xpose.msra.mxu1 %v3614_v6 }
 0x55f   : > { %12959 = vmatprep.subr.bf16.mxu1 %v14054_v55  ;;  %v13685_v8 = vpop.eup %13684 }
 0x560   : > { %v3659_v7 = vpop.permute.xlu1 %3658  ;;  %v3502_v10 = vmul.f32 %v13685_v8, %v13677_v49 }
 0x563   : > { %v13687_v9 = vpop.eup %13686 }
 0x564   : > { %v3503_v11 = vmul.f32 %v13687_v9, %v13679_v51  ;;  %v3606_v15 = vpop.permute.xlu1 %3605 }
 0x565   : > { %12950 = vmatmul.mubr.msk.bf16.vlgmr.msra.gmra.mrb[8].mxu1 %vm3363_vm3, %v3606_v15 }
 0x566   : > { %v3505_v17 = vpack.c.bf16 %v3503_v11, %v3502_v10  ;;  %12961 = vmatprep.mubr.msk.bf16.mxu1 %vm14055_vm0, %v14054_v55 }
 0x568   : > { %12944 = vmatmul.mubr.msk.bf16.vlgmr.msra.gmra.mrb[16].mxu0 %vm3458_vm4, %v3505_v17 }
 0x569   : > { %12954 = vmatpush3.bf16.xpose.msra.mxu0 %v3667_v18  ;;  %12955 = vmatprep.mubr.msk.bf16.mxu0 %vm14055_vm0, %v14054_v55 }
 0x56a   : > { %12965 = vmatprep.subr.bf16.mxu0 %v14054_v55 }
 0x570   : > { %12956 = vmatmul.mubr.msk.bf16.vlgmr.msra.gmra.mrb[20].mxu0 %vm3363_vm3, %v3659_v7 }
 0x571   : > { %12967 = vmatprep.mubr.msk.bf16.mxu0 %vm14055_vm0, %v14054_v55 }
 0x62b   : > { %v14619_v20 = vpop.f32.mrb[4].mxu1 }
 0x62c   : > { %v12939_v21 = vpop.f32.mrb[5].mxu1 }
 0x62d   : > { %v14621_v22 = vpop.f32.mrb[6].mxu1 }
 0x62e   : > { %v12940_v23 = vpop.f32.mrb[7].mxu1 }
 0x638   : > { %v3650_v24 = vpop.f32.mrb[8].mxu1 }
 0x639   : > { %v12951_v25 = vpop.f32.mrb[9].mxu1  ;;  %v3710_v41 = vsel %vm3458_vm4, %v3650_v24, -inf }
 0x63a   : > { %v3653_v26 = vpop.f32.mrb[10].mxu1 }
 0x63b   : > { %v14623_v27 = vpop.f32.mrb[16].mxu0  ;;  %v12952_v28 = vpop.f32.mrb[11].mxu1  ;;  %v3713_v42 = vsel %vm3462_vm5, %v3653_v26, -inf }
 0x63c   : > { %v12945_v29 = vpop.f32.mrb[17].mxu0 }
 0x63d   : > { %v14625_v31 = vpop.f32.mrb[18].mxu0 }
 0x63e   : > { %v12946_v32 = vpop.f32.mrb[19].mxu0 }
 0x643   : > { %v3703_v33 = vpop.f32.mrb[20].mxu0 }
 0x644   : > { %v12957_v34 = vpop.f32.mrb[21].mxu0  ;;  %v3716_v35 = vsel %vm3458_vm4, %v3703_v33, -inf }
 0x645   : > { %3717 = vmax.xlane.f32.xlu0 %v3716_v35  ;;  %v3706_v36 = vpop.f32.mrb[22].mxu0 }
 0x646   : > { %v12958_v37 = vpop.f32.mrb[23].mxu0  ;;  %v3719_v38 = vsel %vm3462_vm5, %v3706_v36, -inf }
 0x647   : > { %3720 = vmax.xlane.f32.xlu1 %v3719_v38 }
 0x649   : > { %3711 = vmax.xlane.f32.xlu0 %v3710_v41 }
 0x64d   : > { %3714 = vmax.xlane.f32.xlu0 %v3713_v42 }
 0x6d2   : > { %v3718_v4 = vpop.xlane.xlu0 %3717 }
 0x6d3   : > { %v3724_v30 = vsub.f32 %v3703_v33, %v3718_v4 }
 0x6d4   : > { %v3721_v40 = vpop.xlane.xlu1 %3720 }
 0x6d5   : > { %v3730_v47 = vmul.f32 1.442695, %v3724_v30  ;;  %v3725_v63 = vsub.f32 %v3706_v36, %v3721_v40 }
 0x6d6   : > { %v3712_v45 = vpop.xlane.xlu0 %3711 }
 0x6d7   : > { %v3722_v46 = vsub.f32 %v3650_v24, %v3712_v45  ;;  %v3732_v0 = vmul.f32 1.442695, %v3725_v63 }
 0x6d9   : > { %v3726_v48 = vmul.f32 1.442695, %v3722_v46 }
 0x6da   : > { %v3715_v49 = vpop.xlane.xlu0 %3714 }
 0x6db   : > { %13688 = vpow2.f32 %v3726_v48  ;;  %v3723_v50 = vsub.f32 %v3653_v26, %v3715_v49 }
 0x6dc   : > { %13690 = vpow2.f32 %v3730_v47 }
 0x6dd   : > { %v3728_v51 = vmul.f32 1.442695, %v3723_v50 }
 0x6df   : > { %13692 = vpow2.f32 %v3728_v51 }
 0x6e0   : > { %13694 = vpow2.f32 %v3732_v0 }
 0x6e5   : > { %v13689_v52 = vpop.eup %13688 }
 0x6e6   : > { %v3734_v53 = vsel %vm3458_vm4, %v13689_v52, 0.0  ;;  %v13691_v54 = vpop.eup %13690 }
 0x6e7   : > { %3735 = vadd.xlane.f32.xlu0 %v3734_v53  ;;  %v3740_v61 = vsel %vm3458_vm4, %v13691_v54, 0.0 }
 0x6e9   : > { %v13693_v60 = vpop.eup %13692 }
 0x6ea   : > { %v3737_v62 = vsel %vm3462_vm5, %v13693_v60, 0.0  ;;  %v13695_v2 = vpop.eup %13694 }
 0x6eb   : > { %3741 = vadd.xlane.f32.xlu0 %v3740_v61  ;;  %3738 = vadd.xlane.f32.xlu1 %v3737_v62  ;;  %v3743_v5 = vsel %vm3462_vm5, %v13695_v2, 0.0 }
 0x6fc   : > { %3757 = vrot.lane.b32.xlu1 %v14545_v19, %s14057_s15 }
 0x700   : > { %3909 = vrot.lane.b32.xlu1 %v14571_v12, %s14058_s21 }
 0x701   : > { %3807 = vrot.lane.b32.xlu0 %v14575_v14, %s14057_s15 }
 0x705   : > { %3907 = vrot.lane.b32.xlu0 %v14573_v13, %s14058_s21 }
 0x724   : > { %3744 = vadd.xlane.f32.xlu1 %v3743_v5 }
 0x735   : > { %3858 = vrot.lane.b32.xlu1 %v14548_v39, %s14058_s21 }
 0x739   : > { %3856 = vrot.lane.b32.xlu1 %v14539_v44, %s14058_s21 }
 0x774   : > { %v3736_v6 = vpop.xlane.xlu0 %3735 }
 0x775   : > { %13696 = vrcp.f32 %v3736_v6 }
 0x778   : > { %v3742_v7 = vpop.xlane.xlu0 %3741  ;;  %v3739_v8 = vpop.xlane.xlu1 %3738 }
 0x779   : > { %13698 = vrcp.f32 %v3739_v8 }
 0x77a   : > { %13700 = vrcp.f32 %v3742_v7 }
 0x77c   : > { %v3808_v9 = vpop.permute.xlu0 %3807  ;;  %v3758_v10 = vpop.permute.xlu1 %3757 }
 0x77d   : > { %v3813_v11 = vand.u32 %v3808_v9, %v14542_v3  ;;  %v3763_v15 = vand.u32 %v3758_v10, %v14542_v3 }
 0x77f   : > { %12960 = vmatpush3.bf16.msra.mxu1 %v3763_v15  ;;  %12966 = vmatpush3.bf16.msra.mxu0 %v3813_v11  ;;  %v13697_v16 = vpop.eup %13696 }
 0x780   : > { %12971 = vmatprep.subr.bf16.mxu1 %v14054_v55  ;;  %12977 = vmatprep.subr.bf16.mxu0 %v14054_v55  ;;  %v3750_v18 = vmul.f32 %v13697_v16, %v13689_v52  ;;  %v3910_v24 = vpop.permute.xlu1 %3909  ;;  %v3908_v38 = vpop.permute.xlu0 %3907 }
 0x781   : > { %v3915_v37 = vsel %vm3363_vm3, %v3910_v24, 0 }
 0x783   : > { %v13699_v17 = vpop.eup %13698 }
 0x784   : > { %v3751_v21 = vmul.f32 %v13699_v17, %v13693_v60  ;;  %v13701_v29 = vpop.eup %13700 }
 0x785   : > { %v3752_v33 = vmul.f32 %v13701_v29, %v13691_v54 }
 0x786   : > { %v3754_v23 = vpack.c.bf16 %v3751_v21, %v3750_v18 }
 0x788   : > { %12962 = vmatmul.mubr.msk.bf16.vlgmr.msra.gmra.mrb[12].mxu1 %vm3458_vm4, %v3754_v23 }
 0x789   : > { %12973 = vmatprep.mubr.msk.bf16.mxu1 %vm14055_vm0, %v14054_v55 }
 0x7b1   : > { %v3745_v25 = vpop.xlane.xlu1 %3744 }
 0x7b2   : > { %13702 = vrcp.f32 %v3745_v25 }
 0x7b5   : > { %v3859_v26 = vpop.permute.xlu1 %3858 }
 0x7b6   : > { %v3864_v28 = vsel %vm3363_vm3, %v3859_v26, 0 }
 0x7b7   : > { %12972 = vmatpush3.bf16.xpose.msra.mxu1 %v3864_v28 }
 0x7b8   : > { %12983 = vmatprep.subr.bf16.mxu1 %v14054_v55 }
 0x7b9   : > { %v3857_v35 = vpop.permute.xlu1 %3856 }
 0x7bc   : > { %v13703_v32 = vpop.eup %13702 }
 0x7bd   : > { %v3753_v34 = vmul.f32 %v13703_v32, %v13695_v2 }
 0x7be   : > { %12974 = vmatmul.mubr.msk.bf16.vlgmr.msra.gmra.mrb[16].mxu1 %vm3363_vm3, %v3857_v35 }
 0x7bf   : > { %v3755_v36 = vpack.c.bf16 %v3753_v34, %v3752_v33  ;;  %12985 = vmatprep.mubr.msk.bf16.mxu1 %vm14055_vm0, %v14054_v55 }
 0x7c1   : > { %12968 = vmatmul.mubr.msk.bf16.vlgmr.msra.gmra.mrb[24].mxu0 %vm3458_vm4, %v3755_v36 }
 0x7c2   : > { %12978 = vmatpush3.bf16.xpose.msra.mxu0 %v3915_v37  ;;  %12979 = vmatprep.mubr.msk.bf16.mxu0 %vm14055_vm0, %v14054_v55 }
 0x7c3   : > { %12989 = vmatprep.subr.bf16.mxu0 %v14054_v55 }
 0x7c9   : > { %12980 = vmatmul.mubr.msk.bf16.vlgmr.msra.gmra.mrb[28].mxu0 %vm3363_vm3, %v3908_v38 }
 0x7ca   : > { %12991 = vmatprep.mubr.msk.bf16.mxu0 %vm14055_vm0, %v14054_v55 }
 0x85b   : > { %v14667_v41 = vpop.f32.mrb[12].mxu1 }
 0x85c   : > { %v12963_v42 = vpop.f32.mrb[13].mxu1 }
 0x85d   : > { %v14669_v4 = vpop.f32.mrb[14].mxu1 }
 0x85e   : > { %v13292_v30 = vpack.i.bf16 %v14669_v4, %v14667_v41  ;;  %v12964_v45 = vpop.f32.mrb[15].mxu1 }
 0x891   : > { %v3900_v46 = vpop.f32.mrb[16].mxu1 }
 0x892   : > { %v12975_v47 = vpop.f32.mrb[17].mxu1  ;;  %v3958_v2 = vsel %vm3458_vm4, %v3900_v46, -inf }
 0x893   : > { %v3903_v48 = vpop.f32.mrb[18].mxu1 }
 0x894   : > { %v14673_v49 = vpop.f32.mrb[24].mxu0  ;;  %v12976_v50 = vpop.f32.mrb[19].mxu1  ;;  %v3961_v5 = vsel %vm3462_vm5, %v3903_v48, -inf }
 0x895   : > { %v12969_v51 = vpop.f32.mrb[25].mxu0 }
 0x896   : > { %v14675_v52 = vpop.f32.mrb[26].mxu0 }
 0x897   : > { %v13282_v53 = vpack.i.bf16 %v14675_v52, %v14673_v49  ;;  %v12970_v54 = vpop.f32.mrb[27].mxu0 }
 0x89c   : > { %v3951_v60 = vpop.f32.mrb[28].mxu0 }
 0x89d   : > { %v12981_v61 = vpop.f32.mrb[29].mxu0  ;;  %v3964_v62 = vsel %vm3458_vm4, %v3951_v60, -inf }
 0x89e   : > { %3965 = vmax.xlane.f32.xlu0 %v3964_v62  ;;  %v3954_v40 = vpop.f32.mrb[30].mxu0 }
 0x89f   : > { %v12982_v63 = vpop.f32.mrb[31].mxu0  ;;  %v3967_v0 = vsel %vm3462_vm5, %v3954_v40, -inf }
 0x8a0   : > { %3968 = vmax.xlane.f32.xlu1 %v3967_v0 }
 0x8a2   : > { %3959 = vmax.xlane.f32.xlu0 %v3958_v2 }
 0x8a6   : > { %3962 = vmax.xlane.f32.xlu0 %v3961_v5 }
 0x92b   : > { %v3966_v6 = vpop.xlane.xlu0 %3965 }
 0x92c   : > { %v3972_v7 = vsub.f32 %v3951_v60, %v3966_v6 }
 0x92d   : > { %v3969_v28 = vpop.xlane.xlu1 %3968 }
 0x92e   : > { %v3978_v10 = vmul.f32 1.442695, %v3972_v7  ;;  %v3973_v29 = vsub.f32 %v3954_v40, %v3969_v28 }
 0x92f   : > { %v3960_v8 = vpop.xlane.xlu0 %3959 }
 0x930   : > { %v3970_v9 = vsub.f32 %v3900_v46, %v3960_v8  ;;  %v3980_v32 = vmul.f32 1.442695, %v3973_v29 }
 0x932   : > { %v3974_v11 = vmul.f32 1.442695, %v3970_v9 }
 0x933   : > { %v3963_v15 = vpop.xlane.xlu0 %3962 }
 0x934   : > { %13704 = vpow2.f32 %v3974_v11  ;;  %v3971_v16 = vsub.f32 %v3903_v48, %v3963_v15 }
 0x935   : > { %13706 = vpow2.f32 %v3978_v10 }
 0x936   : > { %v3976_v17 = vmul.f32 1.442695, %v3971_v16 }
 0x938   : > { %13708 = vpow2.f32 %v3976_v17 }
 0x939   : > { %13710 = vpow2.f32 %v3980_v32 }
 0x93e   : > { %v13705_v18 = vpop.eup %13704 }
 0x93f   : > { %v3982_v21 = vsel %vm3458_vm4, %v13705_v18, 0.0  ;;  %v13707_v23 = vpop.eup %13706 }
 0x940   : > { %3983 = vadd.xlane.f32.xlu0 %v3982_v21  ;;  %v3988_v25 = vsel %vm3458_vm4, %v13707_v23, 0.0 }
 0x942   : > { %v13709_v24 = vpop.eup %13708 }
 0x943   : > { %v3985_v26 = vsel %vm3462_vm5, %v13709_v24, 0.0  ;;  %v13711_v33 = vpop.eup %13710 }
 0x944   : > { %3989 = vadd.xlane.f32.xlu0 %v3988_v25  ;;  %3986 = vadd.xlane.f32.xlu1 %v3985_v26  ;;  %v3991_v34 = vsel %vm3462_vm5, %v13711_v33, 0.0 }
 0x955   : > { %4004 = vrot.lane.b32.xlu1 %v14545_v19, %s14058_s21 }
 0x959   : > { %4155 = vrot.lane.b32.xlu1 %v14571_v12, %s14059_s2 }
 0x95a   : > { %4053 = vrot.lane.b32.xlu0 %v14575_v14, %s14058_s21 }
 0x95e   : > { %4153 = vrot.lane.b32.xlu0 %v14573_v13, %s14059_s2 }
 0x97d   : > { %3992 = vadd.xlane.f32.xlu1 %v3991_v34 }
 0x98e   : > { %4104 = vrot.lane.b32.xlu1 %v14548_v39, %s14059_s2 }
 0x992   : > { %4102 = vrot.lane.b32.xlu1 %v14539_v44, %s14059_s2 }
 0x9cd   : > { %v3984_v12 = vpop.xlane.xlu0 %3983 }
 0x9ce   : > { %13712 = vrcp.f32 %v3984_v12 }
 0x9d1   : > { %v3990_v35 = vpop.xlane.xlu0 %3989  ;;  %v3987_v36 = vpop.xlane.xlu1 %3986 }
 0x9d2   : > { %13714 = vrcp.f32 %v3987_v36 }
 0x9d3   : > { %13716 = vrcp.f32 %v3990_v35 }
 0x9d5   : > { %v4054_v13 = vpop.permute.xlu0 %4053  ;;  %v4005_v37 = vpop.permute.xlu1 %4004 }
 0x9d6   : > { %v4059_v38 = vand.u32 %v4054_v13, %v14542_v3  ;;  %v4010_v42 = vand.u32 %v4005_v37, %v14542_v3 }
 0x9d8   : > { %12984 = vmatpush3.bf16.msra.mxu1 %v4010_v42  ;;  %12990 = vmatpush3.bf16.msra.mxu0 %v4059_v38  ;;  %v13713_v39 = vpop.eup %13712 }
 0x9d9   : > { %12995 = vmatprep.subr.bf16.mxu1 %v14054_v55  ;;  %13001 = vmatprep.subr.bf16.mxu0 %v14054_v55  ;;  %v3998_v44 = vmul.f32 %v13713_v39, %v13705_v18  ;;  %v4156_v48 = vpop.permute.xlu1 %4155  ;;  %v4154_v5 = vpop.permute.xlu0 %4153 }
 0x9da   : > { %v4161_v2 = vsel %vm3363_vm3, %v4156_v48, 0 }
 0x9dc   : > { %v13715_v45 = vpop.eup %13714 }
 0x9dd   : > { %v3999_v46 = vmul.f32 %v13715_v45, %v13709_v24  ;;  %v13717_v60 = vpop.eup %13716 }
 0x9de   : > { %v4000_v62 = vmul.f32 %v13717_v60, %v13707_v23 }
 0x9df   : > { %v4002_v47 = vpack.c.bf16 %v3999_v46, %v3998_v44 }
 0x9e1   : > { %12986 = vmatmul.mubr.msk.bf16.vlgmr.msra.gmra.mrb[20].mxu1 %vm3458_vm4, %v4002_v47 }
 0x9e2   : > { %12997 = vmatprep.mubr.msk.bf16.mxu1 %vm14055_vm0, %v14054_v55 }
 0xa0a   : > { %v3993_v50 = vpop.xlane.xlu1 %3992 }
 0xa0b   : > { %13718 = vrcp.f32 %v3993_v50 }
 0xa0e   : > { %v4105_v51 = vpop.permute.xlu1 %4104 }
 0xa0f   : > { %v4110_v54 = vsel %vm3363_vm3, %v4105_v51, 0 }
 0xa10   : > { %12996 = vmatpush3.bf16.xpose.msra.mxu1 %v4110_v54 }
 0xa11   : > { %13007 = vmatprep.subr.bf16.mxu1 %v14054_v55 }
 0xa12   : > { %v4103_v63 = vpop.permute.xlu1 %4102 }
 0xa15   : > { %v13719_v61 = vpop.eup %13718 }
 0xa16   : > { %v4001_v40 = vmul.f32 %v13719_v61, %v13711_v33 }
 0xa17   : > { %12998 = vmatmul.mubr.msk.bf16.vlgmr.msra.gmra.mrb[24].mxu1 %vm3363_vm3, %v4103_v63 }
 0xa18   : > { %v4003_v0 = vpack.c.bf16 %v4001_v40, %v4000_v62  ;;  %13009 = vmatprep.mubr.msk.bf16.mxu1 %vm14055_vm0, %v14054_v55 }
 0xa1a   : > { %12992 = vmatmul.mubr.msk.bf16.vlgmr.msra.gmra.mrb[32].mxu0 %vm3458_vm4, %v4003_v0 }
 0xa1b   : > { %13002 = vmatpush3.bf16.xpose.msra.mxu0 %v4161_v2  ;;  %13003 = vmatprep.mubr.msk.bf16.mxu0 %vm14055_vm0, %v14054_v55 }
 0xa1c   : > { %13013 = vmatprep.subr.bf16.mxu0 %v14054_v55 }
 0xa22   : > { %13004 = vmatmul.mubr.msk.bf16.vlgmr.msra.gmra.mrb[36].mxu0 %vm3363_vm3, %v4154_v5 }
 0xa23   : > { %13015 = vmatprep.mubr.msk.bf16.mxu0 %vm14055_vm0, %v14054_v55 }
 0xab4   : > { %v14719_v6 = vpop.f32.mrb[20].mxu1 }
 0xab5   : > { %v12987_v7 = vpop.f32.mrb[21].mxu1 }
 0xab6   : > { %v14721_v8 = vpop.f32.mrb[22].mxu1 }
 0xab7   : > { %v13302_v9 = vpack.i.bf16 %v14721_v8, %v14719_v6  ;;  %v12988_v10 = vpop.f32.mrb[23].mxu1 }
 0xaea   : > { %v4146_v11 = vpop.f32.mrb[24].mxu1 }
 0xaeb   : > { %v12999_v15 = vpop.f32.mrb[25].mxu1  ;;  %v4204_v34 = vsel %vm3458_vm4, %v4146_v11, -inf }
 0xaec   : > { %v4149_v16 = vpop.f32.mrb[26].mxu1 }
 0xaed   : > { %v4095_v17 = vpop.f32.mrb[32].mxu0  ;;  %v13000_v18 = vpop.f32.mrb[27].mxu1  ;;  %v4207_v12 = vsel %vm3462_vm5, %v4149_v16, -inf }
 0xaee   : > { %v12993_v21 = vpop.f32.mrb[33].mxu0 }
 0xaef   : > { %v4098_v23 = vpop.f32.mrb[34].mxu0  ;;  %v13345_v21 = vld [vmem:[%s14365_s8 + $0xac] ss:$80 sps:$4 sm:$0xff]  }
 0xaf0   : > { %v13287_v24 = vpack.i.bf16 %v4098_v23, %v4095_v17  ;;  %v12994_v25 = vpop.f32.mrb[35].mxu0  ;;  %v13346_v23 = vld [vmem:[%s14365_s8 + $0x14c] ss:$80 sps:$4 sm:$0xff]  }
 0xaf5   : > { %v4197_v26 = vpop.f32.mrb[36].mxu0 }
 0xaf6   : > { %v13005_v55 = vpop.f32.mrb[37].mxu0  ;;  %v4210_v28 = vsel %vm3458_vm4, %v4197_v26, -inf }
 0xaf7   : > { %4211 = vmax.xlane.f32.xlu0 %v4210_v28  ;;  %v4200_v29 = vpop.f32.mrb[38].mxu0 }
 0xaf8   : > { %v13006_v32 = vpop.f32.mrb[39].mxu0  ;;  %v4213_v33 = vsel %vm3462_vm5, %v4200_v29, -inf }
 0xaf9   : > { %4214 = vmax.xlane.f32.xlu1 %v4213_v33 }
 0xafb   : > { %4205 = vmax.xlane.f32.xlu0 %v4204_v34 }
 0xaff   : > { %4208 = vmax.xlane.f32.xlu0 %v4207_v12  ;;  %v13348_v12 = vld [vmem:[%s14365_s8 + $0x28c] ss:$80 sps:$4 sm:$0xff]  }
 0xb84   : > { %v4212_v35 = vpop.xlane.xlu0 %4211 }
 0xb85   : > { %v4218_v36 = vsub.f32 %v4197_v26, %v4212_v35  ;;  %v13347_v26 = vld [vmem:[%s14365_s8 + $0x1ec] ss:$80 sps:$4 sm:$0xff]  }
 0xb86   : > { %v4215_v13 = vpop.xlane.xlu1 %4214 }
 0xb87   : > { %v4224_v42 = vmul.f32 1.442695, %v4218_v36  ;;  %v4219_v39 = vsub.f32 %v4200_v29, %v4215_v13  ;;  %v13349_v13 = vld [vmem:[%s14365_s8 + $0x32c] ss:$80 sps:$4 sm:$0xff]  }
 0xb88   : > { %v4206_v37 = vpop.xlane.xlu0 %4205 }
 0xb89   : > { %v4216_v38 = vsub.f32 %v4146_v11, %v4206_v37  ;;  %v4226_v47 = vmul.f32 1.442695, %v4219_v39  ;;  %v13350_v37 = vld [vmem:[%s14365_s8 + $0x3cc] ss:$80 sps:$4 sm:$0xff]  }
 0xb8b   : > { %v4220_v45 = vmul.f32 1.442695, %v4216_v38  ;;  %v13351_v38 = vld [vmem:[%s14365_s8 + $0x46c] ss:$80 sps:$4 sm:$0xff]  }
 0xb8c   : > { %v4209_v44 = vpop.xlane.xlu0 %4208 }
 0xb8d   : > { %13720 = vpow2.f32 %v4220_v45  ;;  %v4217_v46 = vsub.f32 %v4149_v16, %v4209_v44 }
 0xb8e   : > { %13722 = vpow2.f32 %v4224_v42 }
 0xb8f   : > { %v4222_v48 = vmul.f32 1.442695, %v4217_v46 }
 0xb91   : > { %13724 = vpow2.f32 %v4222_v48 }
 0xb92   : > { %13726 = vpow2.f32 %v4226_v47 }
 0xb97   : > { %v13721_v50 = vpop.eup %13720 }
 0xb98   : > { %v4228_v51 = vsel %vm3458_vm4, %v13721_v50, 0.0  ;;  %v13723_v54 = vpop.eup %13722 }
 0xb99   : > { %4229 = vadd.xlane.f32.xlu0 %v4228_v51  ;;  %v4234_v61 = vsel %vm3458_vm4, %v13723_v54, 0.0 }
 0xb9b   : > { %v13725_v60 = vpop.eup %13724 }
 0xb9c   : > { %v4231_v62 = vsel %vm3462_vm5, %v13725_v60, 0.0  ;;  %v13727_v40 = vpop.eup %13726 }
 0xb9d   : > { %4235 = vadd.xlane.f32.xlu0 %v4234_v61  ;;  %4232 = vadd.xlane.f32.xlu1 %v4231_v62  ;;  %v4237_v63 = vsel %vm3462_vm5, %v13727_v40, 0.0 }
 0xba1   : > { %4238 = vadd.xlane.f32.xlu1 %v4237_v63 }
 0xbb2   : > { %4250 = vrot.lane.b32.xlu1 %v14545_v19, %s14059_s2 }
 0xbb3   : > { %4299 = vrot.lane.b32.xlu0 %v14575_v14, %s14059_s2 }
 0xbb6   : > { %13283 = vrot.lane.b32.xlu1 %v13282_v53, %s14059_s2 }
 0xbba   : > { %13288 = vrot.lane.b32.xlu1 %v13287_v24, %s14058_s21 }
 0xbbe   : > { %13293 = vrot.lane.b32.xlu1 %v13292_v30, %s14059_s2 }
 0xc26   : > { %v4230_v0 = vpop.xlane.xlu0 %4229 }
 0xc27   : > { %13728 = vrcp.f32 %v4230_v0 }
 0xc2a   : > { %v4236_v2 = vpop.xlane.xlu0 %4235  ;;  %v4233_v5 = vpop.xlane.xlu1 %4232 }
 0xc2b   : > { %13730 = vrcp.f32 %v4233_v5 }
 0xc2c   : > { %13732 = vrcp.f32 %v4236_v2 }
 0xc2e   : > { %v4300_v19 = vpop.permute.xlu0 %4299  ;;  %v4239_v14 = vpop.xlane.xlu1 %4238 }
 0xc2f   : > { %v4305_v7 = vand.u32 %v4300_v19, %v14542_v3  ;;  %13734 = vrcp.f32 %v4239_v14 }
 0xc31   : > { %13014 = vmatpush3.bf16.msra.mxu0 %v4305_v7  ;;  %v13729_v53 = vpop.eup %13728 }
 0xc32   : > { %v4251_v49 = vpop.permute.xlu1 %4250  ;;  %v4244_v30 = vmul.f32 %v13729_v53, %v13721_v50 }
 0xc33   : > { %v4256_v52 = vand.u32 %v4251_v49, %v14542_v3  ;;  %v13344_v3 = vld [vmem:[%s14365_s8 + $0xc] ss:$80 sps:$4 sm:$0xff]  }
 0xc35   : > { %13008 = vmatpush3.bf16.msra.mxu1 %v4256_v52  ;;  %v13731_v41 = vpop.eup %13730 }
 0xc36   : > { %v13733_v4 = vpop.eup %13732  ;;  %v4245_v10 = vmul.f32 %v13731_v41, %v13725_v60  ;;  %13019 = vmatprep.subr.bf16.mxu1 %v13344_v3  ;;  %v13284_v42 = vpop.permute.xlu1 %13283 }
 0xc37   : > { %v4246_v16 = vmul.f32 %v13733_v4, %v13723_v54  ;;  %v13286_v45 = vunpack.i.h.bf16 %v13284_v42  ;;  %v13285_v44 = vunpack.i.l.bf16 %v13284_v42 }
 0xc38   : > { %v4248_v15 = vpack.c.bf16 %v4245_v10, %v4244_v30 }
 0xc39   : > { %v13735_v11 = vpop.eup %13734  ;;  %v4399_v6 = vsel %vm3363_vm3, %v14625_v31, %v13286_v45  ;;  %v4398_v8 = vsel %vm3363_vm3, %v14623_v27, %v13285_v44 }
 0xc3a   : > { %v4247_v17 = vmul.f32 %v13735_v11, %v13727_v40  ;;  %13010 = vmatmul.mubr.msk.bf16.vlgmr.msra.gmra.mrb[28].mxu1 %vm3458_vm4, %v4248_v15  ;;  %v13289_v39 = vpop.permute.xlu1 %13288 }
 0xc3b   : > { %13020 = vmatpush3.bf16.msra.mxu1 %v13344_v3  ;;  %v13291_v46 = vunpack.i.h.bf16 %v13289_v39  ;;  %v13290_v47 = vunpack.i.l.bf16 %v13289_v39 }
 0xc3c   : > { %v4249_v18 = vpack.c.bf16 %v4247_v17, %v4246_v16  ;;  %13021 = vmatprep.subr.bf16.mxu1 %v13345_v21 }
 0xc3d   : > { %v4403_v54 = vsel %vm4400_vm6, %v4398_v8, %v13290_v47  ;;  %v4404_v60 = vsel %vm4400_vm6, %v4399_v6, %v13291_v46 }
 0xc3e   : > { %13016 = vmatmul.mubr.msk.bf16.vlgmr.msra.gmra.mrb[40].mxu0 %vm3458_vm4, %v4249_v18  ;;  %v13294_v48 = vpop.permute.xlu1 %13293 }
 0xc3f   : > { %7060 = vmatprep.mubr.bf16.mxu0 %v14052_v43  ;;  %13022 = vmatpush3.bf16.msra.mxu1 %v13345_v21  ;;  %v13296_v61 = vunpack.i.h.bf16 %v13294_v48  ;;  %v13295_v62 = vunpack.i.l.bf16 %v13294_v48 }
 0xc40   : > { %13023 = vmatprep.subr.bf16.mxu1 %v13346_v23 }
 0xc41   : > { %v4397_v27 = vsel %vm3363_vm3, %v14621_v22, %v13296_v61  ;;  %v4396_v14 = vsel %vm3363_vm3, %v14619_v20, %v13295_v62  ;;  %v14801_v61 = vld [vmem:[%s14373_s12] sm:$0xff] }
 0xc42   : > { %v4412_v62 = vrot.slane %v14801_v61, 3 }
 0xc43   : > { %13024 = vmatpush3.bf16.msra.mxu1 %v13346_v23 }
 0xc44   : > { %13025 = vmatprep.subr.bf16.mxu1 %v13347_v26 }
 0xc47   : > { %13026 = vmatpush3.bf16.msra.mxu1 %v13347_v26 }
 0xc48   : > { %13027 = vmatprep.subr.bf16.mxu1 %v13348_v12 }
 0xc4b   : > { %13028 = vmatpush3.bf16.msra.mxu1 %v13348_v12 }
 0xc4c   : > { %13029 = vmatprep.subr.bf16.mxu1 %v13349_v13 }
 0xc4f   : > { %13030 = vmatpush3.bf16.msra.mxu1 %v13349_v13 }
 0xc50   : > { %13031 = vmatprep.subr.bf16.mxu1 %v13350_v37 }
 0xc53   : > { %13032 = vmatpush3.bf16.msra.mxu1 %v13350_v37 }
 0xc54   : > { %13033 = vmatprep.subr.bf16.mxu1 %v13351_v38 }
 0xc57   : > { %13034 = vmatpush3.bf16.msra.mxu1 %v13351_v38 }
 0xd0d   : > { %v4292_v24 = vpop.f32.mrb[28].mxu1 }
 0xd0e   : > { %v13011_v25 = vpop.f32.mrb[29].mxu1 }
 0xd0f   : > { %v4295_v55 = vpop.f32.mrb[30].mxu1 }
 0xd10   : > { %v13307_v28 = vpack.i.bf16 %v4295_v55, %v4292_v24  ;;  %v13012_v29 = vpop.f32.mrb[31].mxu1 }
 0xd11   : > { %v4341_v32 = vpop.f32.mrb[40].mxu0 }
 0xd12   : > { %v13017_v33 = vpop.f32.mrb[41].mxu0  ;;  %13308 = vrot.lane.b32.xlu1 %v13307_v28, %s14057_s15 }
 0xd13   : > { %v4344_v34 = vpop.f32.mrb[42].mxu0 }
 0xd14   : > { %v13297_v35 = vpack.i.bf16 %v4344_v34, %v4341_v32  ;;  %v13018_v36 = vpop.f32.mrb[43].mxu0 }
 0xd16   : > { %13298 = vrot.lane.b32.xlu0 %v13297_v35, %s14057_s15 }
 0xd1a   : > { %13303 = vrot.lane.b32.xlu0 %v13302_v9, %s14058_s21 }
 0xd84   : > { %v13309_v40 = vpop.permute.xlu1 %13308 }
 0xd85   : > { %v13311_v7 = vunpack.i.h.bf16 %v13309_v40  ;;  %v13310_v52 = vunpack.i.l.bf16 %v13309_v40  ;;  %v4416_v40 = vrot.slane %v4412_v62, %v14459_v56 }
 0xd88   : > { %v13299_v50 = vpop.permute.xlu0 %13298 }
 0xd89   : > { %v13301_v9 = vunpack.i.h.bf16 %v13299_v50  ;;  %v13300_v51 = vunpack.i.l.bf16 %v13299_v50 }
 0xd8b   : > { %v4409_v63 = vsel %vm4405_vm7, %v4404_v60, %v13301_v9  ;;  %v4408_v0 = vsel %vm4405_vm7, %v4403_v54, %v13300_v51 }
 0xd8c   : > { %v4411_v2 = vpack.c.bf16 %v4409_v63, %v4408_v0  ;;  %v13304_v5 = vpop.permute.xlu0 %13303  ;;  %v12070_v53 = vpack.c.bf16 %v4409_v63, %v4409_v63  ;;  %v4515_v63 = vcombine.high %v4416_v40, %v4416_v40  ;;  %v4522_v0 = vrot.slane %v4416_v40, %v14425_v1 }
 0xd8d   : > { %v13306_v19 = vunpack.i.h.bf16 %v13304_v5  ;;  %v13305_v31 = vunpack.i.l.bf16 %v13304_v5 }
 0xd8e   : > { %v4465_v49 = vrot.slane %v4411_v2, %v14425_v1  ;;  %v4472_v18 = vrot.slane %v12070_v53, %v14425_v1  ;;  %v4529_v2 = vrot.slane %v4515_v63, %v14425_v1  ;;  %v4530_v5 = vcombine.high %v4522_v0, %v4522_v0 }
 0xd8f   : > { %v4402_v41 = vsel %vm4400_vm6, %v4397_v27, %v13306_v19  ;;  %v4401_v4 = vsel %vm4400_vm6, %v4396_v14, %v13305_v31  ;;  %v4538_v31 = vrot.slane %v4522_v0, %v14425_v1 }
 0xd90   : > { %v4473_v30 = vcombine.high %v4465_v49, %v4465_v49  ;;  %v4480_v10 = vrot.slane %v4465_v49, %v14425_v1  ;;  %v4407_v11 = vsel %vm4405_vm7, %v4402_v41, %v13311_v7  ;;  %v4406_v22 = vsel %vm4405_vm7, %v4401_v4, %v13310_v52 }
 0xd91   : > { %v12069_v15 = vpack.c.bf16 %v4407_v11, %v4407_v11  ;;  %v4410_v17 = vpack.c.bf16 %v4407_v11, %v4406_v22  ;;  %v4487_v33 = vrot.slane %v4472_v18, %v14425_v1  ;;  %v4531_v19 = vcombine.high %v4529_v2, %v4529_v2 }
 0xd92   : > { %v4494_v16 = vrot.slane %v4473_v30, %v14425_v1  ;;  %v4495_v20 = vcombine.high %v4480_v10, %v4480_v10  ;;  %v4507_v3 = vunpack.i.h.s16 %v4480_v10  ;;  %v4545_v27 = vrot.slane %v4529_v2, %v14425_v1 }
 0xd93   : > { %v4433_v21 = vrot.slane %v12069_v15, %v14425_v1  ;;  %v4426_v23 = vrot.slane %v4410_v17, %v14425_v1  ;;  %v4552_v14 = vrot.slane %v4530_v5, %v14425_v1  ;;  %v4559_v7 = vrot.slane %v4531_v19, %v14425_v1 }
 0xd94   : > { %v4496_v24 = vcombine.high %v4494_v16, %v4494_v16  ;;  %v4509_v25 = vunpack.i.h.s16 %v4494_v16  ;;  %v4511_v26 = vunpack.i.h.s16 %v4495_v20  ;;  %v12072_v12 = vpack.i.b16 %v4494_v16, %v4507_v3 }
 0xd95   : > { %v4448_v55 = vrot.slane %v4433_v21, %v14425_v1  ;;  %v4434_v28 = vcombine.high %v4426_v23, %v4426_v23  ;;  %v4441_v36 = vrot.slane %v4426_v23, %v14425_v1  ;;  %v4560_v49 = vcombine.high %v4538_v31, %v4538_v31 }
 0xd96   : > { %v12073_v29 = vpack.i.b16 %v4495_v20, %v4509_v25  ;;  %v12074_v32 = vpack.i.b16 %v4496_v24, %v4511_v26  ;;  %v4513_v35 = vunpack.i.h.s16 %v4496_v24  ;;  %v4561_v52 = vcombine.high %v4545_v27, %v4545_v27 }
 0xd97   : > { %v12071_v34 = vpack.i.b16 %v4480_v10, %v4448_v55  ;;  %v4455_v13 = vrot.slane %v4434_v28, %v14425_v1  ;;  %v4562_v53 = vcombine.high %v4552_v14, %v4552_v14  ;;  %v4686_v41 = vcombine.low %v4538_v31, %v4552_v14 }
 0xd98   : > { %v4576_v37 = vcombine.low %v12073_v29, %v12074_v32  ;;  %v12075_v42 = vpack.i.b16 %v4487_v33, %v4513_v35  ;;  %v12085_v4 = vcombine.high %v4538_v31, %v4552_v14  ;;  %v4688_v30 = vcombine.low %v4545_v27, %v4559_v7 }
 0xd99   : > { %v4575_v38 = vcombine.low %v12071_v34, %v12072_v12  ;;  %v4573_v39 = vcombine.low %v4441_v36, %v4455_v13  ;;  %v12076_v45 = vcombine.high %v4441_v36, %v4455_v13  ;;  %v12086_v10 = vcombine.high %v4545_v27, %v4559_v7 }
 0xd9a   : > { %v4604_v44 = vrot.slane %v4576_v37, %v14425_v1  ;;  %v4628_v9 = vrot.slane %v12075_v42, %v14425_v1  ;;  %v4735_v11 = vcombine.low %v4538_v31, %v4538_v31  ;;  %v4736_v15 = vcombine.low %v4552_v14, %v4560_v49 }
 0xd9b   : > { %v4597_v46 = vrot.slane %v4575_v38, %v14425_v1  ;;  %v4583_v47 = vrot.slane %v4573_v39, %v14425_v1  ;;  %v4590_v48 = vrot.slane %v12076_v45, %v14425_v1  ;;  %v4737_v22 = vcombine.low %v4562_v53, %v4545_v27 }
 0xd9c   : > { %v4635_v60 = vrot.slane %v4628_v9, %v14425_v1  ;;  %v4738_v16 = vcombine.low %v4559_v7, %v4561_v52  ;;  %v4563_v20 = vcombine.high %v4559_v7, %v4559_v7  ;;  %v4696_v17 = vrot.slane %v4686_v41, %v14425_v1 }
 0xd9d   : > { %v4606_v50 = vcombine.low %v4597_v46, %v4604_v44  ;;  %v4605_v6 = vcombine.low %v4583_v47, %v4590_v48  ;;  %v4703_v18 = vrot.slane %v12085_v4, %v14425_v1  ;;  %v4710_v3 = vrot.slane %v4688_v30, %v14425_v1 }
 0xd9e   : > { %v4717_v21 = vrot.slane %v12086_v10, %v14425_v1  ;;  %v4745_v23 = vrot.slane %v4735_v11, %v14425_v1  ;;  %v4752_v24 = vrot.slane %v4736_v15, %v14425_v1  ;;  %v4759_v25 = vrot.slane %v4737_v22, %v14425_v1 }
 0xd9f   : > { %v4620_v8 = vrot.slane %v4606_v50, %v14425_v1  ;;  %v4613_v51 = vrot.slane %v4605_v6, %v14425_v1  ;;  %v4766_v26 = vrot.slane %v4738_v16, %v14425_v1  ;;  %v4784_v55 = vcombine.low %v4563_v20, %v4538_v31 }
 0xda0   : > { %v4718_v28 = vcombine.low %v4696_v17, %v4703_v18  ;;  %v4719_v29 = vcombine.low %v4710_v3, %v4717_v21  ;;  %v4767_v32 = vcombine.low %v4745_v23, %v4752_v24  ;;  %v13753_v24 = vld [vmem:[#allocation2 + $0x18] sm:$0x1] }
 0xda1   : > { %v4621_v54 = vcombine.low %v4613_v51, %v4620_v8  ;;  %v4768_v33 = vcombine.low %v4759_v25, %v4766_v26  ;;  %v4791_v34 = vrot.slane %v4784_v55, %v14425_v1 }
 0xda2   : > { %v4726_v12 = vrot.slane %v4718_v28, %v14425_v1  ;;  %v4733_v35 = vrot.slane %v4719_v29, %v14425_v1  ;;  %v4775_v36 = vrot.slane %v4767_v32, %v14425_v1 }
 0xda3   : > { %13035 = vmatprep.mubr.bf16.mxu1 %v4621_v54  ;;  %v4782_v13 = vrot.slane %v4768_v33, %v14425_v1  ;;  %v4798_v37 = vrot.slane %v4791_v34, %v14425_v1 }
 0xda4   : > { %13036 = vmatmul.mubr.bf16.vlgmr.msra.gmra.mrb[32].mxu1 %v4635_v60  ;;  %v4734_v38 = vcombine.low %v4726_v12, %v4733_v35 }
 0xda5   : > { %7111 = vmatprep.mubr.bf16.mxu1 %v14052_v43  ;;  %v4783_v39 = vcombine.low %v4775_v36, %v4782_v13 }
 0xe77   : > { %v13037_v42 = vpop.f32.mrb[32].mxu1 }
 0xe78   : > { %v4845_v45 = vadd.f32 %v13037_v42, %v4798_v37  ;;  %v4836_v44 = vpop.f32.mrb[33].mxu1  ;;  %v13754_v42 = vld [vmem:[#allocation2 + $0x8] sm:$0x1] }
 0xe79   : > { %v4837_v46 = vadd.f32 %v4836_v44, %v4734_v38  ;;  %v13038_v47 = vpop.f32.mrb[34].mxu1 }
 0xe7a   : > { %v4957_v48 = vrot.slane %v4845_v45, %v14425_v1  ;;  %v4839_v50 = vpop.f32.mrb[35].mxu1 }
 0xe7b   : > { %v4853_v6 = vcombine.high %v4837_v46, %v4837_v46  ;;  %v4860_v8 = vrot.slane %v4837_v46, %v14425_v1  ;;  %v4840_v9 = vadd.f32 %v4839_v50, %v4783_v39 }
 0xe7c   : > { %v4958_v51 = vcombine.high %v4957_v48, %v4957_v48  ;;  %v4965_v40 = vrot.slane %v4957_v48, %v14425_v1 }
 0xe7d   : > { %v4867_v54 = vrot.slane %v4853_v6, %v14425_v1  ;;  %v4868_v60 = vcombine.high %v4860_v8, %v4860_v8  ;;  %v4902_v62 = vcombine.high %v4840_v9, %v4840_v9  ;;  %v4909_v0 = vrot.slane %v4840_v9, %v14425_v1  ;;  %v13755_v9 = vld [vmem:[#allocation2] sm:$0xff] }
 0xe7e   : > { %v4972_v63 = vrot.slane %v4958_v51, %v14425_v1  ;;  %v4876_v5 = vrot.slane %v4860_v8, %v14425_v1 }
 0xe7f   : > { %v4869_v2 = vcombine.high %v4867_v54, %v4867_v54  ;;  %v4890_v19 = vrot.slane %v4868_v60, %v14425_v1  ;;  %v4916_v31 = vrot.slane %v4902_v62, %v14425_v1  ;;  %v4883_v27 = vrot.slane %v4867_v54, %v14425_v1 }
 0xe80   : > { %v4917_v14 = vcombine.high %v4909_v0, %v4909_v0  ;;  %v4925_v7 = vrot.slane %v4909_v0, %v14425_v1  ;;  %v5091_v49 = vrot.slane %v4972_v63, %v14425_v1 }
 0xe81   : > { %v4897_v52 = vrot.slane %v4869_v2, %v14425_v1  ;;  %v4973_v53 = vcombine.low %v4876_v5, %v4890_v19  ;;  %v12087_v41 = vcombine.high %v4876_v5, %v4890_v19  ;;  %v4918_v4 = vcombine.high %v4916_v31, %v4916_v31 }
 0xe82   : > { %v4932_v30 = vrot.slane %v4916_v31, %v14425_v1  ;;  %v4939_v10 = vrot.slane %v4917_v14, %v14425_v1  ;;  %v4947_v11 = vcombine.high %v4925_v7, %v4925_v7  ;;  %v5098_v15 = vrot.slane %v5091_v49, %v14425_v1 }
 0xe83   : > { %v4975_v22 = vcombine.low %v4883_v27, %v4897_v52  ;;  %v12088_v16 = vcombine.high %v4883_v27, %v4897_v52  ;;  %v4983_v20 = vrot.slane %v4973_v53, %v14425_v1  ;;  %v4990_v17 = vrot.slane %v12087_v41, %v14425_v1 }
 0xe84   : > { %v4946_v18 = vrot.slane %v4918_v4, %v14425_v1  ;;  %v4948_v3 = vcombine.high %v4932_v30, %v4932_v30  ;;  %v4949_v21 = vcombine.high %v4939_v10, %v4939_v10  ;;  %v5036_v23 = vcombine.low %v4939_v10, %v4947_v11 }
 0xe85   : > { %v5106_v25 = vadd.f32 %v13753_v24, %v5098_v15  ;;  %v5028_v26 = vrot.slane %v4925_v7, %v14425_v1  ;;  %v4997_v55 = vrot.slane %v4975_v22, %v14425_v1  ;;  %v5004_v28 = vrot.slane %v12088_v16, %v14425_v1  ;;  %v13354_v16 = vld [vmem:[%s14365_s8 + $0x14] ss:$80 sps:$4 sm:$0xff]   ;;  %v13361_v24 = vld [vmem:[%s14365_s8 + $0xb8] ss:$80 sps:$4 sm:$0xff]  }
 0xe86   : > { %v4950_v29 = vcombine.high %v4946_v18, %v4946_v18  ;;  %v5037_v32 = vcombine.low %v4949_v21, %v4932_v30  ;;  %v5038_v33 = vcombine.low %v4946_v18, %v4948_v3  ;;  %v5005_v34 = vcombine.low %v4983_v20, %v4990_v17  ;;  %v13357_v20 = vld [vmem:[%s14365_s8 + $0x1c] ss:$80 sps:$4 sm:$0xff]   ;;  %v13352_v17 = vld [vmem:[%s14365_s8 + $0x10] ss:$80 sps:$4 sm:$0xff]   ;;  %v13355_v18 = vld [vmem:[%s14365_s8 + $0x18] ss:$80 sps:$4 sm:$0xff]   ;;  %7028 = vmatprep.subr.bf16.mxu0 %v13354_v16 }
 0xe87   : > { %v5115_v12 = vsel %vm5109_vm8, %v5106_v25, 0.0  ;;  %v5035_v35 = vrot.slane %v5028_v26, %v14425_v1  ;;  %v5006_v36 = vcombine.low %v4997_v55, %v5004_v28  ;;  %v5046_v37 = vrot.slane %v5036_v23, %v14425_v1  ;;  %7079 = vmatprep.subr.bf16.mxu1 %v13357_v20  ;;  %7029 = vmatpush1.bf16.msra.mxu0 %v13352_v17  ;;  %v13360_v3 = vld [vmem:[%s14365_s8 + $0xb4] ss:$80 sps:$4 sm:$0xff]   ;;  %v13363_v21 = vld [vmem:[%s14365_s8 + $0xbc] ss:$80 sps:$4 sm:$0xff]  }
 0xe88   : > { %5116 = vadd.xlane.f32.xlu0 %v5115_v12  ;;  %v5039_v13 = vcombine.low %v4950_v29, %v4965_v40  ;;  %v5053_v38 = vrot.slane %v5037_v32, %v14425_v1  ;;  %v5013_v45 = vrot.slane %v5005_v34, %v14425_v1  ;;  %v5060_v46 = vrot.slane %v5038_v33, %v14425_v1  ;;  %v13756_v40 = vld [vmem:[#allocation2 + $0x10] sm:$0xff]  ;;  %v13367_v28 = vld [vmem:[%s14365_s8 + $0x158] ss:$80 sps:$4 sm:$0xff]  }
 0xe89   : > { %v5104_v39 = vadd.f32 %v13754_v42, %v5035_v35  ;;  %v5020_v44 = vrot.slane %v5006_v36, %v14425_v1  ;;  %7080 = vmatpush1.bf16.msra.mxu1 %v13355_v18  ;;  %v13358_v23 = vld [vmem:[%s14365_s8 + $0xb0] ss:$80 sps:$4 sm:$0xff]   ;;  %7030 = vmatprep.subr.bf16.mxu0 %v13360_v3  ;;  %v13369_v26 = vld [vmem:[%s14365_s8 + $0x15c] ss:$80 sps:$4 sm:$0xff]   ;;  %v13372_v29 = vld [vmem:[%s14365_s8 + $0x1f4] ss:$80 sps:$4 sm:$0xff]  }
 0xe8a   : > { %v5067_v47 = vrot.slane %v5039_v13, %v14425_v1  ;;  %v5068_v48 = vcombine.low %v5046_v37, %v5053_v38  ;;  %7081 = vmatprep.subr.bf16.mxu1 %v13363_v21  ;;  %v13364_v55 = vld [vmem:[%s14365_s8 + $0x150] ss:$80 sps:$4 sm:$0xff]   ;;  %v13375_v32 = vld [vmem:[%s14365_s8 + $0x1fc] ss:$80 sps:$4 sm:$0xff]   ;;  %v13373_v34 = vld [vmem:[%s14365_s8 + $0x1f8] ss:$80 sps:$4 sm:$0xff]  }
 0xe8b   : > { %v5110_v50 = vsel %vm5109_vm8, %v5104_v39, 0.0  ;;  %v5021_v6 = vcombine.low %v5013_v45, %v5020_v44  ;;  %7031 = vmatpush1.bf16.msra.mxu0 %v13358_v23  ;;  %v13370_v33 = vld [vmem:[%s14365_s8 + $0x1f0] ss:$80 sps:$4 sm:$0xff]   ;;  %v13378_v12 = vld [vmem:[%s14365_s8 + $0x294] ss:$80 sps:$4 sm:$0xff]  }
 0xe8c   : > { %5111 = vadd.xlane.f32.xlu0 %v5110_v50  ;;  %v5069_v8 = vcombine.low %v5060_v46, %v5067_v47  ;;  %v5076_v54 = vrot.slane %v5068_v48, %v14425_v1  ;;  %v13381_v35 = vld [vmem:[%s14365_s8 + $0x29c] ss:$80 sps:$4 sm:$0xff]   ;;  %v13376_v36 = vld [vmem:[%s14365_s8 + $0x290] ss:$80 sps:$4 sm:$0xff]   ;;  %v13379_v13 = vld [vmem:[%s14365_s8 + $0x298] ss:$80 sps:$4 sm:$0xff]  }
 0xe8d   : > { %v5103_v51 = vadd.f32 %v13755_v9, %v5021_v6  ;;  %7082 = vmatpush1.bf16.msra.mxu1 %v13361_v24  ;;  %v13384_v37 = vld [vmem:[%s14365_s8 + $0x334] ss:$80 sps:$4 sm:$0xff]   ;;  %v13387_v38 = vld [vmem:[%s14365_s8 + $0x33c] ss:$80 sps:$4 sm:$0xff]   ;;  %v13382_v42 = vld [vmem:[%s14365_s8 + $0x330] ss:$80 sps:$4 sm:$0xff]  }
 0xe8e   : > { %v5083_v60 = vrot.slane %v5069_v8, %v14425_v1  ;;  %7083 = vmatprep.subr.bf16.mxu1 %v13369_v26  ;;  %v13390_v45 = vld [vmem:[%s14365_s8 + $0x3d4] ss:$80 sps:$4 sm:$0xff]   ;;  %v13393_v44 = vld [vmem:[%s14365_s8 + $0x3dc] ss:$80 sps:$4 sm:$0xff]   ;;  %v13388_v46 = vld [vmem:[%s14365_s8 + $0x3d0] ss:$80 sps:$4 sm:$0xff]  }
 0xe8f   : > { %v13391_v47 = vld [vmem:[%s14365_s8 + $0x3d8] ss:$80 sps:$4 sm:$0xff]   ;;  %v13396_v48 = vld [vmem:[%s14365_s8 + $0x474] ss:$80 sps:$4 sm:$0xff]   ;;  %v13399_v50 = vld [vmem:[%s14365_s8 + $0x47c] ss:$80 sps:$4 sm:$0xff]  }
 0xe90   : > { %5107 = vadd.xlane.f32.xlu0 %v5103_v51  ;;  %v5084_v62 = vcombine.low %v5076_v54, %v5083_v60  ;;  %v13394_v6 = vld [vmem:[%s14365_s8 + $0x470] ss:$80 sps:$4 sm:$0xff]   ;;  %v13397_v8 = vld [vmem:[%s14365_s8 + $0x478] ss:$80 sps:$4 sm:$0xff]   ;;  %v13402_v9 = vld [vmem:[%s14365_s8 + $0x24] ss:$80 sps:$4 sm:$0xff]  }
 0xe91   : > { %7084 = vmatpush1.bf16.msra.mxu1 %v13367_v28 }
 0xe92   : > { %v5105_v63 = vadd.f32 %v13756_v40, %v5084_v62  ;;  %7085 = vmatprep.subr.bf16.mxu1 %v13375_v32 }
 0xe94   : > { %5113 = vadd.xlane.f32.xlu1 %v5105_v63 }
 0xe95   : > { %7086 = vmatpush1.bf16.msra.mxu1 %v13373_v34 }
 0xe96   : > { %7087 = vmatprep.subr.bf16.mxu1 %v13381_v35 }
 0xe99   : > { %7088 = vmatpush1.bf16.msra.mxu1 %v13379_v13 }
 0xe9a   : > { %7089 = vmatprep.subr.bf16.mxu1 %v13387_v38 }
 0xf15   : > { %v5117_v0 = vpop.xlane.xlu0 %5116 }
 0xf16   : > { %v5122_v2 = vmul.f32 0.0078125, %v5117_v0 }
 0xf18   : > { %v14858_v5 = vsub.f32 %v5106_v25, %v5122_v2  ;;  %v13366_v25 = vld [vmem:[%s14365_s8 + $0x154] ss:$80 sps:$4 sm:$0xff]  }
 0xf19   : > { %v5112_v19 = vpop.xlane.xlu0 %5111  ;;  %7032 = vmatprep.subr.bf16.mxu0 %v13366_v25 }
 0xf1a   : > { %v5120_v31 = vmul.f32 0.0078125, %v5112_v19  ;;  %v5130_v27 = vmul.f32 %v14858_v5, %v14858_v5  ;;  %7033 = vmatpush1.bf16.msra.mxu0 %v13364_v55 }
 0xf1b   : > { %7034 = vmatprep.subr.bf16.mxu0 %v13372_v29 }
 0xf1c   : > { %v14862_v14 = vsub.f32 %v5104_v39, %v5120_v31  ;;  %v5138_v7 = vsel %vm5109_vm8, %v5130_v27, 0.0  ;;  %v13385_v39 = vld [vmem:[%s14365_s8 + $0x338] ss:$80 sps:$4 sm:$0xff]  }
 0xf1d   : > { %5139 = vadd.xlane.f32.xlu1 %v5138_v7  ;;  %v5108_v52 = vpop.xlane.xlu0 %5107  ;;  %7090 = vmatpush1.bf16.msra.mxu1 %v13385_v39  ;;  %v5157_v7 = vrot.slane %v14801_v61, 4 }
 0xf1e   : > { %v5128_v49 = vmul.f32 %v14862_v14, %v14862_v14  ;;  %v5119_v4 = vmul.f32 0.0078125, %v5108_v52  ;;  %7035 = vmatpush1.bf16.msra.mxu0 %v13370_v33  ;;  %7091 = vmatprep.subr.bf16.mxu1 %v13393_v44 }
 0xf1f   : > { %7036 = vmatprep.subr.bf16.mxu0 %v13378_v12 }
 0xf20   : > { %v5133_v53 = vsel %vm5109_vm8, %v5128_v49, 0.0  ;;  %v14870_v11 = vsub.f32 %v5103_v51, %v5119_v4  ;;  %v13405_v51 = vld [vmem:[%s14365_s8 + $0x2c] ss:$80 sps:$4 sm:$0xff]   ;;  %v5161_v4 = vrot.slane %v5157_v7, %v14459_v56 }
 0xf21   : > { %5134 = vadd.xlane.f32.xlu1 %v5133_v53  ;;  %v5114_v41 = vpop.xlane.xlu1 %5113  ;;  %7092 = vmatpush1.bf16.msra.mxu1 %v13391_v47 }
 0xf22   : > { %v5121_v30 = vmul.f32 0.0078125, %v5114_v41  ;;  %v5127_v22 = vmul.f32 %v14870_v11, %v14870_v11  ;;  %7037 = vmatpush1.bf16.msra.mxu0 %v13376_v36  ;;  %7093 = vmatprep.subr.bf16.mxu1 %v13399_v50 }
 0xf23   : > { %7038 = vmatprep.subr.bf16.mxu0 %v13384_v37 }
 0xf24   : > { %v14868_v10 = vsub.f32 %v5105_v63, %v5121_v30  ;;  %v5167_v30 = vrot.slane %v14801_v61, 5 }
 0xf25   : > { %7094 = vmatpush1.bf16.msra.mxu1 %v13397_v8 }
 0xf26   : > { %v5129_v15 = vmul.f32 %v14868_v10, %v14868_v10  ;;  %7039 = vmatpush1.bf16.msra.mxu0 %v13382_v42  ;;  %7181 = vmatprep.subr.bf16.mxu1 %v13405_v51  ;;  %v5171_v20 = vrot.slane %v5167_v30, %v14459_v56  ;;  %v13408_v30 = vld [vmem:[%s14365_s8 + $0xc4] ss:$80 sps:$4 sm:$0xff]  }
 0xf27   : > { %7040 = vmatprep.subr.bf16.mxu0 %v13390_v45 }
 0xf28   : > { %5136 = vadd.xlane.f32.xlu0 %v5129_v15 }
 0xf2a   : > { %7041 = vmatpush1.bf16.msra.mxu0 %v13388_v46 }
 0xf2b   : > { %7042 = vmatprep.subr.bf16.mxu0 %v13396_v48 }
 0xf2c   : > { %5131 = vadd.xlane.f32.xlu0 %v5127_v22 }
 0xf2e   : > { %7043 = vmatpush1.bf16.msra.mxu0 %v13394_v6 }
 0xf2f   : > { %7130 = vmatprep.subr.bf16.mxu0 %v13402_v9 }
 0xfaa   : > { %v5140_v54 = vpop.xlane.xlu1 %5139 }
 0xfab   : > { %v5144_v60 = vmul.f32 0.0078125, %v5140_v54 }
 0xfad   : > { %v5148_v63 = vadd.f32 1e-05, %v5144_v60 }
 0xfae   : > { %v5135_v62 = vpop.xlane.xlu1 %5134 }
 0xfaf   : > { %v5142_v40 = vmul.f32 0.0078125, %v5135_v62 }
 0xfb1   : > { %v5146_v0 = vadd.f32 1e-05, %v5142_v40 }
 0xfb3   : > { %13736 = vrsqrt.f32 %v5146_v0 }
 0xfb4   : > { %13738 = vrsqrt.f32 %v5148_v63 }
 0xfb5   : > { %v5137_v2 = vpop.xlane.xlu0 %5136 }
 0xfb6   : > { %v5143_v19 = vmul.f32 0.0078125, %v5137_v2 }
 0xfb8   : > { %v5147_v31 = vadd.f32 1e-05, %v5143_v19 }
 0xfb9   : > { %v5132_v27 = vpop.xlane.xlu0 %5131 }
 0xfba   : > { %13740 = vrsqrt.f32 %v5147_v31  ;;  %v5141_v49 = vmul.f32 0.0078125, %v5132_v27 }
 0xfbc   : > { %v5145_v52 = vadd.f32 1e-05, %v5141_v49 }
 0xfbd   : > { %v13737_v53 = vpop.eup %13736 }
 0xfbe   : > { %v13739_v41 = vpop.eup %13738  ;;  %v5154_v15 = vmul.f32 %v13737_v53, %v14862_v14  ;;  %13742 = vrsqrt.f32 %v5145_v52  ;;  %v13400_v52 = vld [vmem:[%s14365_s8 + $0x20] ss:$80 sps:$4 sm:$0xff]   ;;  %v13403_v53 = vld [vmem:[%s14365_s8 + $0x28] ss:$80 sps:$4 sm:$0xff]  }
 0xfbf   : > { %v5156_v16 = vmul.f32 %v13739_v41, %v14858_v5 }
 0xfc0   : > { %v5164_v22 = vmul.f32 %v5161_v4, %v5154_v15  ;;  %v13411_v15 = vld [vmem:[%s14365_s8 + $0xcc] ss:$80 sps:$4 sm:$0xff]  }
 0xfc1   : > { %v5166_v3 = vmul.f32 %v5161_v4, %v5156_v16  ;;  %v13409_v16 = vld [vmem:[%s14365_s8 + $0xc8] ss:$80 sps:$4 sm:$0xff]  }
 0xfc2   : > { %v14916_v18 = vadd.f32 %v5171_v20, %v5164_v22  ;;  %v13406_v22 = vld [vmem:[%s14365_s8 + $0xc0] ss:$80 sps:$4 sm:$0xff]  }
 0xfc3   : > { %v14921_v61 = vadd.f32 %v5171_v20, %v5166_v3 }
 0xfc4   : > { %v13741_v17 = vpop.eup %13740  ;;  %16903 = vst [vmem:[#allocation27_spill] sm:$0xff] %v14916_v18  ;;  %v12089_v25 = vpack.c.bf16 %v14916_v18, %v14916_v18 }
 0xfc5   : > { %v5155_v21 = vmul.f32 %v13741_v17, %v14868_v10  ;;  %16904 = vst [vmem:[#allocation28_spill] sm:$0xff] %v14921_v61  ;;  %v12090_v50 = vpack.c.bf16 %v14921_v61, %v14921_v61  ;;  %v13417_v17 = vld [vmem:[%s14365_s8 + $0x16c] ss:$80 sps:$4 sm:$0xff]  }
 0xfc6   : > { %v5268_v28 = vrot.slane %v12089_v25, %v14425_v1  ;;  %v13420_v25 = vld [vmem:[%s14365_s8 + $0x204] ss:$80 sps:$4 sm:$0xff]  }
 0xfc7   : > { %v5165_v23 = vmul.f32 %v5161_v4, %v5155_v21  ;;  %v5307_v40 = vrot.slane %v12090_v50, %v14425_v1  ;;  %v13412_v21 = vld [vmem:[%s14365_s8 + $0x160] ss:$80 sps:$4 sm:$0xff]   ;;  %v13451_v50 = vld [vmem:[%s14365_s8 + $0x38] ss:$80 sps:$4 sm:$0xff]  }
 0xfc8   : > { %v13743_v24 = vpop.eup %13742  ;;  %v5283_v12 = vrot.slane %v5268_v28, %v14425_v1  ;;  %v13426_v28 = vld [vmem:[%s14365_s8 + $0x2a4] ss:$80 sps:$4 sm:$0xff]  }
 0xfc9   : > { %v14923_v14 = vadd.f32 %v5171_v20, %v5165_v23  ;;  %v5153_v26 = vmul.f32 %v13743_v24, %v14870_v11  ;;  %v5322_v7 = vrot.slane %v5307_v40, %v14425_v1  ;;  %v13415_v23 = vld [vmem:[%s14365_s8 + $0x168] ss:$80 sps:$4 sm:$0xff]  }
 0xfca   : > { %v13463_v40 = vld [vmem:[%s14365_s8 + $0x178] ss:$80 sps:$4 sm:$0xff]  }
 0xfcb   : > { %16905 = vst [vmem:[#allocation29_spill] sm:$0xff] %v14923_v14  ;;  %v5178_v5 = vpack.c.bf16 %v14921_v61, %v14923_v14  ;;  %v5163_v55 = vmul.f32 %v5161_v4, %v5153_v26  ;;  %v13423_v26 = vld [vmem:[%s14365_s8 + $0x20c] ss:$80 sps:$4 sm:$0xff]  }
 0xfcd   : > { %v5300_v29 = vrot.slane %v5178_v5, %v14425_v1  ;;  %v14930_v10 = vadd.f32 %v5171_v20, %v5163_v55  ;;  %v13414_v20 = vld [vmem:[%s14365_s8 + $0x164] ss:$80 sps:$4 sm:$0xff]   ;;  %v13418_v5 = vld [vmem:[%s14365_s8 + $0x200] ss:$80 sps:$4 sm:$0xff]   ;;  %v13421_v55 = vld [vmem:[%s14365_s8 + $0x208] ss:$80 sps:$4 sm:$0xff]  }
 0xfcf   : > { %16906 = vst [vmem:[#allocation30_spill] sm:$0xff] %v14930_v10  ;;  %v5308_v32 = vcombine.high %v5300_v29, %v5300_v29  ;;  %v5315_v33 = vrot.slane %v5300_v29, %v14425_v1  ;;  %v5177_v34 = vpack.c.bf16 %v14916_v18, %v14930_v10  ;;  %v13429_v29 = vld [vmem:[%s14365_s8 + $0x2ac] ss:$80 sps:$4 sm:$0xff]  }
 0xfd1   : > { %v5329_v11 = vrot.slane %v5308_v32, %v14425_v1  ;;  %v5330_v35 = vcombine.high %v5315_v33, %v5315_v33  ;;  %v5342_v36 = vunpack.i.h.s16 %v5315_v33  ;;  %v12091_v13 = vpack.i.b16 %v5315_v33, %v5283_v12  ;;  %v13424_v32 = vld [vmem:[%s14365_s8 + $0x2a0] ss:$80 sps:$4 sm:$0xff]   ;;  %v13427_v33 = vld [vmem:[%s14365_s8 + $0x2a8] ss:$80 sps:$4 sm:$0xff]   ;;  %v13435_v12 = vld [vmem:[%s14365_s8 + $0x34c] ss:$80 sps:$4 sm:$0xff]  }
 0xfd2   : > { %v5261_v37 = vrot.slane %v5177_v34, %v14425_v1  ;;  %v13432_v34 = vld [vmem:[%s14365_s8 + $0x344] ss:$80 sps:$4 sm:$0xff]  }
 0xfd3   : > { %v5331_v38 = vcombine.high %v5329_v11, %v5329_v11  ;;  %v5344_v42 = vunpack.i.h.s16 %v5329_v11  ;;  %v5346_v39 = vunpack.i.h.s16 %v5330_v35  ;;  %v12092_v45 = vpack.i.b16 %v5329_v11, %v5342_v36  ;;  %v13430_v11 = vld [vmem:[%s14365_s8 + $0x340] ss:$80 sps:$4 sm:$0xff]   ;;  %v13438_v36 = vld [vmem:[%s14365_s8 + $0x3e4] ss:$80 sps:$4 sm:$0xff]  }
 0xfd4   : > { %v5269_v44 = vcombine.high %v5261_v37, %v5261_v37  ;;  %v5276_v6 = vrot.slane %v5261_v37, %v14425_v1  ;;  %v13436_v37 = vld [vmem:[%s14365_s8 + $0x3e0] ss:$80 sps:$4 sm:$0xff]  }
 0xfd5   : > { %v12093_v46 = vpack.i.b16 %v5330_v35, %v5344_v42  ;;  %v12094_v47 = vpack.i.b16 %v5331_v38, %v5346_v39  ;;  %v5633_v48 = vcombine.low %v12091_v13, %v12092_v45  ;;  %v5348_v19 = vunpack.i.h.s16 %v5331_v38  ;;  %v13433_v35 = vld [vmem:[%s14365_s8 + $0x348] ss:$80 sps:$4 sm:$0xff]   ;;  %v13441_v13 = vld [vmem:[%s14365_s8 + $0x3ec] ss:$80 sps:$4 sm:$0xff]   ;;  %v13444_v42 = vld [vmem:[%s14365_s8 + $0x484] ss:$80 sps:$4 sm:$0xff]  }
 0xfd6   : > { %v5290_v8 = vrot.slane %v5269_v44, %v14425_v1  ;;  %v13439_v38 = vld [vmem:[%s14365_s8 + $0x3e8] ss:$80 sps:$4 sm:$0xff]   ;;  %v13447_v39 = vld [vmem:[%s14365_s8 + $0x48c] ss:$80 sps:$4 sm:$0xff]   ;;  %v13442_v45 = vld [vmem:[%s14365_s8 + $0x480] ss:$80 sps:$4 sm:$0xff]  }
 0xfd7   : > { %v5634_v9 = vcombine.low %v12093_v46, %v12094_v47  ;;  %v5655_v60 = vrot.slane %v5633_v48, %v14425_v1  ;;  %v12095_v41 = vpack.i.b16 %v5322_v7, %v5348_v19  ;;  %v13445_v44 = vld [vmem:[%s14365_s8 + $0x488] ss:$80 sps:$4 sm:$0xff]   ;;  %v13450_v46 = vld [vmem:[%s14365_s8 + $0x34] ss:$80 sps:$4 sm:$0xff]   ;;  %v13453_v47 = vld [vmem:[%s14365_s8 + $0x3c] ss:$80 sps:$4 sm:$0xff]  }
 0xfd8   : > { %v5631_v51 = vcombine.low %v5276_v6, %v5290_v8  ;;  %v12096_v54 = vcombine.high %v5276_v6, %v5290_v8  ;;  %v13448_v48 = vld [vmem:[%s14365_s8 + $0x30] ss:$80 sps:$4 sm:$0xff]   ;;  %v13456_v6 = vld [vmem:[%s14365_s8 + $0xd4] ss:$80 sps:$4 sm:$0xff]   ;;  %v13459_v8 = vld [vmem:[%s14365_s8 + $0xdc] ss:$80 sps:$4 sm:$0xff]  }
 0xfd9   : > { %v5662_v62 = vrot.slane %v5634_v9, %v14425_v1  ;;  %v5686_v3 = vrot.slane %v12095_v41, %v14425_v1  ;;  %v13454_v9 = vld [vmem:[%s14365_s8 + $0xd0] ss:$80 sps:$4 sm:$0xff]   ;;  %v13469_v19 = vld [vmem:[%s14365_s8 + $0x218] ss:$80 sps:$4 sm:$0xff]  }
 0xfda   : > { %v5641_v63 = vrot.slane %v5631_v51, %v14425_v1  ;;  %v5648_v0 = vrot.slane %v12096_v54, %v14425_v1  ;;  %v13457_v51 = vld [vmem:[%s14365_s8 + $0xd8] ss:$80 sps:$4 sm:$0xff]   ;;  %v13462_v54 = vld [vmem:[%s14365_s8 + $0x174] ss:$80 sps:$4 sm:$0xff]   ;;  %v13472_v7 = vld [vmem:[%s14365_s8 + $0x2b0] ss:$80 sps:$4 sm:$0xff]  }
 0xfdb   : > { %v5664_v2 = vcombine.low %v5655_v60, %v5662_v62  ;;  %v14968_v24 = vrot.slane %v5686_v3, %v14425_v1  ;;  %v13465_v60 = vld [vmem:[%s14365_s8 + $0x17c] ss:$80 sps:$4 sm:$0xff]   ;;  %v13460_v62 = vld [vmem:[%s14365_s8 + $0x170] ss:$80 sps:$4 sm:$0xff]  }
 0xfdc   : > { %v5663_v31 = vcombine.low %v5641_v63, %v5648_v0  ;;  %v13468_v63 = vld [vmem:[%s14365_s8 + $0x214] ss:$80 sps:$4 sm:$0xff]   ;;  %v13471_v0 = vld [vmem:[%s14365_s8 + $0x21c] ss:$80 sps:$4 sm:$0xff]   ;;  %v13478_v41 = vld [vmem:[%s14365_s8 + $0x350] ss:$80 sps:$4 sm:$0xff]  }
 0xfdd   : > { %v5678_v27 = vrot.slane %v5664_v2, %v14425_v1  ;;  %v13466_v2 = vld [vmem:[%s14365_s8 + $0x210] ss:$80 sps:$4 sm:$0xff]   ;;  %v13495_v3 = vld [vmem:[%s14365_s8 + $0x49c] ss:$80 sps:$4 sm:$0xff]  }
 0xfde   : > { %v5671_v49 = vrot.slane %v5663_v31, %v14425_v1  ;;  %v13474_v31 = vld [vmem:[%s14365_s8 + $0x2b4] ss:$80 sps:$4 sm:$0xff]  }
 0xfe0   : > { %v14952_v4 = vcombine.low %v5671_v49, %v5678_v27  ;;  %v13477_v27 = vld [vmem:[%s14365_s8 + $0x2bc] ss:$80 sps:$4 sm:$0xff]   ;;  %v13475_v49 = vld [vmem:[%s14365_s8 + $0x2b8] ss:$80 sps:$4 sm:$0xff]  }
 0xfe2   : > { %7061 = vmatmul.mubr.bf16.vlgmr.msra.gmra.mrb[44].mxu0 %v14952_v4  ;;  %7112 = vmatmul.mubr.bf16.vlgmr.msra.gmra.mrb[36].mxu1 %v14952_v4 }
 0xfe3   : > { %7131 = vmatpush1.bf16.msra.mxu0 %v13400_v52  ;;  %7182 = vmatpush1.bf16.msra.mxu1 %v13403_v53  ;;  %v13480_v52 = vld [vmem:[%s14365_s8 + $0x354] ss:$80 sps:$4 sm:$0xff]   ;;  %v13483_v53 = vld [vmem:[%s14365_s8 + $0x35c] ss:$80 sps:$4 sm:$0xff]  }
 0xfe4   : > { %7132 = vmatprep.subr.bf16.mxu0 %v13408_v30  ;;  %7183 = vmatprep.subr.bf16.mxu1 %v13411_v15  ;;  %v13481_v30 = vld [vmem:[%s14365_s8 + $0x358] ss:$80 sps:$4 sm:$0xff]   ;;  %v13486_v15 = vld [vmem:[%s14365_s8 + $0x3f4] ss:$80 sps:$4 sm:$0xff]  }
 0xfe5   : > { %7070 = vmatprep.mubr.bf16.mxu0 %v14052_v43  ;;  %7121 = vmatprep.mubr.bf16.mxu1 %v14052_v43 }
 0xfe7   : > { %7133 = vmatpush1.bf16.msra.mxu0 %v13406_v22  ;;  %7184 = vmatpush1.bf16.msra.mxu1 %v13409_v16  ;;  %v13489_v22 = vld [vmem:[%s14365_s8 + $0x3fc] ss:$80 sps:$4 sm:$0xff]   ;;  %v13484_v16 = vld [vmem:[%s14365_s8 + $0x3f0] ss:$80 sps:$4 sm:$0xff]  }
 0xfe8   : > { %7134 = vmatprep.subr.bf16.mxu0 %v13414_v20  ;;  %7185 = vmatprep.subr.bf16.mxu1 %v13417_v17  ;;  %v13487_v20 = vld [vmem:[%s14365_s8 + $0x3f8] ss:$80 sps:$4 sm:$0xff]   ;;  %v13492_v17 = vld [vmem:[%s14365_s8 + $0x494] ss:$80 sps:$4 sm:$0xff]  }
 0xfea   : > { %7071 = vmatmul.mubr.bf16.gmra.mrb[48].mxu0 %v14968_v24  ;;  %7122 = vmatmul.mubr.bf16.gmra.mrb[40].mxu1 %v14968_v24 }
 0xfeb   : > { %7135 = vmatpush1.bf16.msra.mxu0 %v13412_v21  ;;  %7186 = vmatpush1.bf16.msra.mxu1 %v13415_v23  ;;  %v13490_v21 = vld [vmem:[%s14365_s8 + $0x490] ss:$80 sps:$4 sm:$0xff]   ;;  %v13493_v23 = vld [vmem:[%s14365_s8 + $0x498] ss:$80 sps:$4 sm:$0xff]  }
 0xfec   : > { %7136 = vmatprep.subr.bf16.mxu0 %v13420_v25  ;;  %7187 = vmatprep.subr.bf16.mxu1 %v13423_v26  ;;  %v13498_v25 = vld [vmem:[%s14365_s8 + $0x44] ss:$80 sps:$4 sm:$0xff]   ;;  %v13501_v26 = vld [vmem:[%s14365_s8 + $0x4c] ss:$80 sps:$4 sm:$0xff]  }
 0xfed   : > { %7162 = vmatprep.mubr.bf16.mxu0 %v14052_v43  ;;  %7213 = vmatprep.mubr.bf16.mxu1 %v14052_v43 }
 0xfef   : > { %7137 = vmatpush1.bf16.msra.mxu0 %v13418_v5  ;;  %7188 = vmatpush1.bf16.msra.mxu1 %v13421_v55  ;;  %v13496_v5 = vld [vmem:[%s14365_s8 + $0x40] ss:$80 sps:$4 sm:$0xff]   ;;  %v13499_v55 = vld [vmem:[%s14365_s8 + $0x48] ss:$80 sps:$4 sm:$0xff]  }
 0xff0   : > { %7138 = vmatprep.subr.bf16.mxu0 %v13426_v28  ;;  %7189 = vmatprep.subr.bf16.mxu1 %v13429_v29  ;;  %v13504_v28 = vld [vmem:[%s14365_s8 + $0xe4] ss:$80 sps:$4 sm:$0xff]   ;;  %v13507_v29 = vld [vmem:[%s14365_s8 + $0xec] ss:$80 sps:$4 sm:$0xff]  }
 0xff3   : > { %7139 = vmatpush1.bf16.msra.mxu0 %v13424_v32  ;;  %7190 = vmatpush1.bf16.msra.mxu1 %v13427_v33  ;;  %v13502_v32 = vld [vmem:[%s14365_s8 + $0xe0] ss:$80 sps:$4 sm:$0xff]   ;;  %v13505_v33 = vld [vmem:[%s14365_s8 + $0xe8] ss:$80 sps:$4 sm:$0xff]  }
 0xff4   : > { %7140 = vmatprep.subr.bf16.mxu0 %v13432_v34  ;;  %7191 = vmatprep.subr.bf16.mxu1 %v13435_v12  ;;  %v13510_v34 = vld [vmem:[%s14365_s8 + $0x184] ss:$80 sps:$4 sm:$0xff]   ;;  %v13513_v12 = vld [vmem:[%s14365_s8 + $0x18c] ss:$80 sps:$4 sm:$0xff]  }
 0xff7   : > { %7141 = vmatpush1.bf16.msra.mxu0 %v13430_v11  ;;  %7192 = vmatpush1.bf16.msra.mxu1 %v13433_v35  ;;  %v13508_v11 = vld [vmem:[%s14365_s8 + $0x180] ss:$80 sps:$4 sm:$0xff]   ;;  %v13511_v35 = vld [vmem:[%s14365_s8 + $0x188] ss:$80 sps:$4 sm:$0xff]  }
 0xff8   : > { %7142 = vmatprep.subr.bf16.mxu0 %v13438_v36  ;;  %7193 = vmatprep.subr.bf16.mxu1 %v13441_v13  ;;  %v13516_v36 = vld [vmem:[%s14365_s8 + $0x224] ss:$80 sps:$4 sm:$0xff]   ;;  %v13519_v13 = vld [vmem:[%s14365_s8 + $0x22c] ss:$80 sps:$4 sm:$0xff]  }
 0xffb   : > { %7143 = vmatpush1.bf16.msra.mxu0 %v13436_v37  ;;  %7194 = vmatpush1.bf16.msra.mxu1 %v13439_v38  ;;  %v13514_v37 = vld [vmem:[%s14365_s8 + $0x220] ss:$80 sps:$4 sm:$0xff]   ;;  %v13517_v38 = vld [vmem:[%s14365_s8 + $0x228] ss:$80 sps:$4 sm:$0xff]  }
 0xffc   : > { %7144 = vmatprep.subr.bf16.mxu0 %v13444_v42  ;;  %7195 = vmatprep.subr.bf16.mxu1 %v13447_v39  ;;  %v13522_v42 = vld [vmem:[%s14365_s8 + $0x2c4] ss:$80 sps:$4 sm:$0xff]   ;;  %v13525_v39 = vld [vmem:[%s14365_s8 + $0x2cc] ss:$80 sps:$4 sm:$0xff]  }
 0xfff   : > { %7145 = vmatpush1.bf16.msra.mxu0 %v13442_v45  ;;  %7196 = vmatpush1.bf16.msra.mxu1 %v13445_v44  ;;  %v13520_v45 = vld [vmem:[%s14365_s8 + $0x2c0] ss:$80 sps:$4 sm:$0xff]   ;;  %v13523_v44 = vld [vmem:[%s14365_s8 + $0x2c8] ss:$80 sps:$4 sm:$0xff]  }
0x1000   : > { %7232 = vmatprep.subr.bf16.mxu0 %v13450_v46  ;;  %7283 = vmatprep.subr.bf16.mxu1 %v13453_v47  ;;  %v13528_v46 = vld [vmem:[%s14365_s8 + $0x364] ss:$80 sps:$4 sm:$0xff]   ;;  %v13531_v47 = vld [vmem:[%s14365_s8 + $0x36c] ss:$80 sps:$4 sm:$0xff]  }
0x1002   : > { %7163 = vmatmul.mubr.bf16.vlgmr.msra.gmra.mrb[52].mxu0 %v14952_v4  ;;  %7214 = vmatmul.mubr.bf16.vlgmr.msra.gmra.mrb[44].mxu1 %v14952_v4 }
0x1003   : > { %7233 = vmatpush1.bf16.msra.mxu0 %v13448_v48  ;;  %7284 = vmatpush1.bf16.msra.mxu1 %v13451_v50  ;;  %v13526_v48 = vld [vmem:[%s14365_s8 + $0x360] ss:$80 sps:$4 sm:$0xff]   ;;  %v13529_v50 = vld [vmem:[%s14365_s8 + $0x368] ss:$80 sps:$4 sm:$0xff]  }
0x1004   : > { %7234 = vmatprep.subr.bf16.mxu0 %v13456_v6  ;;  %7285 = vmatprep.subr.bf16.mxu1 %v13459_v8  ;;  %v13534_v6 = vld [vmem:[%s14365_s8 + $0x404] ss:$80 sps:$4 sm:$0xff]   ;;  %v13537_v8 = vld [vmem:[%s14365_s8 + $0x40c] ss:$80 sps:$4 sm:$0xff]  }
0x1005   : > { %7172 = vmatprep.mubr.bf16.mxu0 %v14052_v43  ;;  %7223 = vmatprep.mubr.bf16.mxu1 %v14052_v43 }
0x1007   : > { %7235 = vmatpush1.bf16.msra.mxu0 %v13454_v9  ;;  %7286 = vmatpush1.bf16.msra.mxu1 %v13457_v51  ;;  %v13532_v9 = vld [vmem:[%s14365_s8 + $0x400] ss:$80 sps:$4 sm:$0xff]   ;;  %v13535_v51 = vld [vmem:[%s14365_s8 + $0x408] ss:$80 sps:$4 sm:$0xff]  }
0x1008   : > { %7236 = vmatprep.subr.bf16.mxu0 %v13462_v54  ;;  %7287 = vmatprep.subr.bf16.mxu1 %v13465_v60  ;;  %v13540_v54 = vld [vmem:[%s14365_s8 + $0x4a4] ss:$80 sps:$4 sm:$0xff]   ;;  %v13543_v60 = vld [vmem:[%s14365_s8 + $0x4ac] ss:$80 sps:$4 sm:$0xff]  }
0x100a   : > { %7173 = vmatmul.mubr.bf16.gmra.mrb[56].mxu0 %v14968_v24  ;;  %7224 = vmatmul.mubr.bf16.gmra.mrb[48].mxu1 %v14968_v24 }
0x100b   : > { %7237 = vmatpush1.bf16.msra.mxu0 %v13460_v62  ;;  %7288 = vmatpush1.bf16.msra.mxu1 %v13463_v40  ;;  %v13538_v62 = vld [vmem:[%s14365_s8 + $0x4a0] ss:$80 sps:$4 sm:$0xff]   ;;  %v13541_v40 = vld [vmem:[%s14365_s8 + $0x4a8] ss:$80 sps:$4 sm:$0xff]  }
0x100c   : > { %7238 = vmatprep.subr.bf16.mxu0 %v13468_v63  ;;  %7289 = vmatprep.subr.bf16.mxu1 %v13471_v0  ;;  %v2336_v63 = vld [vmem:[%s14373_s12 + $0x8] sm:$0xff]  ;;  %v15082_v0 = vld [vmem:[%s14373_s12 + $0x10] sm:$0xff] }
0x100d   : > { %7264 = vmatprep.mubr.bf16.mxu0 %v14052_v43  ;;  %7315 = vmatprep.mubr.bf16.mxu1 %v14052_v43 }
0x100f   : > { %7239 = vmatpush1.bf16.msra.mxu0 %v13466_v2  ;;  %7290 = vmatpush1.bf16.msra.mxu1 %v13469_v19  ;;  %v5182_v2 = vrot.slane %v2336_v63, 1  ;;  %v5183_v19 = vrot.slane %v15082_v0, 1 }
0x1010   : > { %7240 = vmatprep.subr.bf16.mxu0 %v13474_v31  ;;  %7291 = vmatprep.subr.bf16.mxu1 %v13477_v27  ;;  %v5206_v27 = vsub.s32 4, %v14418_v59 }
0x1011   : > { %v5186_v31 = vsel %vm5185_vm9, %v5182_v2, %v5183_v19 }
0x1013   : > { %7241 = vmatpush1.bf16.msra.mxu0 %v13472_v7  ;;  %7292 = vmatpush1.bf16.msra.mxu1 %v13475_v49  ;;  %v5214_v7 = vsub.s32 6, %v14418_v59  ;;  %v5191_v49 = vrot.slane %v5186_v31, %v14459_v56 }
0x1014   : > { %7242 = vmatprep.subr.bf16.mxu0 %v13480_v52  ;;  %7293 = vmatprep.subr.bf16.mxu1 %v13483_v53  ;;  %v5195_v52 = vrot.slane %v5186_v31, %v14462_v57  ;;  %v5199_v53 = vrot.slane %v5186_v31, %v14465_v58 }
0x1017   : > { %7243 = vmatpush1.bf16.msra.mxu0 %v13478_v41  ;;  %7294 = vmatpush1.bf16.msra.mxu1 %v13481_v30  ;;  %v5207_v30 = vrot.slane %v5186_v31, %v5206_v27 }
0x1018   : > { %7244 = vmatprep.subr.bf16.mxu0 %v13486_v15  ;;  %7295 = vmatprep.subr.bf16.mxu1 %v13489_v22  ;;  %v5215_v22 = vrot.slane %v5186_v31, %v5214_v7 }
0x101b   : > { %7245 = vmatpush1.bf16.msra.mxu0 %v13484_v16  ;;  %7296 = vmatpush1.bf16.msra.mxu1 %v13487_v20  ;;  %v5350_v20 = vcombine.low %v5191_v49, %v5195_v52 }
0x101c   : > { %7246 = vmatprep.subr.bf16.mxu0 %v13492_v17  ;;  %7297 = vmatprep.subr.bf16.mxu1 %v13495_v3  ;;  %v5351_v17 = vcombine.high %v5191_v49, %v5195_v52 }
0x101f   : > { %7247 = vmatpush1.bf16.msra.mxu0 %v13490_v21  ;;  %7298 = vmatpush1.bf16.msra.mxu1 %v13493_v23 }
0x1020   : > { %7334 = vmatprep.subr.bf16.mxu0 %v13498_v25  ;;  %7385 = vmatprep.subr.bf16.mxu1 %v13501_v26 }
0x1022   : > { %7265 = vmatmul.mubr.bf16.vlgmr.msra.gmra.mrb[60].mxu0 %v14952_v4  ;;  %7316 = vmatmul.mubr.bf16.vlgmr.msra.gmra.mrb[52].mxu1 %v14952_v4 }
0x1023   : > { %7335 = vmatpush1.bf16.msra.mxu0 %v13496_v5  ;;  %7386 = vmatpush1.bf16.msra.mxu1 %v13499_v55  ;;  %v5364_v55 = vrot.slane %v5350_v20, %v14425_v1 }
0x1024   : > { %7336 = vmatprep.subr.bf16.mxu0 %v13504_v28  ;;  %7387 = vmatprep.subr.bf16.mxu1 %v13507_v29  ;;  %v5371_v28 = vrot.slane %v5351_v17, %v14425_v1 }
0x1025   : > { %7274 = vmatprep.mubr.bf16.mxu0 %v14052_v43  ;;  %7325 = vmatprep.mubr.bf16.mxu1 %v14052_v43 }
0x1027   : > { %7337 = vmatpush1.bf16.msra.mxu0 %v13502_v32  ;;  %7388 = vmatpush1.bf16.msra.mxu1 %v13505_v33 }
0x1028   : > { %7338 = vmatprep.subr.bf16.mxu0 %v13510_v34  ;;  %7389 = vmatprep.subr.bf16.mxu1 %v13513_v12 }
0x102a   : > { %7275 = vmatmul.mubr.bf16.gmra.mrb[64].mxu0 %v14968_v24  ;;  %7326 = vmatmul.mubr.bf16.gmra.mrb[56].mxu1 %v14968_v24 }
0x102b   : > { %7339 = vmatpush1.bf16.msra.mxu0 %v13508_v11  ;;  %7390 = vmatpush1.bf16.msra.mxu1 %v13511_v35 }
0x102c   : > { %7340 = vmatprep.subr.bf16.mxu0 %v13516_v36  ;;  %7391 = vmatprep.subr.bf16.mxu1 %v13519_v13 }
0x102d   : > { %7366 = vmatprep.mubr.bf16.mxu0 %v14052_v43  ;;  %7417 = vmatprep.mubr.bf16.mxu1 %v14052_v43 }
0x102f   : > { %7341 = vmatpush1.bf16.msra.mxu0 %v13514_v37  ;;  %7392 = vmatpush1.bf16.msra.mxu1 %v13517_v38 }
0x1030   : > { %7342 = vmatprep.subr.bf16.mxu0 %v13522_v42  ;;  %7393 = vmatprep.subr.bf16.mxu1 %v13525_v39 }
0x1033   : > { %7343 = vmatpush1.bf16.msra.mxu0 %v13520_v45  ;;  %7394 = vmatpush1.bf16.msra.mxu1 %v13523_v44 }
0x1034   : > { %7344 = vmatprep.subr.bf16.mxu0 %v13528_v46  ;;  %7395 = vmatprep.subr.bf16.mxu1 %v13531_v47 }
0x1037   : > { %7345 = vmatpush1.bf16.msra.mxu0 %v13526_v48  ;;  %7396 = vmatpush1.bf16.msra.mxu1 %v13529_v50 }
0x1038   : > { %7346 = vmatprep.subr.bf16.mxu0 %v13534_v6  ;;  %7397 = vmatprep.subr.bf16.mxu1 %v13537_v8 }
0x103b   : > { %7347 = vmatpush1.bf16.msra.mxu0 %v13532_v9  ;;  %7398 = vmatpush1.bf16.msra.mxu1 %v13535_v51 }
0x103c   : > { %7348 = vmatprep.subr.bf16.mxu0 %v13540_v54  ;;  %7399 = vmatprep.subr.bf16.mxu1 %v13543_v60 }
0x103f   : > { %7349 = vmatpush1.bf16.msra.mxu0 %v13538_v62  ;;  %7400 = vmatpush1.bf16.msra.mxu1 %v13541_v40 }
0x1042   : > { %7367 = vmatmul.mubr.bf16.vlgmr.msra.gmra.mrb[68].mxu0 %v14952_v4  ;;  %7418 = vmatmul.mubr.bf16.vlgmr.msra.gmra.mrb[60].mxu1 %v14952_v4  ;;  %v5202_v4 = vsub.s32 3, %v14418_v59 }
0x1043   : > { %7376 = vmatprep.mubr.bf16.mxu0 %v14052_v43  ;;  %7427 = vmatprep.mubr.bf16.mxu1 %v14052_v43  ;;  %v5210_v43 = vsub.s32 5, %v14418_v59 }
0x1044   : > { %v5203_v41 = vrot.slane %v5186_v31, %v5202_v4 }
0x1045   : > { %v5211_v15 = vrot.slane %v5186_v31, %v5210_v43 }
0x1046   : > { %v5352_v3 = vcombine.low %v5199_v53, %v5203_v41  ;;  %v5353_v21 = vcombine.high %v5199_v53, %v5203_v41 }
0x1047   : > { %v5354_v23 = vcombine.low %v5207_v30, %v5211_v15  ;;  %v5355_v25 = vcombine.high %v5207_v30, %v5211_v15 }
0x1048   : > { %v5378_v29 = vrot.slane %v5352_v3, %v14425_v1  ;;  %v5385_v32 = vrot.slane %v5353_v21, %v14425_v1 }
0x1049   : > { %v5392_v33 = vrot.slane %v5354_v23, %v14425_v1  ;;  %v5399_v34 = vrot.slane %v5355_v25, %v14425_v1  ;;  %v13544_v23 = vld [vmem:[%s14371_s13 + $0x40] sm:$0xff]  }
0x104a   : > { %7377 = vmatmul.mubr.bf16.gmra.mrb[72].mxu0 %v14968_v24  ;;  %7428 = vmatmul.mubr.bf16.gmra.mrb[64].mxu1 %v14968_v24  ;;  %v5218_v24 = vsub.s32 7, %v14418_v59  ;;  %v5414_v35 = vcombine.low %v5364_v55, %v5378_v29  ;;  %v5416_v36 = vcombine.low %v5371_v28, %v5385_v32  ;;  %v5415_v13 = vcombine.high %v5364_v55, %v5378_v29  ;;  %v13545_v25 = vld [vmem:[%s14371_s13 + $0xc0] sm:$0xff]   ;;  %v13569_v59 = vld [vmem:[%s14371_s13 + $0xf0] sm:$0xff]  }
0x104b   : > { %v5417_v39 = vcombine.high %v5371_v28, %v5385_v32  ;;  %v13546_v29 = vld [vmem:[%s14371_s13] sm:$0xff]   ;;  %12679 = vmatprep.subr.bf16.mxu0 %v13544_v23  ;;  %12707 = vmatprep.subr.bf16.mxu1 %v13545_v25  ;;  %v13557_v23 = vld [vmem:[%s14371_s13 + $0xd8] sm:$0xff]  }
0x104c   : > { %v5219_v16 = vrot.slane %v5186_v31, %v5218_v24  ;;  %v15115_v45 = vrot.slane %v5414_v35, %v14425_v1  ;;  %v15118_v44 = vrot.slane %v5416_v36, %v14425_v1  ;;  %v15121_v46 = vrot.slane %v5415_v13, %v14425_v1  ;;  %v13547_v32 = vld [vmem:[%s14371_s13 + $0x80] sm:$0xff]   ;;  %12680 = vmatpush3.bf16.msra.mxu0 %v13546_v29  ;;  %v13548_v36 = vld [vmem:[%s14371_s13 + $0x48] sm:$0xff]  }
0x104d   : > { %v15133_v6 = vrot.slane %v5417_v39, %v14425_v1  ;;  %12708 = vmatpush3.bf16.msra.mxu1 %v13547_v32  ;;  %v13549_v13 = vld [vmem:[%s14371_s13 + $0xc8] sm:$0xff]   ;;  %12681 = vmatprep.subr.bf16.mxu0 %v13548_v36 }
0x104e   : > { %v5356_v26 = vcombine.low %v5215_v22, %v5219_v16  ;;  %v5357_v5 = vcombine.high %v5215_v22, %v5219_v16  ;;  %v12225_v60 = vcombine.low %v15115_v45, %v15121_v46  ;;  %v12227_v62 = vcombine.high %v15115_v45, %v15121_v46  ;;  %12709 = vmatprep.subr.bf16.mxu1 %v13549_v13 }
0x104f   : > { %v12229_v40 = vcombine.low %v15118_v44, %v15133_v6  ;;  %v12231_v63 = vcombine.high %v15118_v44, %v15133_v6  ;;  %v12241_v31 = vcombine.low %v15115_v45, %v15115_v45 }
0x1050   : > { %v5406_v12 = vrot.slane %v5356_v26, %v14425_v1  ;;  %v5413_v11 = vrot.slane %v5357_v5, %v14425_v1  ;;  %v6350_v41 = vrot.slane %v12225_v60, %v14425_v1  ;;  %v6364_v30 = vrot.slane %v12227_v62, %v14425_v1 }
0x1051   : > { %v6378_v15 = vrot.slane %v12229_v40, %v14425_v1  ;;  %v6392_v22 = vrot.slane %v12231_v63, %v14425_v1  ;;  %v6622_v20 = vrot.slane %v12241_v31, %v14425_v1 }
0x1052   : > { %v5418_v37 = vcombine.low %v5392_v33, %v5406_v12  ;;  %v5419_v38 = vcombine.high %v5392_v33, %v5406_v12  ;;  %v5420_v42 = vcombine.low %v5399_v34, %v5413_v11  ;;  %v5421_v8 = vcombine.high %v5399_v34, %v5413_v11 }
0x1053   : > { %v6400_v26 = vcombine.low %v6350_v41, %v6364_v30  ;;  %v6404_v5 = vcombine.low %v6378_v15, %v6392_v22  ;;  %v6401_v55 = vcombine.high %v6350_v41, %v6364_v30  ;;  %v6405_v28 = vcombine.high %v6378_v15, %v6392_v22  ;;  %v13554_v22 = vld [vmem:[%s14371_s13 + $0x10] sm:$0xff]  }
0x1054   : > { %v15124_v47 = vrot.slane %v5418_v37, %v14425_v1  ;;  %v15127_v48 = vrot.slane %v5420_v42, %v14425_v1  ;;  %v15130_v50 = vrot.slane %v5419_v38, %v14425_v1  ;;  %v15150_v2 = vrot.slane %v5421_v8, %v14425_v1  ;;  %v2338_v37 = vld [vmem:[%s14373_s12 + $0x18] sm:$0x1] }
0x1055   : > { %v15176_v38 = vrot.slane %v6400_v26, %v14425_v1  ;;  %v15179_v42 = vrot.slane %v6404_v5, %v14425_v1  ;;  %v15182_v39 = vrot.slane %v6401_v55, %v14425_v1  ;;  %v15185_v8 = vrot.slane %v6405_v28, %v14425_v1  ;;  %v13558_v55 = vld [vmem:[%s14371_s13 + $0x18] sm:$0xff]  }
0x1056   : > { %v5479_v9 = vcombine.high %v15115_v45, %v15124_v47  ;;  %v5481_v51 = vcombine.high %v15118_v44, %v15127_v48  ;;  %v5483_v54 = vcombine.high %v15121_v46, %v15130_v50  ;;  %v5485_v16 = vcombine.high %v15133_v6, %v15150_v2  ;;  %v13559_v28 = vld [vmem:[%s14371_s13 + $0x98] sm:$0xff]  }
0x1057   : > { %v5184_v40 = vrot.slane %v2338_v37, 1  ;;  %v6465_v41 = vcombine.high %v15176_v38, %v15179_v42  ;;  %v6468_v30 = vcombine.low %v15182_v39, %v15185_v8  ;;  %v6469_v15 = vcombine.high %v15182_v39, %v15185_v8  ;;  %v13560_v37 = vld [vmem:[%s14371_s13 + $0x60] sm:$0xff]  }
0x1058   : > { %v12243_v49 = vcombine.low %v15121_v46, %v5479_v9  ;;  %v12245_v52 = vcombine.low %v5483_v54, %v15118_v44  ;;  %v12247_v53 = vcombine.low %v15133_v6, %v5481_v51  ;;  %v12257_v33 = vcombine.low %v5485_v16, %v15115_v45  ;;  %v13550_v9 = vld [vmem:[%s14371_s13 + $0x8] sm:$0xff]   ;;  %v13555_v16 = vld [vmem:[%s14371_s13 + $0x90] sm:$0xff]  }
0x1059   : > { %v13551_v51 = vld [vmem:[%s14371_s13 + $0x88] sm:$0xff]   ;;  %12682 = vmatpush3.bf16.msra.mxu0 %v13550_v9  ;;  %v5187_v5 = vsel %vm5185_vm9, %v5183_v19, %v5184_v40  ;;  %v12232_v19 = vcombine.high %v15127_v48, %v15150_v2  ;;  %v13561_v9 = vld [vmem:[%s14371_s13 + $0xe0] sm:$0xff]  }
0x105a   : > { %v6636_v17 = vrot.slane %v12243_v49, %v14425_v1  ;;  %v6650_v3 = vrot.slane %v12245_v52, %v14425_v1  ;;  %v6664_v21 = vrot.slane %v12247_v53, %v14425_v1  ;;  %v6888_v54 = vrot.slane %v12257_v33, %v14425_v1  ;;  %12710 = vmatpush3.bf16.msra.mxu1 %v13551_v51  ;;  %v13552_v49 = vld [vmem:[%s14371_s13 + $0x50] sm:$0xff]   ;;  %v13563_v40 = vld [vmem:[%s14371_s13 + $0xa0] sm:$0xff]  }
0x105b   : > { %v13553_v52 = vld [vmem:[%s14371_s13 + $0xd0] sm:$0xff]   ;;  %v6464_v53 = vcombine.low %v15176_v38, %v15179_v42  ;;  %12683 = vmatprep.subr.bf16.mxu0 %v13552_v49  ;;  %v12230_v33 = vcombine.low %v15127_v48, %v15150_v2  ;;  %v5223_v13 = vrot.slane %v5187_v5, %v14459_v56  ;;  %v5231_v51 = vrot.slane %v5187_v5, %v14465_v58  ;;  %v13565_v58 = vld [vmem:[%s14371_s13 + $0xe8] sm:$0xff]  }
0x105c   : > { %v6672_v34 = vcombine.low %v6622_v20, %v6636_v17  ;;  %v6676_v12 = vcombine.low %v6650_v3, %v6664_v21  ;;  %v6673_v11 = vcombine.high %v6622_v20, %v6636_v17  ;;  %v6677_v35 = vcombine.high %v6650_v3, %v6664_v21  ;;  %v13556_v20 = vld [vmem:[%s14371_s13 + $0x58] sm:$0xff]   ;;  %12711 = vmatprep.subr.bf16.mxu1 %v13553_v52 }
0x105d   : > { %v15216_v17 = vrot.slane %v6888_v54, %v14425_v1  ;;  %v12226_v3 = vcombine.low %v15124_v47, %v15130_v50  ;;  %v12228_v21 = vcombine.high %v15124_v47, %v15130_v50  ;;  %12684 = vmatpush3.bf16.msra.mxu0 %v13554_v22  ;;  %v6896_v32 = vcombine.high %v6888_v54, %v6888_v54  ;;  %v13562_v54 = vld [vmem:[%s14371_s13 + $0x20] sm:$0xff]  }
0x105e   : > { %v15191_v60 = vrot.slane %v6672_v34, %v14425_v1  ;;  %v15194_v62 = vrot.slane %v6676_v12, %v14425_v1  ;;  %v15197_v63 = vrot.slane %v6673_v11, %v14425_v1  ;;  %v15200_v31 = vrot.slane %v6677_v35, %v14425_v1  ;;  %12712 = vmatpush3.bf16.msra.mxu1 %v13555_v16 }
0x105f   : > { %12685 = vmatprep.subr.bf16.mxu0 %v13556_v20  ;;  %12713 = vmatprep.subr.bf16.mxu1 %v13557_v23  ;;  %v5480_v34 = vcombine.low %v15118_v44, %v15127_v48  ;;  %v5482_v12 = vcombine.low %v15121_v46, %v15130_v50  ;;  %v6926_v11 = vcombine.high %v15216_v17, %v15216_v17 }
0x1060   : > { %v6736_v25 = vcombine.low %v15191_v60, %v15194_v62  ;;  %v6737_v26 = vcombine.high %v15191_v60, %v15194_v62  ;;  %v6740_v29 = vcombine.low %v15197_v63, %v15200_v31  ;;  %v6741_v0 = vcombine.high %v15197_v63, %v15200_v31 }
0x1061   : > { %v15247_v35 = vrot.slane %v12226_v3, %v14425_v1  ;;  %v15250_v36 = vrot.slane %v12228_v21, %v14425_v1  ;;  %v5227_v44 = vrot.slane %v5187_v5, %v14462_v57  ;;  %v5235_v46 = vrot.slane %v5187_v5, %v5202_v4  ;;  %12686 = vmatpush3.bf16.msra.mxu0 %v13558_v55  ;;  %v13564_v57 = vld [vmem:[%s14371_s13 + $0x68] sm:$0xff]  }
0x1062   : > { %12714 = vmatpush3.bf16.msra.mxu1 %v13559_v28  ;;  %v15262_v49 = vrot.slane %v6896_v32, %v14425_v1  ;;  %v15265_v52 = vrot.slane %v12230_v33, %v14425_v1  ;;  %v5484_v22 = vcombine.low %v15133_v6, %v15150_v2  ;;  %12687 = vmatprep.subr.bf16.mxu0 %v13560_v37 }
0x1063   : > { %12715 = vmatprep.subr.bf16.mxu1 %v13561_v9  ;;  %v15272_v4 = vrot.slane %v12232_v19, %v14425_v1  ;;  %v12242_v16 = vcombine.low %v15124_v47, %v15124_v47  ;;  %v12244_v20 = vcombine.high %v5482_v12, %v15124_v47  ;;  %v12246_v3 = vcombine.high %v15130_v50, %v5480_v34  ;;  %v13566_v50 = vld [vmem:[%s14371_s13 + $0x28] sm:$0xff]  }
0x1064   : > { %v5239_v21 = vrot.slane %v5187_v5, %v5206_v27  ;;  %v5243_v6 = vrot.slane %v5187_v5, %v5210_v43  ;;  %v5247_v23 = vrot.slane %v5187_v5, %v5214_v7  ;;  %v5251_v55 = vrot.slane %v5187_v5, %v5218_v24  ;;  %v13567_v27 = vld [vmem:[%s14371_s13 + $0xa8] sm:$0xff]   ;;  %v13568_v7 = vld [vmem:[%s14371_s13 + $0x70] sm:$0xff]  }
0x1065   : > { %v6402_v28 = vcombine.low %v15247_v35, %v15250_v36  ;;  %v5486_v32 = vcombine.low %v5223_v13, %v5227_v44  ;;  %v5488_v33 = vcombine.low %v5231_v51, %v5235_v46  ;;  %12688 = vmatpush3.bf16.msra.mxu0 %v13562_v54  ;;  %v12248_v19 = vcombine.high %v5484_v22, %v15127_v48  ;;  %v13571_v22 = vld [vmem:[%s14371_s13 + $0xb0] sm:$0xff]  }
0x1066   : > { %12716 = vmatpush3.bf16.msra.mxu1 %v13563_v40  ;;  %v5487_v34 = vcombine.high %v5223_v13, %v5227_v44  ;;  %v5489_v43 = vcombine.high %v5231_v51, %v5235_v46  ;;  %12689 = vmatprep.subr.bf16.mxu0 %v13564_v57  ;;  %v6406_v24 = vcombine.low %v15265_v52, %v15272_v4  ;;  %v13570_v40 = vld [vmem:[%s14371_s13 + $0x30] sm:$0xff]  }
0x1067   : > { %12717 = vmatprep.subr.bf16.mxu1 %v13565_v58  ;;  %v6629_v5 = vrot.slane %v12242_v16, %v14425_v1  ;;  %v6643_v12 = vrot.slane %v12244_v20, %v14425_v1  ;;  %v6657_v37 = vrot.slane %v12246_v3, %v14425_v1  ;;  %v5478_v48 = vcombine.low %v15115_v45, %v15124_v47  ;;  %v13572_v47 = vld [vmem:[%s14371_s13 + $0x78] sm:$0xff]  }
0x1068   : > { %v5490_v13 = vcombine.low %v5239_v21, %v5243_v6  ;;  %v5491_v9 = vcombine.high %v5239_v21, %v5243_v6  ;;  %v5492_v44 = vcombine.low %v5247_v23, %v5251_v55  ;;  %v5500_v51 = vrot.slane %v5486_v32, %v14425_v1  ;;  %v13573_v16 = vld [vmem:[%s14371_s13 + $0xf8] sm:$0xff]  }
0x1069   : > { %v5514_v46 = vrot.slane %v5488_v33, %v14425_v1  ;;  %v5493_v54 = vcombine.high %v5247_v23, %v5251_v55  ;;  %12690 = vmatpush3.bf16.msra.mxu0 %v13566_v50  ;;  %v6671_v57 = vrot.slane %v12248_v19, %v14425_v1  ;;  %v5507_v58 = vrot.slane %v5487_v34, %v14425_v1 }
0x106a   : > { %12718 = vmatpush3.bf16.msra.mxu1 %v13567_v27  ;;  %v5521_v45 = vrot.slane %v5489_v43, %v14425_v1  ;;  %12691 = vmatprep.subr.bf16.mxu0 %v13568_v7  ;;  %v15310_v20 = vrot.slane %v6402_v28, %v14425_v1  ;;  %v6403_v3 = vcombine.high %v15247_v35, %v15250_v36  ;;  %v13574_v35 = vld [vmem:[%s14371_s13 + $0x38] sm:$0xff]  }
0x106b   : > { %12719 = vmatprep.subr.bf16.mxu1 %v13569_v59  ;;  %v6407_v21 = vcombine.high %v15265_v52, %v15272_v4  ;;  %v6674_v6 = vcombine.low %v6629_v5, %v6643_v12  ;;  %v12258_v23 = vcombine.high %v15150_v2, %v5478_v48  ;;  %v5528_v55 = vrot.slane %v5490_v13, %v14425_v1  ;;  %v13575_v36 = vld [vmem:[%s14371_s13 + $0xb8] sm:$0xff]  }
0x106c   : > { %v15319_v32 = vrot.slane %v5491_v9, %v14425_v1  ;;  %v5542_v33 = vrot.slane %v5492_v44, %v14425_v1  ;;  %v5550_v50 = vcombine.low %v5500_v51, %v5514_v46  ;;  %v5551_v27 = vcombine.high %v5500_v51, %v5514_v46 }
0x106d   : > { %v15323_v28 = vrot.slane %v5493_v54, %v14425_v1  ;;  %12692 = vmatpush3.bf16.msra.mxu0 %v13570_v40  ;;  %v6678_v52 = vcombine.low %v6657_v37, %v6671_v57  ;;  %v5552_v4 = vcombine.low %v5507_v58, %v5521_v45  ;;  %v5553_v19 = vcombine.high %v5507_v58, %v5521_v45 }
0x106e   : > { %12720 = vmatpush3.bf16.msra.mxu1 %v13571_v22  ;;  %12693 = vmatprep.subr.bf16.mxu0 %v13572_v47  ;;  %v15328_v2 = vrot.slane %v6406_v24, %v14425_v1  ;;  %v15331_v34 = vrot.slane %v6403_v3, %v14425_v1  ;;  %v6675_v43 = vcombine.high %v6629_v5, %v6643_v12 }
0x106f   : > { %12721 = vmatprep.subr.bf16.mxu1 %v13573_v16  ;;  %v6679_v7 = vcombine.high %v6657_v37, %v6671_v57  ;;  %v15334_v59 = vrot.slane %v6407_v21, %v14425_v1  ;;  %v6895_v48 = vrot.slane %v12258_v23, %v14425_v1  ;;  %v5554_v13 = vcombine.low %v5528_v55, %v5542_v33 }
0x1070   : > { %v5555_v9 = vcombine.high %v5528_v55, %v5542_v33  ;;  %v15338_v44 = vrot.slane %v5550_v50, %v14425_v1  ;;  %v15341_v51 = vrot.slane %v5551_v27, %v14425_v1  ;;  %v5556_v24 = vcombine.low %v15319_v32, %v15323_v28  ;;  %v13576_v55 = vld [vmem:[%s14371_s13 + $0x140] sm:$0xff]  }
0x1071   : > { %12694 = vmatpush3.bf16.msra.mxu0 %v13574_v35  ;;  %v15346_v5 = vrot.slane %v6674_v6, %v14425_v1  ;;  %v15349_v12 = vrot.slane %v6678_v52, %v14425_v1  ;;  %v15352_v37 = vrot.slane %v5552_v4, %v14425_v1  ;;  %v15355_v46 = vrot.slane %v5553_v19, %v14425_v1  ;;  %v13577_v33 = vld [vmem:[%s14371_s13 + $0x1c0] sm:$0xff]  }
0x1072   : > { %16907 = vst [vmem:[#allocation31_spill] sm:$0xff] %v15338_v44  ;;  %12722 = vmatpush3.bf16.msra.mxu1 %v13575_v36  ;;  %v6928_v54 = vcombine.high %v15262_v49, %v15262_v49  ;;  %v15362_v22 = vrot.slane %v6675_v43, %v14425_v1  ;;  %v15365_v57 = vrot.slane %v6679_v7, %v14425_v1 }
0x1073   : > { %v15372_v47 = vrot.slane %v5554_v13, %v14425_v1  ;;  %v15375_v16 = vrot.slane %v5555_v9, %v14425_v1  ;;  %v6897_v3 = vcombine.high %v6895_v48, %v6895_v48  ;;  %v12233_v21 = vcombine.low %v15338_v44, %v15341_v51  ;;  %12735 = vmatprep.subr.bf16.mxu0 %v13576_v55 }
0x1074   : > { %v12235_v6 = vcombine.high %v15338_v44, %v15341_v51  ;;  %v15382_v23 = vrot.slane %v5556_v24, %v14425_v1  ;;  %v12237_v35 = vcombine.low %v15352_v37, %v15355_v46  ;;  %v5557_v36 = vcombine.high %v15319_v32, %v15323_v28  ;;  %12763 = vmatprep.subr.bf16.mxu1 %v13577_v33 }
0x1075   : > { %16908 = vst [vmem:[#allocation32_spill] sm:$0xff] %v15372_v47  ;;  %v12239_v19 = vcombine.high %v15352_v37, %v15355_v46  ;;  %v15403_v7 = vrot.slane %v6895_v48, %v14425_v1  ;;  %v5615_v32 = vcombine.high %v15338_v44, %v15372_v47  ;;  %v5619_v28 = vcombine.high %v15341_v51, %v15375_v16 }
0x1076   : > { %v15410_v24 = vrot.slane %v6897_v3, %v14425_v1  ;;  %v15413_v55 = vrot.slane %v12233_v21, %v14425_v1  ;;  %v15416_v33 = vrot.slane %v12235_v6, %v14425_v1  ;;  %v5617_v48 = vcombine.high %v15352_v37, %v15382_v23 }
0x1077   : > { %v15427_v27 = vrot.slane %v12237_v35, %v14425_v1  ;;  %v15430_v21 = vrot.slane %v5557_v36, %v14425_v1  ;;  %v15439_v38 = vrot.slane %v12239_v19, %v14425_v1  ;;  %v12249_v42 = vcombine.low %v15338_v44, %v15338_v44 }
0x1078   : > { %v12251_v39 = vcombine.low %v15341_v51, %v5615_v32  ;;  %v12253_v8 = vcombine.low %v5619_v28, %v15352_v37  ;;  %v12255_v60 = vcombine.low %v15355_v46, %v5617_v48 }
0x1079   : > { %16909 = vst [vmem:[#allocation33_spill] sm:$0xff] %v15430_v21  ;;  %v5621_v62 = vcombine.high %v15355_v46, %v15430_v21 }
0x10b5   : > { %v7062_v13 = vpop.f32.mrb[44].mxu0  ;;  %v7113_v9 = vpop.f32.mrb[36].mxu1 }
0x10b6   : > { %v7063_v43 = vadd.f32 %v7062_v13, %v6464_v53  ;;  %v7114_v4 = vadd.f32 %v7113_v9, %v6465_v41  ;;  %v7064_v52 = vpop.f32.mrb[45].mxu0  ;;  %v7115_v3 = vpop.f32.mrb[37].mxu1 }
0x10b7   : > { %v7065_v6 = vadd.f32 %v7064_v52, %v6468_v30  ;;  %v7116_v53 = vadd.f32 %v7115_v3, %v6469_v15  ;;  %v7066_v13 = vpop.f32.mrb[46].mxu0  ;;  %v7117_v50 = vpop.f32.mrb[38].mxu1 }
0x10b8   : > { %v7067_v41 = vadd.f32 %v7066_v13, %v6736_v25  ;;  %v7118_v30 = vadd.f32 %v7117_v50, %v6737_v26  ;;  %v7068_v35 = vpop.f32.mrb[47].mxu0  ;;  %v7119_v36 = vpop.f32.mrb[39].mxu1 }
0x10b9   : > { %v7484_v15 = vcombine.low %v7063_v43, %v7065_v6  ;;  %v7485_v52 = vcombine.high %v7063_v43, %v7065_v6  ;;  %v7486_v19 = vcombine.low %v7114_v4, %v7116_v53  ;;  %v7487_v9 = vcombine.high %v7114_v4, %v7116_v53 }
0x10ba   : > { %v7069_v3 = vadd.f32 %v7068_v35, %v6740_v29  ;;  %v7120_v25 = vadd.f32 %v7119_v36, %v6741_v0 }
0x10bb   : > { %v15461_v26 = vrot.slane %v7484_v15, %v14425_v1  ;;  %v15464_v50 = vrot.slane %v7485_v52, %v14425_v1  ;;  %v15467_v4 = vrot.slane %v7486_v19, %v14425_v1  ;;  %v15470_v29 = vrot.slane %v7487_v9, %v14425_v1 }
0x10bc   : > { %v7756_v43 = vcombine.low %v7067_v41, %v7069_v3  ;;  %v7757_v63 = vcombine.high %v7067_v41, %v7069_v3  ;;  %v7758_v31 = vcombine.low %v7118_v30, %v7120_v25  ;;  %v7759_v0 = vcombine.high %v7118_v30, %v7120_v25 }
0x10bd   : > { %v7548_v32 = vcombine.low %v15461_v26, %v15467_v4  ;;  %v7549_v28 = vcombine.high %v15461_v26, %v15467_v4  ;;  %v7550_v48 = vcombine.low %v15464_v50, %v15470_v29  ;;  %v7551_v6 = vcombine.high %v15464_v50, %v15470_v29  ;;  %v7072_v53 = vpop.f32.mrb[48].mxu0  ;;  %v7123_v13 = vpop.f32.mrb[40].mxu1 }
0x10be   : > { %v15481_v35 = vrot.slane %v7756_v43, %v14425_v1  ;;  %v15484_v41 = vrot.slane %v7757_v63, %v14425_v1  ;;  %v15487_v30 = vrot.slane %v7758_v31, %v14425_v1  ;;  %v15490_v36 = vrot.slane %v7759_v0, %v14425_v1  ;;  %v7074_v15 = vpop.f32.mrb[49].mxu0  ;;  %v7125_v52 = vpop.f32.mrb[41].mxu1 }
0x10bf   : > { %v7076_v19 = vpop.f32.mrb[50].mxu0  ;;  %v7127_v9 = vpop.f32.mrb[42].mxu1  ;;  %v6536_v25 = vcombine.low %v15413_v55, %v15416_v33  ;;  %v6540_v43 = vcombine.low %v15427_v27, %v15439_v38  ;;  %v12259_v63 = vcombine.low %v5621_v62, %v15338_v44  ;;  %v7073_v58 = vadd.f32 %v7072_v53, %v15216_v17 }
0x10c0   : > { %v7077_v3 = vpop.f32.mrb[51].mxu0  ;;  %v7128_v45 = vpop.f32.mrb[43].mxu1  ;;  %v7124_v62 = vadd.f32 %v7123_v13, %v6926_v11  ;;  %v7075_v40 = vadd.f32 %v7074_v15, %v15262_v49  ;;  %v7126_v0 = vadd.f32 %v7125_v52, %v6928_v54  ;;  %v6758_v31 = vrot.slane %v12249_v42, %v14425_v1 }
0x10c1   : > { %v6772_v19 = vrot.slane %v12251_v39, %v14425_v1  ;;  %v6786_v9 = vrot.slane %v12253_v8, %v14425_v1  ;;  %v6800_v45 = vrot.slane %v12255_v60, %v14425_v1  ;;  %v6537_v11 = vcombine.high %v15413_v55, %v15416_v33 }
0x10c2   : > { %v8028_v3 = vcombine.low %v7073_v58, %v7075_v40  ;;  %v8029_v53 = vcombine.low %v7124_v62, %v7126_v0  ;;  %v6541_v49 = vcombine.high %v15427_v27, %v15439_v38  ;;  %v6938_v54 = vrot.slane %v12259_v63, %v14425_v1 }
0x10c3   : > { %v12234_v42 = vcombine.low %v15372_v47, %v15375_v16  ;;  %v12236_v39 = vcombine.high %v15372_v47, %v15375_v16  ;;  %v12238_v55 = vcombine.low %v15382_v23, %v15430_v21  ;;  %v12240_v27 = vcombine.high %v15382_v23, %v15430_v21 }
0x10c4   : > { %v15531_v40 = vrot.slane %v8028_v3, %v14425_v1  ;;  %v15534_v58 = vrot.slane %v8029_v53, %v14425_v1  ;;  %v15541_v33 = vrot.slane %v6536_v25, %v14425_v1  ;;  %v15544_v38 = vrot.slane %v6540_v43, %v14425_v1 }
0x10c5   : > { %v6808_v8 = vcombine.low %v6758_v31, %v6772_v19  ;;  %v6812_v60 = vcombine.low %v6786_v9, %v6800_v45  ;;  %v6809_v52 = vcombine.high %v6758_v31, %v6772_v19  ;;  %v6813_v63 = vcombine.high %v6786_v9, %v6800_v45 }
0x10c6   : > { %v8060_v13 = vcombine.low %v15531_v40, %v15534_v58  ;;  %v15551_v0 = vrot.slane %v6537_v11, %v14425_v1  ;;  %v15554_v62 = vrot.slane %v6541_v49, %v14425_v1  ;;  %v6946_v25 = vcombine.high %v6938_v54, %v6938_v54 }
0x10c7   : > { %v5618_v43 = vcombine.low %v15341_v51, %v15375_v16  ;;  %v6493_v3 = vrot.slane %v12234_v42, %v14425_v1  ;;  %v6507_v53 = vrot.slane %v12236_v39, %v14425_v1  ;;  %v6521_v17 = vrot.slane %v12238_v55, %v14425_v1 }
0x10c8   : > { %v6535_v15 = vrot.slane %v12240_v27, %v14425_v1  ;;  %v5616_v9 = vcombine.low %v15352_v37, %v15382_v23  ;;  %v5620_v51 = vcombine.low %v15355_v46, %v15430_v21  ;;  %v15571_v45 = vrot.slane %v6808_v8, %v14425_v1 }
0x10c9   : > { %v15574_v11 = vrot.slane %v6812_v60, %v14425_v1  ;;  %v15577_v49 = vrot.slane %v6809_v52, %v14425_v1  ;;  %v15580_v42 = vrot.slane %v6813_v63, %v14425_v1  ;;  %v15583_v39 = vrot.slane %v6938_v54, %v14425_v1 }
0x10ca   : > { %v15586_v37 = vrot.slane %v6946_v25, %v14425_v1  ;;  %v12250_v46 = vcombine.low %v15372_v47, %v15372_v47  ;;  %v12252_v55 = vcombine.high %v5618_v43, %v15372_v47  ;;  %v6538_v27 = vcombine.low %v6493_v3, %v6507_v53 }
0x10cb   : > { %v6542_v8 = vcombine.low %v6521_v17, %v6535_v15  ;;  %v6539_v60 = vcombine.high %v6493_v3, %v6507_v53  ;;  %v6543_v19 = vcombine.high %v6521_v17, %v6535_v15  ;;  %v12254_v54 = vcombine.high %v15375_v16, %v5616_v9 }
0x10cc   : > { %v12256_v25 = vcombine.high %v5620_v51, %v15382_v23  ;;  %v6765_v23 = vrot.slane %v12250_v46, %v14425_v1  ;;  %v6779_v53 = vrot.slane %v12252_v55, %v14425_v1  ;;  %v15612_v9 = vrot.slane %v6538_v27, %v14425_v1 }
0x10cd   : > { %v15615_v51 = vrot.slane %v6542_v8, %v14425_v1  ;;  %v15618_v3 = vrot.slane %v6539_v60, %v14425_v1  ;;  %v15621_v17 = vrot.slane %v6543_v19, %v14425_v1  ;;  %v15627_v16 = vrot.slane %v7548_v32, %v14425_v1 }
0x10ce   : > { %v15633_v46 = vrot.slane %v7550_v48, %v14425_v1  ;;  %v6793_v55 = vrot.slane %v12254_v54, %v14425_v1  ;;  %v6807_v27 = vrot.slane %v12256_v25, %v14425_v1  ;;  %v15641_v19 = vrot.slane %v7549_v28, %v14425_v1 }
0x10cf   : > { %v15647_v32 = vrot.slane %v7551_v6, %v14425_v1  ;;  %v16910_v48 = vcombine.low %v15481_v35, %v15487_v30  ;;  %v16911_v60 = vcombine.low %v15484_v41, %v15490_v36  ;;  %v16912_v26 = vcombine.high %v15481_v35, %v15487_v30 }
0x10d0   : > { %v16913_v50 = vcombine.high %v15484_v41, %v15490_v36  ;;  %v6810_v28 = vcombine.low %v6765_v23, %v6779_v53  ;;  %v6811_v6 = vcombine.high %v6765_v23, %v6779_v53  ;;  %v16914_v41 = vcombine.low %v15310_v20, %v15328_v2 }
0x10d1   : > { %v15653_v8 = vrot.slane %v16910_v48, %v14425_v1  ;;  %v15659_v54 = vrot.slane %v16911_v60, %v14425_v1  ;;  %v15665_v4 = vrot.slane %v16912_v26, %v14425_v1  ;;  %v16915_v23 = vcombine.high %v15310_v20, %v15328_v2 }
0x10d2   : > { %v15671_v29 = vrot.slane %v16913_v50, %v14425_v1  ;;  %v6814_v60 = vcombine.low %v6793_v55, %v6807_v27  ;;  %v6815_v43 = vcombine.high %v6793_v55, %v6807_v27  ;;  %v15691_v35 = vrot.slane %v8060_v13, %v14425_v1 }
0x10d3   : > { %v16916_v30 = vcombine.high %v15531_v40, %v15534_v58  ;;  %v16917_v20 = vcombine.low %v15331_v34, %v15334_v59  ;;  %v16919_v13 = vcombine.low %v15346_v5, %v15349_v12  ;;  %v15712_v31 = vrot.slane %v6810_v28, %v14425_v1 }
0x10d4   : > { %v15727_v28 = vrot.slane %v6815_v43, %v14425_v1  ;;  %v16928_v44 = vcombine.high %v15403_v7, %v15403_v7 }
0x10d5   : > { %v7164_v25 = vpop.f32.mrb[52].mxu0  ;;  %v7215_v48 = vpop.f32.mrb[44].mxu1  ;;  %v15697_v15 = vrot.slane %v16916_v30, %v14425_v1 }
0x10d6   : > { %v7165_v36 = vadd.f32 %v7164_v25, %v16914_v41  ;;  %v7216_v53 = vadd.f32 %v7215_v48, %v16915_v23  ;;  %v7166_v26 = vpop.f32.mrb[53].mxu0  ;;  %v7217_v50 = vpop.f32.mrb[45].mxu1  ;;  %v16918_v25 = vcombine.high %v15331_v34, %v15334_v59  ;;  %v16920_v23 = vcombine.high %v15346_v5, %v15349_v12  ;;  %16923 = vst [vmem:[#allocation34_spill] sm:$0xff] %v15727_v28 }
0x10d7   : > { %v7167_v2 = vadd.f32 %v7166_v26, %v16917_v20  ;;  %v7168_v27 = vpop.f32.mrb[54].mxu0  ;;  %v7219_v48 = vpop.f32.mrb[46].mxu1  ;;  %v15715_v26 = vrot.slane %v6811_v6, %v14425_v1  ;;  %v16922_v5 = vcombine.high %v15362_v22, %v15365_v57 }
0x10d8   : > { %v7218_v55 = vadd.f32 %v7217_v50, %v16918_v25  ;;  %v7169_v41 = vadd.f32 %v7168_v27, %v16919_v13  ;;  %v7220_v40 = vadd.f32 %v7219_v48, %v16920_v23  ;;  %v7170_v58 = vpop.f32.mrb[55].mxu0  ;;  %v7221_v30 = vpop.f32.mrb[47].mxu1  ;;  %v16921_v25 = vcombine.low %v15362_v22, %v15365_v57 }
0x10d9   : > { %v7488_v34 = vcombine.low %v7165_v36, %v7167_v2  ;;  %v7489_v59 = vcombine.high %v7165_v36, %v7167_v2  ;;  %v7222_v12 = vadd.f32 %v7221_v30, %v16922_v5  ;;  %v15724_v48 = vrot.slane %v6814_v60, %v14425_v1 }
0x10da   : > { %v7490_v50 = vcombine.low %v7216_v53, %v7218_v55  ;;  %v7491_v20 = vcombine.high %v7216_v53, %v7218_v55  ;;  %v7171_v27 = vadd.f32 %v7170_v58, %v16921_v25 }
0x10db   : > { %v7526_v6 = vrot.slane %v7488_v34, %v14425_v1  ;;  %v7533_v36 = vrot.slane %v7489_v59, %v14425_v1  ;;  %v7762_v23 = vcombine.low %v7220_v40, %v7222_v12  ;;  %v7763_v58 = vcombine.high %v7220_v40, %v7222_v12 }
0x10dc   : > { %v7540_v53 = vrot.slane %v7490_v50, %v14425_v1  ;;  %v7547_v2 = vrot.slane %v7491_v20, %v14425_v1  ;;  %v7760_v55 = vcombine.low %v7169_v41, %v7171_v27  ;;  %v7761_v13 = vcombine.high %v7169_v41, %v7171_v27 }
0x10dd   : > { %v15733_v25 = vpop.f32.mrb[56].mxu0  ;;  %v15735_v43 = vpop.f32.mrb[48].mxu1  ;;  %v7812_v50 = vrot.slane %v7762_v23, %v14425_v1  ;;  %v7819_v20 = vrot.slane %v7763_v58, %v14425_v1 }
0x10de   : > { %v7552_v22 = vcombine.low %v7526_v6, %v7540_v53  ;;  %v7553_v57 = vcombine.high %v7526_v6, %v7540_v53  ;;  %v7554_v30 = vcombine.low %v7533_v36, %v7547_v2  ;;  %v7555_v60 = vcombine.high %v7533_v36, %v7547_v2  ;;  %v15741_v5 = vpop.f32.mrb[57].mxu0  ;;  %v15743_v41 = vpop.f32.mrb[49].mxu1 }
0x10df   : > { %v7798_v34 = vrot.slane %v7760_v55, %v14425_v1  ;;  %v7805_v59 = vrot.slane %v7761_v13, %v14425_v1  ;;  %v7178_v36 = vpop.f32.mrb[58].mxu0  ;;  %v7229_v53 = vpop.f32.mrb[50].mxu1 }
0x10e0   : > { %v7590_v40 = vrot.slane %v7552_v22, %v14425_v1  ;;  %v7597_v27 = vrot.slane %v7554_v30, %v14425_v1  ;;  %v7604_v12 = vrot.slane %v7553_v57, %v14425_v1  ;;  %v7611_v6 = vrot.slane %v7555_v60, %v14425_v1  ;;  %v7179_v63 = vpop.f32.mrb[59].mxu0  ;;  %v7230_v58 = vpop.f32.mrb[51].mxu1 }
0x10e1   : > { %v7824_v2 = vcombine.low %v7798_v34, %v7812_v50  ;;  %v7825_v55 = vcombine.high %v7798_v34, %v7812_v50  ;;  %v7826_v13 = vcombine.low %v7805_v59, %v7819_v20  ;;  %v7827_v23 = vcombine.high %v7805_v59, %v7819_v20 }
0x10e2   : > { %v7612_v52 = vcombine.low %v15627_v16, %v7590_v40  ;;  %v7613_v14 = vcombine.high %v15627_v16, %v7590_v40  ;;  %v7614_v22 = vcombine.low %v15633_v46, %v7597_v27  ;;  %v7615_v30 = vcombine.high %v15633_v46, %v7597_v27 }
0x10e3   : > { %v7616_v57 = vcombine.low %v15641_v19, %v7604_v12  ;;  %v7617_v60 = vcombine.high %v15641_v19, %v7604_v12  ;;  %v7618_v36 = vcombine.low %v15647_v32, %v7611_v6  ;;  %v7619_v34 = vcombine.high %v15647_v32, %v7611_v6 }
0x10e4   : > { %v8196_v50 = vmax.f32 %v7612_v52, 0.0  ;;  %v8200_v59 = vmax.f32 %v7613_v14, 0.0  ;;  %v8204_v63 = vmax.f32 %v7614_v22, 0.0  ;;  %v8208_v20 = vmax.f32 %v7615_v30, 0.0 }
0x10e5   : > { %v8198_v53 = vmax.f32 %v7616_v57, 0.0  ;;  %v8202_v58 = vmax.f32 %v7617_v60, 0.0  ;;  %v8206_v10 = vmax.f32 %v7618_v36, 0.0  ;;  %v8210_v16 = vmax.f32 %v7619_v34, 0.0 }
0x10e6   : > { %v7862_v40 = vrot.slane %v7824_v2, %v14425_v1  ;;  %v7869_v46 = vrot.slane %v7826_v13, %v14425_v1  ;;  %v7876_v27 = vrot.slane %v7825_v55, %v14425_v1  ;;  %v15761_v19 = vrot.slane %v7827_v23, %v14425_v1 }
0x10e7   : > { %v8268_v12 = vcombine.low %v8196_v50, %v8198_v53  ;;  %v8269_v61 = vcombine.high %v8196_v50, %v8198_v53  ;;  %v8270_v32 = vcombine.low %v8200_v59, %v8202_v58  ;;  %v8271_v52 = vcombine.high %v8200_v59, %v8202_v58 }
0x10e8   : > { %v8272_v14 = vcombine.low %v8204_v63, %v8206_v10  ;;  %v8273_v6 = vcombine.high %v8204_v63, %v8206_v10  ;;  %v8274_v22 = vcombine.low %v8208_v20, %v8210_v16  ;;  %v8275_v30 = vcombine.high %v8208_v20, %v8210_v16 }
0x10e9   : > { %v8282_v57 = vrot.slane %v8268_v12, %v14425_v1  ;;  %v8289_v60 = vrot.slane %v8269_v61, %v14425_v1  ;;  %v8296_v2 = vrot.slane %v8270_v32, %v14425_v1  ;;  %v8303_v13 = vrot.slane %v8271_v52, %v14425_v1 }
0x10ea   : > { %v8310_v55 = vrot.slane %v8272_v14, %v14425_v1  ;;  %v8317_v23 = vrot.slane %v8273_v6, %v14425_v1  ;;  %v8324_v36 = vrot.slane %v8274_v22, %v14425_v1  ;;  %v8331_v34 = vrot.slane %v8275_v30, %v14425_v1 }
0x10eb   : > { %v8332_v50 = vcombine.low %v8282_v57, %v8296_v2  ;;  %v8333_v10 = vcombine.high %v8282_v57, %v8296_v2  ;;  %v8334_v59 = vcombine.low %v8289_v60, %v8303_v13  ;;  %v8335_v63 = vcombine.high %v8289_v60, %v8303_v13 }
0x10ec   : > { %v8336_v20 = vcombine.low %v8310_v55, %v8324_v36  ;;  %v8337_v53 = vcombine.high %v8310_v55, %v8324_v36  ;;  %v8338_v58 = vcombine.low %v8317_v23, %v8331_v34  ;;  %v8339_v61 = vcombine.high %v8317_v23, %v8331_v34 }
0x10ed   : > { %v15772_v16 = vrot.slane %v8332_v50, %v14425_v1  ;;  %v15775_v12 = vrot.slane %v8334_v59, %v14425_v1  ;;  %v15778_v32 = vrot.slane %v8333_v10, %v14425_v1  ;;  %v15781_v52 = vrot.slane %v8335_v63, %v14425_v1 }
0x10ee   : > { %v15784_v14 = vrot.slane %v8336_v20, %v14425_v1  ;;  %v15787_v6 = vrot.slane %v8338_v58, %v14425_v1  ;;  %v15790_v22 = vrot.slane %v8337_v53, %v14425_v1  ;;  %v15793_v30 = vrot.slane %v8339_v61, %v14425_v1 }
0x10ef   : > { %16924 = vst [vmem:[#allocation35_spill] sm:$0xff] %v15775_v12  ;;  %16925 = vst [vmem:[#allocation36_spill] sm:$0xff] %v15781_v52  ;;  %v7884_v57 = vcombine.low %v15653_v8, %v7862_v40  ;;  %v7885_v60 = vcombine.high %v15653_v8, %v7862_v40  ;;  %v7886_v2 = vcombine.low %v15659_v54, %v7869_v46 }
0x10f0   : > { %16926 = vst [vmem:[#allocation37_spill] sm:$0xff] %v15787_v6  ;;  %16927 = vst [vmem:[#allocation38_spill] sm:$0xff] %v15793_v30  ;;  %v7887_v13 = vcombine.high %v15659_v54, %v7869_v46  ;;  %v7888_v46 = vcombine.low %v15665_v4, %v7876_v27  ;;  %v7889_v10 = vcombine.high %v15665_v4, %v7876_v27 }
0x10f1   : > { %v7890_v59 = vcombine.low %v15671_v29, %v15761_v19  ;;  %v7891_v63 = vcombine.high %v15671_v29, %v15761_v19  ;;  %v8212_v20 = vmax.f32 %v7884_v57, 0.0  ;;  %v8216_v53 = vmax.f32 %v7885_v60, 0.0 }
0x10f2   : > { %v8220_v58 = vmax.f32 %v7886_v2, 0.0  ;;  %v8224_v61 = vmax.f32 %v7887_v13, 0.0  ;;  %v8214_v34 = vmax.f32 %v7888_v46, 0.0  ;;  %v8218_v36 = vmax.f32 %v7889_v10, 0.0 }
0x10f3   : > { %v8222_v54 = vmax.f32 %v7890_v59, 0.0  ;;  %v8540_v8 = vcombine.high %v8212_v20, %v8212_v20  ;;  %v8547_v23 = vrot.slane %v8212_v20, %v14425_v1 }
0x10f4   : > { %v8638_v29 = vcombine.low %v8214_v34, %v8216_v53  ;;  %v8639_v19 = vcombine.high %v8214_v34, %v8216_v53  ;;  %v8640_v57 = vcombine.low %v8218_v36, %v8220_v58  ;;  %v8641_v60 = vcombine.high %v8218_v36, %v8220_v58 }
0x10f5   : > { %v7266_v2 = vpop.f32.mrb[60].mxu0  ;;  %v7317_v13 = vpop.f32.mrb[52].mxu1  ;;  %v8554_v46 = vrot.slane %v8540_v8, %v14425_v1  ;;  %v8555_v10 = vcombine.high %v8547_v23, %v8547_v23  ;;  %v15830_v59 = vrot.slane %v8547_v23, %v14425_v1  ;;  %v8642_v40 = vcombine.low %v8222_v54, %v8224_v61 }
0x10f6   : > { %v7268_v20 = vpop.f32.mrb[61].mxu0  ;;  %v7319_v50 = vpop.f32.mrb[53].mxu1  ;;  %v8643_v55 = vcombine.high %v8222_v54, %v8224_v61  ;;  %v8652_v4 = vrot.slane %v8638_v29, %v14425_v1  ;;  %v8659_v27 = vrot.slane %v8639_v19, %v14425_v1  ;;  %v8666_v34 = vrot.slane %v8640_v57, %v14425_v1 }
0x10f7   : > { %v7270_v53 = vpop.f32.mrb[62].mxu0  ;;  %v7321_v36 = vpop.f32.mrb[54].mxu1  ;;  %v8556_v58 = vcombine.high %v8554_v46, %v8554_v46  ;;  %v15836_v18 = vrot.slane %v8554_v46, %v14425_v1  ;;  %v15839_v8 = vrot.slane %v8555_v10, %v14425_v1  ;;  %v15843_v61 = vmax.f32 %v7891_v63, 0.0 }
0x10f8   : > { %v7272_v23 = vpop.f32.mrb[63].mxu0  ;;  %v7323_v56 = vpop.f32.mrb[55].mxu1  ;;  %v8673_v29 = vrot.slane %v8641_v60, %v14425_v1  ;;  %v8702_v19 = vcombine.low %v8652_v4, %v8666_v34  ;;  %v7175_v57 = vadd.f32 %v15733_v25, %v15403_v7  ;;  %v8703_v10 = vcombine.high %v8652_v4, %v8666_v34 }
0x10f9   : > { %v15849_v21 = vrot.slane %v8556_v58, %v14425_v1  ;;  %v8587_v46 = vcombine.high %v15839_v8, %v15839_v8  ;;  %v7226_v54 = vadd.f32 %v15735_v43, %v16928_v44  ;;  %v8585_v63 = vcombine.high %v15830_v59, %v15830_v59 }
0x10fa   : > { %v15860_v60 = vrot.slane %v8642_v40, %v14425_v1  ;;  %v8704_v47 = vcombine.low %v8659_v27, %v8673_v29  ;;  %v8705_v25 = vcombine.high %v8659_v27, %v8673_v29  ;;  %v8586_v58 = vcombine.high %v15836_v18, %v15836_v18 }
0x10fb   : > { %v15865_v30 = vrot.slane %v8643_v55, %v14425_v1  ;;  %v15868_v4 = vrot.slane %v8702_v19, %v14425_v1  ;;  %v12262_v44 = vpack.c.bf16 %v15839_v8, %v15830_v59  ;;  %v8588_v7 = vcombine.high %v15849_v21, %v15849_v21 }
0x10fc   : > { %v15875_v43 = vrot.slane %v8703_v10, %v14425_v1  ;;  %v15877_v40 = vpack.c.bf16 %v8587_v46, %v8585_v63  ;;  %v7177_v27 = vadd.f32 %v15741_v5, %v15410_v24  ;;  %v15882_v29 = vrot.slane %v8704_v47, %v14425_v1 }
0x10fd   : > { %v7276_v34 = vpop.f32.mrb[64].mxu0  ;;  %v7327_v55 = vpop.f32.mrb[56].mxu1  ;;  %v15885_v19 = vrot.slane %v8705_v25, %v14425_v1  ;;  %v12266_v59 = vpack.c.bf16 %v15849_v21, %v15836_v18  ;;  %v16929_v8 = vcombine.high %v15410_v24, %v15410_v24  ;;  %v16930_v47 = vcombine.low %v15541_v33, %v15544_v38 }
0x10fe   : > { %v15893_v10 = vpop.f32.mrb[65].mxu0  ;;  %v15895_v63 = vpop.f32.mrb[57].mxu1  ;;  %v8030_v5 = vcombine.low %v7175_v57, %v7177_v27  ;;  %v16931_v25 = vcombine.high %v15541_v33, %v15544_v38  ;;  %v16932_v18 = vcombine.low %v15551_v0, %v15554_v62  ;;  %v16934_v57 = vcombine.low %v15571_v45, %v15574_v11 }
0x10ff   : > { %v7228_v46 = vadd.f32 %v15743_v41, %v16929_v8  ;;  %v7267_v52 = vadd.f32 %v7266_v2, %v16930_v47  ;;  %v7280_v24 = vpop.f32.mrb[66].mxu0  ;;  %v7331_v12 = vpop.f32.mrb[58].mxu1  ;;  %v16933_v8 = vcombine.high %v15551_v0, %v15554_v62  ;;  %v16935_v2 = vcombine.high %v15571_v45, %v15574_v11 }
0x1100   : > { %v7318_v6 = vadd.f32 %v7317_v13, %v16931_v25  ;;  %v7269_v21 = vadd.f32 %v7268_v20, %v16932_v18  ;;  %v7271_v27 = vadd.f32 %v7270_v53, %v16934_v57  ;;  %v7281_v38 = vpop.f32.mrb[67].mxu0  ;;  %v7332_v13 = vpop.f32.mrb[59].mxu1  ;;  %v8052_v47 = vrot.slane %v8030_v5, %v14425_v1 }
0x1101   : > { %v8031_v41 = vcombine.low %v7226_v54, %v7228_v46  ;;  %v7320_v28 = vadd.f32 %v7319_v50, %v16933_v8  ;;  %v7322_v33 = vadd.f32 %v7321_v36, %v16935_v2  ;;  %v16936_v12 = vcombine.low %v15577_v49, %v15580_v42 }
0x1102   : > { %v7620_v20 = vcombine.low %v7267_v52, %v7269_v21  ;;  %v7621_v25 = vcombine.high %v7267_v52, %v7269_v21  ;;  %v16937_v53 = vcombine.high %v15577_v49, %v15580_v42  ;;  %v15941_v13 = vpack.c.bf16 %v8588_v7, %v8586_v58 }
0x1103   : > { %v7273_v54 = vadd.f32 %v7272_v23, %v16936_v12  ;;  %v8059_v0 = vrot.slane %v8031_v41, %v14425_v1  ;;  %v7622_v62 = vcombine.low %v7318_v6, %v7320_v28  ;;  %v7623_v50 = vcombine.high %v7318_v6, %v7320_v28 }
0x1104   : > { %v7324_v46 = vadd.f32 %v7323_v56, %v16937_v53  ;;  %v7634_v45 = vrot.slane %v7620_v20, %v14425_v1  ;;  %v7641_v11 = vrot.slane %v7621_v25, %v14425_v1  ;;  %v9175_v25 = vrot.slane %v15877_v40, %v14425_v1 }
0x1105   : > { %v7892_v36 = vcombine.low %v7271_v27, %v7273_v54  ;;  %v7893_v5 = vcombine.high %v7271_v27, %v7273_v54  ;;  %v8062_v18 = vcombine.low %v8052_v47, %v8059_v0  ;;  %v8063_v52 = vcombine.high %v8052_v47, %v8059_v0 }
0x1106   : > { %v7648_v21 = vrot.slane %v7622_v62, %v14425_v1  ;;  %v7655_v23 = vrot.slane %v7623_v50, %v14425_v1  ;;  %v7894_v49 = vcombine.low %v7322_v33, %v7324_v46  ;;  %v7895_v56 = vcombine.high %v7322_v33, %v7324_v46 }
0x1107   : > { %v15928_v24 = vrot.slane %v7892_v36, %v14425_v1  ;;  %v15931_v28 = vrot.slane %v7893_v5, %v14425_v1  ;;  %v8084_v42 = vrot.slane %v8062_v18, %v14425_v1  ;;  %v8091_v6 = vrot.slane %v8063_v52, %v14425_v1 }
0x1108   : > { %v7684_v41 = vcombine.low %v7634_v45, %v7648_v21  ;;  %v7685_v8 = vcombine.high %v7634_v45, %v7648_v21  ;;  %v7686_v57 = vcombine.low %v7641_v11, %v7655_v23  ;;  %v7687_v27 = vcombine.high %v7641_v11, %v7655_v23 }
0x1109   : > { %v15936_v2 = vrot.slane %v7894_v49, %v14425_v1  ;;  %v15939_v38 = vrot.slane %v7895_v56, %v14425_v1  ;;  %v15944_v47 = vrot.slane %v12262_v44, %v14425_v1  ;;  %v8092_v33 = vcombine.low %v15691_v35, %v8084_v42 }
0x110a   : > { %v8093_v20 = vcombine.low %v15697_v15, %v8091_v6  ;;  %v15951_v12 = vrot.slane %v12266_v59, %v14425_v1  ;;  %v15962_v35 = vrot.slane %v7684_v41, %v14425_v1  ;;  %v15965_v59 = vrot.slane %v7685_v8, %v14425_v1 }
0x110b   : > { %v7956_v54 = vcombine.low %v15928_v24, %v15936_v2  ;;  %v7957_v58 = vcombine.high %v15928_v24, %v15936_v2  ;;  %v8228_v7 = vmax.f32 %v8092_v33, 0.0  ;;  %v7958_v44 = vcombine.low %v15931_v28, %v15939_v38 }
0x110c   : > { %v8230_v0 = vmax.f32 %v8093_v20, 0.0  ;;  %v7959_v15 = vcombine.high %v15931_v28, %v15939_v38  ;;  %v7277_v62 = vadd.f32 %v7276_v34, %v15583_v39  ;;  %v16938_v50 = vcombine.high %v15583_v39, %v15583_v39 }
0x110d   : > { %v8644_v46 = vcombine.low %v15843_v61, %v8228_v7  ;;  %v8645_v45 = vcombine.high %v15843_v61, %v8228_v7  ;;  %v15975_v5 = vrot.slane %v7686_v57, %v14425_v1  ;;  %v15978_v18 = vrot.slane %v7687_v27, %v14425_v1 }
0x110e   : > { %v7328_v53 = vadd.f32 %v7327_v55, %v16938_v50  ;;  %v8910_v11 = vcombine.high %v8230_v0, %v8230_v0  ;;  %v8917_v36 = vrot.slane %v8230_v0, %v14425_v1  ;;  %v7279_v34 = vadd.f32 %v15893_v10, %v15586_v37 }
0x110f   : > { %v16939_v39 = vcombine.high %v15586_v37, %v15586_v37  ;;  %v8694_v52 = vrot.slane %v8644_v46, %v14425_v1  ;;  %v8701_v61 = vrot.slane %v8645_v45, %v14425_v1  ;;  %v16940_v10 = vcombine.low %v15772_v16, %v15784_v14 }
0x1110   : > { %v8924_v21 = vrot.slane %v8910_v11, %v14425_v1  ;;  %v8925_v23 = vcombine.high %v8917_v36, %v8917_v36  ;;  %v15990_v49 = vrot.slane %v8917_v36, %v14425_v1  ;;  %v8094_v56 = vcombine.low %v7277_v62, %v7279_v34 }
0x1111   : > { %v7330_v55 = vadd.f32 %v15895_v63, %v16939_v39  ;;  %v16941_v37 = vcombine.low %v15778_v32, %v15790_v22  ;;  %v8706_v63 = vcombine.low %v15860_v60, %v8694_v52  ;;  %v8707_v41 = vcombine.high %v15860_v60, %v8694_v52 }
0x1112   : > { %v8708_v8 = vcombine.low %v15865_v30, %v8701_v61  ;;  %v8709_v57 = vcombine.high %v15865_v30, %v8701_v61  ;;  %v8926_v27 = vcombine.high %v8924_v21, %v8924_v21  ;;  %v16003_v33 = vrot.slane %v8924_v21, %v14425_v1 }
0x1113   : > { %v8095_v42 = vcombine.low %v7328_v53, %v7330_v55  ;;  %v12261_v6 = vpack.c.bf16 %v16941_v37, %v16940_v10  ;;  %v16006_v20 = vrot.slane %v8925_v23, %v14425_v1  ;;  %v16009_v7 = vrot.slane %v7956_v54, %v14425_v1 }
0x1114   : > { %v8744_v0 = vrot.slane %v8706_v63, %v14425_v1  ;;  %v8751_v62 = vrot.slane %v8708_v8, %v14425_v1  ;;  %v8758_v60 = vrot.slane %v8707_v41, %v14425_v1  ;;  %v8765_v50 = vrot.slane %v8709_v57, %v14425_v1 }
0x1115   : > { %v16016_v30 = vrot.slane %v8926_v27, %v14425_v1  ;;  %v8955_v53 = vcombine.high %v15990_v49, %v15990_v49  ;;  %v8956_v46 = vcombine.high %v16003_v33, %v16003_v33  ;;  %v16023_v54 = vrot.slane %v7958_v44, %v14425_v1  ;;  %v16033_v21 = vpop.f32.mrb[68].mxu0  ;;  %v16035_v44 = vpop.f32.mrb[60].mxu1 }
0x1116   : > { %v8766_v45 = vcombine.low %v15868_v4, %v8744_v0  ;;  %v8767_v11 = vcombine.high %v15868_v4, %v8744_v0  ;;  %v8768_v36 = vcombine.low %v15882_v29, %v8751_v62  ;;  %v8769_v34 = vcombine.high %v15882_v29, %v8751_v62  ;;  %v16048_v37 = vpop.f32.mrb[61].mxu1 }
0x1117   : > { %v8770_v39 = vcombine.low %v15875_v43, %v8758_v60  ;;  %v8771_v55 = vcombine.high %v15875_v43, %v8758_v60  ;;  %v8772_v52 = vcombine.low %v15885_v19, %v8765_v50  ;;  %v8773_v61 = vcombine.high %v15885_v19, %v8765_v50  ;;  %v16046_v43 = vpop.f32.mrb[69].mxu0  ;;  %v16052_v27 = vpop.f32.mrb[62].mxu1 }
0x1118   : > { %v8957_v23 = vcombine.high %v16006_v20, %v16006_v20  ;;  %v8958_v4 = vcombine.high %v16016_v30, %v16016_v30  ;;  %v12278_v29 = vpack.c.bf16 %v16006_v20, %v15990_v49  ;;  %v16044_v10 = vrot.slane %v8094_v56, %v14425_v1  ;;  %v16050_v57 = vpop.f32.mrb[70].mxu0 }
0x1119   : > { %v12277_v19 = vpack.c.bf16 %v8770_v39, %v8766_v45  ;;  %v12279_v63 = vpack.c.bf16 %v8771_v55, %v8767_v11  ;;  %v12281_v41 = vpack.c.bf16 %v8772_v52, %v8768_v36  ;;  %v12283_v8 = vpack.c.bf16 %v8773_v61, %v8769_v34  ;;  %v16066_v50 = vpop.f32.mrb[71].mxu0  ;;  %v16068_v45 = vpop.f32.mrb[63].mxu1 }
0x111a   : > { %v16055_v0 = vrot.slane %v8095_v42, %v14425_v1  ;;  %v16942_v49 = vcombine.high %v15772_v16, %v15784_v14  ;;  %v16943_v56 = vcombine.high %v15778_v32, %v15790_v22  ;;  %v9154_v62 = vrot.slane %v12261_v6, %v14425_v1 }
0x111b   : > { %v9203_v60 = vrot.slane %v15941_v13, %v14425_v1  ;;  %v9206_v42 = vcombine.low %v15944_v47, %v9175_v25  ;;  %v9388_v16 = vrot.slane %v12277_v19, %v14425_v1  ;;  %v9402_v14 = vrot.slane %v12279_v63, %v14425_v1 }
0x111c   : > { %v12263_v20 = vpack.c.bf16 %v16943_v56, %v16942_v49  ;;  %v9416_v32 = vrot.slane %v12281_v41, %v14425_v1  ;;  %v8126_v22 = vcombine.low %v16044_v10, %v16055_v0  ;;  %v8127_v13 = vcombine.high %v16044_v10, %v16055_v0 }
0x111d   : > { %v9209_v11 = vcombine.low %v15951_v12, %v9203_v60  ;;  %v12280_v36 = vpack.c.bf16 %v8957_v23, %v8955_v53  ;;  %v9430_v40 = vrot.slane %v12283_v8, %v14425_v1  ;;  %v9438_v47 = vcombine.low %v9388_v16, %v9402_v14  ;;  %v16089_v49 = vpop.f32.mrb[72].mxu0  ;;  %v16091_v12 = vpop.f32.mrb[64].mxu1 }
0x111e   : > { %v9168_v6 = vrot.slane %v12263_v20, %v14425_v1  ;;  %v9439_v25 = vcombine.high %v9388_v16, %v9402_v14  ;;  %v12282_v34 = vpack.c.bf16 %v16016_v30, %v16003_v33  ;;  %v9223_v52 = vrot.slane %v9206_v42, %v14425_v1  ;;  %v16096_v8 = vpop.f32.mrb[73].mxu0  ;;  %v16098_v56 = vpop.f32.mrb[65].mxu1 }
0x111f   : > { %v9244_v61 = vrot.slane %v9209_v11, %v14425_v1  ;;  %v9441_v19 = vcombine.low %v9416_v32, %v9430_v40  ;;  %v9442_v63 = vcombine.high %v9416_v32, %v9430_v40  ;;  %v9450_v41 = vrot.slane %v9438_v47, %v14425_v1  ;;  %v7382_v16 = vpop.f32.mrb[74].mxu0  ;;  %v7433_v14 = vpop.f32.mrb[66].mxu1 }
0x1120   : > { %v9204_v39 = vcombine.low %v9154_v62, %v9168_v6  ;;  %v9205_v55 = vcombine.high %v9154_v62, %v9168_v6  ;;  %v9464_v33 = vrot.slane %v9439_v25, %v14425_v1  ;;  %v12284_v30 = vpack.c.bf16 %v8958_v4, %v8956_v46  ;;  %v7383_v46 = vpop.f32.mrb[75].mxu0  ;;  %v7434_v4 = vpop.f32.mrb[67].mxu1 }
0x1121   : > { %v9254_v20 = vcombine.low %v9223_v52, %v9244_v61  ;;  %v9471_v62 = vrot.slane %v9441_v19, %v14425_v1  ;;  %v9485_v60 = vrot.slane %v9442_v63, %v14425_v1  ;;  %v9395_v42 = vrot.slane %v12278_v29, %v14425_v1 }
0x1122   : > { %v9216_v53 = vrot.slane %v9204_v39, %v14425_v1  ;;  %v9230_v23 = vrot.slane %v9205_v55, %v14425_v1  ;;  %v9409_v11 = vrot.slane %v12280_v36, %v14425_v1  ;;  %v9423_v40 = vrot.slane %v12282_v34, %v14425_v1 }
0x1123   : > { %v9486_v47 = vcombine.low %v9450_v41, %v9471_v62  ;;  %v9487_v25 = vcombine.high %v9450_v41, %v9471_v62  ;;  %v9489_v39 = vcombine.low %v9464_v33, %v9485_v60  ;;  %v9490_v55 = vcombine.high %v9464_v33, %v9485_v60 }
0x1124   : > { %v12303_v32 = vcombine.low %v9216_v53, %v9230_v23  ;;  %v12305_v6 = vcombine.high %v9216_v53, %v9230_v23  ;;  %v9437_v29 = vrot.slane %v12284_v30, %v14425_v1  ;;  %v9440_v19 = vcombine.low %v9395_v42, %v9409_v11 }
0x1125   : > { %v9628_v63 = vunpack.i.h.s16 %v9486_v47  ;;  %v9632_v16 = vunpack.i.h.s16 %v9489_v39  ;;  %v9636_v53 = vunpack.i.h.s16 %v9487_v25  ;;  %v16108_v23 = vpack.i.b16 %v9486_v47, %v9254_v20 }
0x1126   : > { %v9725_v52 = vrot.slane %v12303_v32, %v14425_v1  ;;  %v9739_v61 = vrot.slane %v12305_v6, %v14425_v1  ;;  %v9443_v14 = vcombine.low %v9423_v40, %v9437_v29  ;;  %v9457_v46 = vrot.slane %v9440_v19, %v14425_v1 }
0x1127   : > { %v16111_v41 = vpack.i.b16 %v9489_v39, %v9628_v63  ;;  %v16113_v33 = vpack.i.b16 %v9487_v25, %v9632_v16  ;;  %v16115_v62 = vpack.i.b16 %v9490_v55, %v9636_v53  ;;  %v9640_v60 = vunpack.i.h.s16 %v9490_v55  ;;  %v16950_v16 = vld [vmem:[#allocation34_spill] sm:$0xff] }
0x1128   : > { %v9775_v36 = vcombine.low %v9725_v52, %v9739_v61  ;;  %v9776_v34 = vcombine.high %v9725_v52, %v9739_v61  ;;  %v9478_v32 = vrot.slane %v9443_v14, %v14425_v1  ;;  %v16944_v20 = vcombine.low %v15612_v9, %v15615_v51 }
0x1129   : > { %v9715_v11 = vcombine.low %v16108_v23, %v16111_v41  ;;  %v9717_v40 = vcombine.low %v16113_v33, %v16115_v62  ;;  %v16945_v4 = vcombine.high %v15612_v9, %v15615_v51  ;;  %v16946_v25 = vcombine.low %v15618_v3, %v15621_v17 }
0x112a   : > { %v9803_v30 = vrot.slane %v9776_v34, %v14425_v1  ;;  %v9789_v42 = vrot.slane %v9775_v36, %v14425_v1  ;;  %v7369_v6 = vadd.f32 %v16033_v21, %v16944_v20  ;;  %v9488_v55 = vcombine.low %v9457_v46, %v9478_v32 }
0x112b   : > { %v7420_v47 = vadd.f32 %v16035_v44, %v16945_v4  ;;  %v7371_v39 = vadd.f32 %v16046_v43, %v16946_v25  ;;  %v16947_v21 = vcombine.high %v15618_v3, %v15621_v17  ;;  %v16948_v61 = vcombine.low %v15712_v31, %v15724_v48 }
0x112c   : > { %v16949_v9 = vcombine.high %v15712_v31, %v15724_v48  ;;  %v9753_v44 = vrot.slane %v9715_v11, %v14425_v1  ;;  %v9767_v43 = vrot.slane %v9717_v40, %v14425_v1  ;;  %v16152_v3 = vpack.i.b16 %v9488_v55, %v9640_v60 }
0x112d   : > { %v7422_v52 = vadd.f32 %v16048_v37, %v16947_v21  ;;  %v7373_v29 = vadd.f32 %v16050_v57, %v16948_v61  ;;  %v7624_v19 = vcombine.low %v7369_v6, %v7371_v39  ;;  %v7625_v63 = vcombine.high %v7369_v6, %v7371_v39  ;;  %v13578_v61 = vld [vmem:[%s14371_s13 + $0x100] sm:$0xff]  }
0x112e   : > { %v16148_v51 = vadd.f32 %v16052_v27, %v16949_v9  ;;  %v16951_v53 = vcombine.low %v15715_v26, %v16950_v16  ;;  %v9779_v36 = vcombine.low %v9753_v44, %v9767_v43  ;;  %v9780_v31 = vcombine.high %v9753_v44, %v9767_v43  ;;  %v13580_v43 = vld [vmem:[%s14371_s13 + $0x148] sm:$0xff]  }
0x112f   : > { %v7626_v17 = vcombine.low %v7420_v47, %v7422_v52  ;;  %v7627_v37 = vcombine.high %v7420_v47, %v7422_v52  ;;  %v7662_v48 = vrot.slane %v7624_v19, %v14425_v1  ;;  %v7669_v27 = vrot.slane %v7625_v63, %v14425_v1  ;;  %v13581_v19 = vld [vmem:[%s14371_s13 + $0x1c8] sm:$0xff]  }
0x1130   : > { %v7375_v57 = vadd.f32 %v16066_v50, %v16951_v53  ;;  %v16162_v34 = vrot.slane %v16152_v3, %v14425_v1  ;;  %v9831_v32 = vrot.slane %v9780_v31, %v14425_v1  ;;  %v9817_v50 = vrot.slane %v9779_v36, %v14425_v1  ;;  %v13582_v53 = vld [vmem:[%s14371_s13 + $0x108] sm:$0xff]  }
0x1131   : > { %v7676_v14 = vrot.slane %v7626_v17, %v14425_v1  ;;  %v7683_v46 = vrot.slane %v7627_v37, %v14425_v1  ;;  %v16952_v6 = vcombine.high %v15715_v26, %v16950_v16 }
0x1132   : > { %v7896_v60 = vcombine.low %v7373_v29, %v7375_v57  ;;  %v7897_v20 = vcombine.high %v7373_v29, %v7375_v57  ;;  %v9998_v40 = vcombine.high %v16162_v34, %v16162_v34  ;;  %v9843_v39 = vcombine.low %v9803_v30, %v9831_v32  ;;  %v13579_v29 = vld [vmem:[%s14371_s13 + $0x180] sm:$0xff]   ;;  %v13583_v57 = vld [vmem:[%s14371_s13 + $0x188] sm:$0xff]  }
0x1133   : > { %v16172_v11 = vadd.f32 %v16068_v45, %v16952_v6  ;;  %v7688_v4 = vcombine.low %v7662_v48, %v7676_v14  ;;  %v7689_v47 = vcombine.high %v7662_v48, %v7676_v14  ;;  %v7690_v25 = vcombine.low %v7669_v27, %v7683_v46 }
0x1134   : > { %v9844_v55 = vcombine.high %v9803_v30, %v9831_v32  ;;  %v9839_v21 = vcombine.low %v9789_v42, %v9817_v50  ;;  %v9840_v52 = vcombine.high %v9789_v42, %v9817_v50  ;;  %v10020_v9 = vrot.slane %v9998_v40, %v14425_v1  ;;  %11029 = vmatprep.mubr.bf16.mxu0 %v9843_v39  ;;  %v13584_v32 = vld [vmem:[%s14371_s13 + $0x150] sm:$0xff]  }
0x1135   : > { %v7691_v26 = vcombine.high %v7669_v27, %v7683_v46  ;;  %v7726_v45 = vrot.slane %v7688_v4, %v14425_v1  ;;  %v7733_v44 = vrot.slane %v7690_v25, %v14425_v1  ;;  %v7740_v63 = vrot.slane %v7689_v47, %v14425_v1  ;;  %v13585_v40 = vld [vmem:[%s14371_s13 + $0x1d0] sm:$0xff]  }
0x1136   : > { %11077 = vmatprep.mubr.bf16.mxu1 %v9844_v55  ;;  %v16185_v30 = vrot.slane %v7896_v60, %v14425_v1  ;;  %v16188_v42 = vrot.slane %v7897_v20, %v14425_v1  ;;  %11030 = vmatmul.mubr.bf16.vlgmr.msra.gmra.mrb[76].mxu0 %v9839_v21  ;;  %v10030_v17 = vcombine.high %v10020_v9, %v10020_v9  ;;  %v13586_v55 = vld [vmem:[%s14371_s13 + $0x110] sm:$0xff]   ;;  %v16953_v21 = vld [vmem:[#allocation35_spill] sm:$0xff] }
0x1137   : > { %11078 = vmatmul.mubr.bf16.vlgmr.msra.gmra.mrb[68].mxu1 %v9840_v52  ;;  %v7747_v37 = vrot.slane %v7691_v26, %v14425_v1  ;;  %v7748_v16 = vcombine.low %v15962_v35, %v7726_v45  ;;  %12736 = vmatpush3.bf16.msra.mxu0 %v13578_v61  ;;  %v7749_v36 = vcombine.high %v15962_v35, %v7726_v45  ;;  %v16954_v52 = vld [vmem:[#allocation37_spill] sm:$0xff] }
0x1138   : > { %12764 = vmatpush3.bf16.msra.mxu1 %v13579_v29  ;;  %v7750_v31 = vcombine.low %v15975_v5, %v7733_v44  ;;  %v7751_v48 = vcombine.high %v15975_v5, %v7733_v44  ;;  %11037 = vmatprep.mubr.bf16.mxu0 %v10020_v9  ;;  %v7752_v27 = vcombine.low %v15965_v59, %v7740_v63  ;;  %v16956_v29 = vld [vmem:[#allocation36_spill] sm:$0xff]  ;;  %v16957_v9 = vld [vmem:[#allocation38_spill] sm:$0xff] }
0x1139   : > { %11085 = vmatprep.mubr.bf16.mxu1 %v10030_v17  ;;  %v7753_v14 = vcombine.high %v15965_v59, %v7740_v63  ;;  %v7754_v46 = vcombine.low %v15978_v18, %v7747_v37  ;;  %v8197_v60 = vmax.f32 %v7748_v16, 0.0  ;;  %12737 = vmatprep.subr.bf16.mxu0 %v13580_v43  ;;  %v7755_v35 = vcombine.high %v15978_v18, %v7747_v37  ;;  %v13588_v16 = vld [vmem:[%s14371_s13 + $0x158] sm:$0xff]  }
0x113a   : > { %12765 = vmatprep.subr.bf16.mxu1 %v13581_v19  ;;  %v8201_v50 = vmax.f32 %v7749_v36, 0.0  ;;  %v8205_v20 = vmax.f32 %v7750_v31, 0.0  ;;  %v8209_v6 = vmax.f32 %v7751_v48, 0.0  ;;  %v8199_v5 = vmax.f32 %v7752_v27, 0.0  ;;  %v13589_v48 = vld [vmem:[%s14371_s13 + $0x1d8] sm:$0xff]  }
0x113b   : > { %v8203_v4 = vmax.f32 %v7753_v14, 0.0  ;;  %v8207_v47 = vmax.f32 %v7754_v46, 0.0  ;;  %v7898_v59 = vcombine.low %v16148_v51, %v16172_v11  ;;  %12738 = vmatpush3.bf16.msra.mxu0 %v13582_v53  ;;  %v8211_v25 = vmax.f32 %v7755_v35, 0.0 }
0x113c   : > { %12766 = vmatpush3.bf16.msra.mxu1 %v13583_v57  ;;  %v7899_v39 = vcombine.high %v16148_v51, %v16172_v11  ;;  %v16209_v18 = vrot.slane %v16162_v34, %v14425_v1  ;;  %v16955_v61 = vcombine.low %v16953_v21, %v16954_v52  ;;  %v16958_v26 = vcombine.low %v16956_v29, %v16957_v9  ;;  %v13587_v51 = vld [vmem:[%s14371_s13 + $0x190] sm:$0xff]  }
0x113d   : > { %v8404_v44 = vcombine.low %v8197_v60, %v8199_v5  ;;  %v8405_v43 = vcombine.high %v8197_v60, %v8199_v5  ;;  %v8406_v19 = vcombine.low %v8201_v50, %v8203_v4  ;;  %v8407_v63 = vcombine.high %v8201_v50, %v8203_v4  ;;  %12739 = vmatprep.subr.bf16.mxu0 %v13584_v32  ;;  %v13590_v32 = vld [vmem:[%s14371_s13 + $0x118] sm:$0xff]  }
0x113e   : > { %v16218_v45 = vpack.c.bf16 %v16958_v26, %v16955_v61  ;;  %v8408_v11 = vcombine.low %v8205_v20, %v8207_v47  ;;  %v8409_v17 = vcombine.high %v8205_v20, %v8207_v47  ;;  %v8410_v34 = vcombine.low %v8209_v6, %v8211_v25  ;;  %12767 = vmatprep.subr.bf16.mxu1 %v13585_v40  ;;  %v13591_v40 = vld [vmem:[%s14371_s13 + $0x198] sm:$0xff]   ;;  %v13592_v61 = vld [vmem:[%s14371_s13 + $0x160] sm:$0xff]  }
0x113f   : > { %v8411_v37 = vcombine.high %v8209_v6, %v8211_v25  ;;  %v8418_v53 = vrot.slane %v8404_v44, %v14425_v1  ;;  %v8425_v57 = vrot.slane %v8405_v43, %v14425_v1  ;;  %v8432_v36 = vrot.slane %v8406_v19, %v14425_v1  ;;  %11038 = vmatmul.mubr.bf16.gmra.mrb[80].mxu0 %v16209_v18 }
0x1140   : > { %v8439_v31 = vrot.slane %v8407_v63, %v14425_v1  ;;  %v8446_v27 = vrot.slane %v8408_v11, %v14425_v1  ;;  %v8453_v14 = vrot.slane %v8409_v17, %v14425_v1  ;;  %v8460_v46 = vrot.slane %v8410_v34, %v14425_v1  ;;  %12740 = vmatpush3.bf16.msra.mxu0 %v13586_v55  ;;  %v13593_v17 = vld [vmem:[%s14371_s13 + $0x1e0] sm:$0xff]  }
0x1141   : > { %v8467_v60 = vrot.slane %v8411_v37, %v14425_v1  ;;  %v8468_v35 = vcombine.low %v8418_v53, %v8432_v36  ;;  %v8469_v50 = vcombine.high %v8418_v53, %v8432_v36  ;;  %12768 = vmatpush3.bf16.msra.mxu1 %v13587_v51  ;;  %12741 = vmatprep.subr.bf16.mxu0 %v13588_v16 }
0x1142   : > { %v8470_v20 = vcombine.low %v8425_v57, %v8439_v31  ;;  %v8471_v6 = vcombine.high %v8425_v57, %v8439_v31  ;;  %v8472_v5 = vcombine.low %v8446_v27, %v8460_v46  ;;  %v8473_v4 = vcombine.high %v8446_v27, %v8460_v46  ;;  %12769 = vmatprep.subr.bf16.mxu1 %v13589_v48  ;;  %v13594_v31 = vld [vmem:[%s14371_s13 + $0x120] sm:$0xff]  }
0x1143   : > { %v8474_v47 = vcombine.low %v8453_v14, %v8467_v60  ;;  %v8475_v25 = vcombine.high %v8453_v14, %v8467_v60  ;;  %v16236_v26 = vrot.slane %v8468_v35, %v14425_v1  ;;  %v16242_v44 = vrot.slane %v8469_v50, %v14425_v1  ;;  %v13596_v14 = vld [vmem:[%s14371_s13 + $0x168] sm:$0xff]  }
0x1144   : > { %v16239_v55 = vrot.slane %v8470_v20, %v14425_v1  ;;  %v16245_v43 = vrot.slane %v8471_v6, %v14425_v1  ;;  %v16248_v19 = vrot.slane %v8472_v5, %v14425_v1  ;;  %v16254_v51 = vrot.slane %v8473_v4, %v14425_v1  ;;  %12742 = vmatpush3.bf16.msra.mxu0 %v13590_v32  ;;  %v13597_v50 = vld [vmem:[%s14371_s13 + $0x1e8] sm:$0xff]  }
0x1145   : > { %v16251_v63 = vrot.slane %v8474_v47, %v14425_v1  ;;  %v16257_v11 = vrot.slane %v8475_v25, %v14425_v1  ;;  %v7948_v34 = vrot.slane %v7898_v59, %v14425_v1  ;;  %v7955_v37 = vrot.slane %v7899_v39, %v14425_v1  ;;  %12770 = vmatpush3.bf16.msra.mxu1 %v13591_v40  ;;  %v13598_v5 = vld [vmem:[%s14371_s13 + $0x128] sm:$0xff]  }
0x1146   : > { %v10028_v16 = vcombine.high %v16209_v18, %v16209_v18  ;;  %v16959_v53 = vcombine.high %v16953_v21, %v16954_v52  ;;  %v16960_v57 = vcombine.high %v16956_v29, %v16957_v9  ;;  %v8532_v48 = vcombine.low %v16236_v26, %v16248_v19  ;;  %12743 = vmatprep.subr.bf16.mxu0 %v13592_v61  ;;  %v13595_v21 = vld [vmem:[%s14371_s13 + $0x1a0] sm:$0xff]   ;;  %v13599_v25 = vld [vmem:[%s14371_s13 + $0x1a8] sm:$0xff]   ;;  %v13600_v61 = vld [vmem:[%s14371_s13 + $0x170] sm:$0xff]  }
0x1147   : > { %v8533_v59 = vcombine.high %v16236_v26, %v16248_v19  ;;  %v8534_v39 = vcombine.low %v16239_v55, %v16251_v63  ;;  %v8535_v18 = vcombine.high %v16239_v55, %v16251_v63  ;;  %v8536_v52 = vcombine.low %v16242_v44, %v16254_v51  ;;  %12771 = vmatprep.subr.bf16.mxu1 %v13593_v17 }
0x1148   : > { %v12267_v36 = vpack.c.bf16 %v16960_v57, %v16959_v53  ;;  %v8537_v29 = vcombine.high %v16242_v44, %v16254_v51  ;;  %v8538_v9 = vcombine.low %v16245_v43, %v16257_v11  ;;  %v8539_v27 = vcombine.high %v16245_v43, %v16257_v11  ;;  %11086 = vmatmul.mubr.bf16.gmra.mrb[72].mxu1 %v10028_v16  ;;  %v13601_v53 = vld [vmem:[%s14371_s13 + $0x1f0] sm:$0xff]  }
0x1149   : > { %v7960_v46 = vcombine.low %v16185_v30, %v7948_v34  ;;  %v7961_v60 = vcombine.high %v16185_v30, %v7948_v34  ;;  %v7962_v32 = vcombine.low %v16188_v42, %v7955_v37  ;;  %v7963_v35 = vcombine.high %v16188_v42, %v7955_v37  ;;  %12744 = vmatpush3.bf16.msra.mxu0 %v13594_v31  ;;  %v13602_v31 = vld [vmem:[%s14371_s13 + $0x130] sm:$0xff]  }
0x114a   : > { %v16296_v20 = vrot.slane %v16218_v45, %v14425_v1  ;;  %v9196_v6 = vrot.slane %v12267_v36, %v14425_v1  ;;  %v9716_v40 = vcombine.high %v16108_v23, %v16111_v41  ;;  %v9718_v30 = vcombine.high %v16113_v33, %v16115_v62  ;;  %12772 = vmatpush3.bf16.msra.mxu1 %v13595_v21  ;;  %v16962_v23 = vld [vmem:[#allocation31_spill] sm:$0xff]  ;;  %v13619_v11 = vld [vmem:[%s14371_s13 + $0x290] sm:$0xff]  }
0x114b   : > { %v7998_v4 = vrot.slane %v7960_v46, %v14425_v1  ;;  %v8005_v42 = vrot.slane %v7962_v32, %v14425_v1  ;;  %v8012_v47 = vrot.slane %v7961_v60, %v14425_v1  ;;  %v16308_v45 = vrot.slane %v7963_v35, %v14425_v1  ;;  %12745 = vmatprep.subr.bf16.mxu0 %v13596_v14  ;;  %v13604_v35 = vld [vmem:[%s14371_s13 + $0x178] sm:$0xff]  }
0x114c   : > { %v7984_v17 = vrot.slane %v7957_v58, %v14425_v1  ;;  %v16320_v34 = vrot.slane %v7959_v15, %v14425_v1  ;;  %v9207_v37 = vcombine.low %v16296_v20, %v9196_v6  ;;  %v9208_v16 = vcombine.high %v16296_v20, %v9196_v6  ;;  %12773 = vmatprep.subr.bf16.mxu1 %v13597_v50  ;;  %v13605_v50 = vld [vmem:[%s14371_s13 + $0x1f8] sm:$0xff]  }
0x114d   : > { %v8020_v57 = vcombine.low %v16009_v7, %v7998_v4  ;;  %v8021_v36 = vcombine.high %v16009_v7, %v7998_v4  ;;  %v8022_v24 = vcombine.low %v16023_v54, %v8005_v42  ;;  %v8023_v2 = vcombine.high %v16023_v54, %v8005_v42  ;;  %12746 = vmatpush3.bf16.msra.mxu0 %v13598_v5  ;;  %v13603_v54 = vld [vmem:[%s14371_s13 + $0x1b0] sm:$0xff]   ;;  %v13606_v42 = vld [vmem:[%s14371_s13 + $0x138] sm:$0xff]  }
0x114e   : > { %v8024_v28 = vcombine.low %v7984_v17, %v8012_v47  ;;  %v8025_v38 = vcombine.high %v7984_v17, %v8012_v47  ;;  %v8026_v58 = vcombine.low %v16320_v34, %v16308_v45  ;;  %v8027_v15 = vcombine.high %v16320_v34, %v16308_v45  ;;  %12774 = vmatpush3.bf16.msra.mxu1 %v13599_v25  ;;  %v13607_v25 = vld [vmem:[%s14371_s13 + $0x1b8] sm:$0xff]  }
0x114f   : > { %v8217_v21 = vmax.f32 %v8021_v36, 0.0  ;;  %v8221_v14 = vmax.f32 %v8022_v24, 0.0  ;;  %v16334_v7 = vmax.f32 %v8023_v2, 0.0  ;;  %12747 = vmatprep.subr.bf16.mxu0 %v13600_v61  ;;  %12775 = vmatprep.subr.bf16.mxu1 %v13601_v53  ;;  %v13608_v24 = vld [vmem:[%s14371_s13 + $0x240] sm:$0xff]   ;;  %v9983_v33 = vcombine.high %v16152_v3, %v16152_v3 }
0x1150   : > { %v8215_v46 = vmax.f32 %v8024_v28, 0.0  ;;  %v8219_v60 = vmax.f32 %v8025_v38, 0.0  ;;  %v16337_v32 = vmax.f32 %v8026_v58, 0.0  ;;  %v13609_v2 = vld [vmem:[%s14371_s13 + $0x2c0] sm:$0xff]   ;;  %v9237_v58 = vrot.slane %v9207_v37, %v14425_v1 }
0x1151   : > { %12748 = vmatpush3.bf16.msra.mxu0 %v13602_v31  ;;  %v9251_v31 = vrot.slane %v9208_v16, %v14425_v1  ;;  %v9774_v37 = vrot.slane %v9718_v30, %v14425_v1  ;;  %v12269_v62 = vpack.c.bf16 %v8536_v52, %v8532_v48  ;;  %v12271_v30 = vpack.c.bf16 %v8537_v29, %v8533_v59 }
0x1152   : > { %v8774_v20 = vcombine.low %v8215_v46, %v8217_v21  ;;  %v8775_v6 = vcombine.high %v8215_v46, %v8217_v21  ;;  %v8776_v5 = vcombine.low %v8219_v60, %v8221_v14  ;;  %v8777_v4 = vcombine.high %v8219_v60, %v8221_v14  ;;  %12776 = vmatpush3.bf16.msra.mxu1 %v13603_v54 }
0x1153   : > { %v8778_v47 = vcombine.low %v16337_v32, %v16334_v7  ;;  %v8779_v61 = vcombine.high %v16337_v32, %v16334_v7  ;;  %12749 = vmatprep.subr.bf16.mxu0 %v13604_v35  ;;  %12777 = vmatprep.subr.bf16.mxu1 %v13605_v50  ;;  %v8213_v21 = vmax.f32 %v8020_v57, 0.0  ;;  %v9760_v60 = vrot.slane %v9716_v40, %v14425_v1 }
0x1154   : > { %v16348_v17 = vrot.slane %v8774_v20, %v14425_v1  ;;  %v16351_v53 = vrot.slane %v8775_v6, %v14425_v1  ;;  %v16354_v36 = vrot.slane %v8776_v5, %v14425_v1  ;;  %v16359_v28 = vrot.slane %v8777_v4, %v14425_v1  ;;  %v16961_v4 = vld [vmem:[#allocation32_spill] sm:$0xff] }
0x1155   : > { %12750 = vmatpush3.bf16.msra.mxu0 %v13606_v42  ;;  %v12304_v16 = vcombine.low %v9237_v58, %v9251_v31  ;;  %v8589_v57 = vcombine.high %v8213_v21, %v8213_v21  ;;  %v16380_v35 = vrot.slane %v8213_v21, %v14425_v1  ;;  %v12306_v50 = vcombine.high %v9237_v58, %v9251_v31 }
0x1156   : > { %v8838_v38 = vcombine.low %v16348_v17, %v16354_v36  ;;  %v8839_v14 = vcombine.high %v16348_v17, %v16354_v36  ;;  %12778 = vmatpush3.bf16.msra.mxu1 %v13607_v25  ;;  %v8840_v54 = vcombine.low %v16351_v53, %v16359_v28  ;;  %v8841_v46 = vcombine.high %v16351_v53, %v16359_v28  ;;  %v16963_v25 = vld [vmem:[#allocation33_spill] sm:$0xff] }
0x1157   : > { %12791 = vmatprep.subr.bf16.mxu0 %v13608_v24  ;;  %12819 = vmatprep.subr.bf16.mxu1 %v13609_v2  ;;  %v9732_v20 = vrot.slane %v12304_v16, %v14425_v1  ;;  %v9781_v6 = vcombine.low %v9760_v60, %v9774_v37  ;;  %v9782_v5 = vcombine.high %v9760_v60, %v9774_v37 }
0x1158   : > { %v5614_v41 = vcombine.low %v16962_v23, %v16961_v4  ;;  %v9746_v40 = vrot.slane %v12306_v50, %v14425_v1  ;;  %v9997_v31 = vrot.slane %v9983_v33, %v14425_v1  ;;  %v9271_v21 = vrot.slane %v12269_v62, %v14425_v1  ;;  %v13611_v33 = vld [vmem:[%s14371_s13 + $0x280] sm:$0xff]   ;;  %v13612_v62 = vld [vmem:[%s14371_s13 + $0x248] sm:$0xff]  }
0x1159   : > { %v9838_v42 = vrot.slane %v9782_v5, %v14425_v1  ;;  %v9824_v3 = vrot.slane %v9781_v6, %v14425_v1  ;;  %v16409_v26 = vrot.slane %v8126_v22, %v14425_v1  ;;  %v8603_v44 = vrot.slane %v8589_v57, %v14425_v1  ;;  %v13610_v5 = vld [vmem:[%s14371_s13 + $0x200] sm:$0xff]  }
0x115a   : > { %v12260_v24 = vcombine.high %v16963_v25, %v5614_v41  ;;  %v9777_v2 = vcombine.low %v9732_v20, %v9746_v40  ;;  %v9778_v58 = vcombine.high %v9732_v20, %v9746_v40  ;;  %v9285_v51 = vrot.slane %v12271_v30, %v14425_v1 }
0x115b   : > { %v8604_v48 = vcombine.high %v16380_v35, %v16380_v35  ;;  %v9999_v29 = vcombine.high %v9997_v31, %v9997_v31  ;;  %v8605_v30 = vcombine.high %v8603_v44, %v8603_v44  ;;  %v16427_v25 = vrot.slane %v16380_v35, %v14425_v1  ;;  %v13614_v35 = vld [vmem:[%s14371_s13 + $0x208] sm:$0xff]  }
0x115c   : > { %v6945_v19 = vrot.slane %v12260_v24, %v14425_v1  ;;  %v9810_v59 = vrot.slane %v9778_v58, %v14425_v1  ;;  %v9796_v52 = vrot.slane %v9777_v2, %v14425_v1  ;;  %v9321_v37 = vcombine.low %v9271_v21, %v9285_v51 }
0x115d   : > { %v9322_v16 = vcombine.high %v9271_v21, %v9285_v51  ;;  %v10027_v40 = vrot.slane %v9999_v29, %v14425_v1  ;;  %v10013_v21 = vrot.slane %v9997_v31, %v14425_v1  ;;  %v16446_v29 = vrot.slane %v8605_v30, %v14425_v1  ;;  %v13617_v31 = vld [vmem:[%s14371_s13 + $0x2d0] sm:$0xff]  }
0x115e   : > { %v6961_v22 = vrot.slane %v6945_v19, %v14425_v1  ;;  %v6947_v60 = vcombine.high %v6945_v19, %v6945_v19  ;;  %v9845_v57 = vcombine.low %v9810_v59, %v9838_v42  ;;  %v9846_v50 = vcombine.high %v9810_v59, %v9838_v42  ;;  %v13613_v42 = vld [vmem:[%s14371_s13 + $0x2c8] sm:$0xff]  }
0x115f   : > { %v9841_v20 = vcombine.low %v9796_v52, %v9824_v3  ;;  %v9842_v6 = vcombine.high %v9796_v52, %v9824_v3  ;;  %v9333_v24 = vrot.slane %v9321_v37, %v14425_v1  ;;  %v10031_v58 = vcombine.high %v10027_v40, %v10027_v40 }
0x1160   : > { %v7379_v4 = vadd.f32 %v16089_v49, %v6961_v22  ;;  %v6977_v23 = vcombine.high %v6961_v22, %v6961_v22  ;;  %v6975_v41 = vrot.slane %v6947_v60, %v14425_v1  ;;  %11125 = vmatprep.mubr.bf16.mxu0 %v9845_v57  ;;  %11173 = vmatprep.mubr.bf16.mxu1 %v9846_v50  ;;  %v13618_v50 = vld [vmem:[%s14371_s13 + $0x210] sm:$0xff]   ;;  %v8227_v30 = vmax.f32 %v8027_v15, 0.0  ;;  %v13625_v15 = vld [vmem:[%s14371_s13 + $0x2e0] sm:$0xff]  }
0x1161   : > { %11126 = vmatmul.mubr.bf16.vlgmr.msra.gmra.mrb[84].mxu0 %v9841_v20  ;;  %11174 = vmatmul.mubr.bf16.vlgmr.msra.gmra.mrb[76].mxu1 %v9842_v6  ;;  %v9347_v19 = vrot.slane %v9322_v16, %v14425_v1  ;;  %v12273_v52 = vpack.c.bf16 %v8538_v9, %v8534_v39  ;;  %v12275_v39 = vpack.c.bf16 %v8539_v27, %v8535_v18  ;;  %v13620_v18 = vld [vmem:[%s14371_s13 + $0x258] sm:$0xff]  }
0x1162   : > { %v7430_v49 = vadd.f32 %v16091_v12, %v6977_v23  ;;  %v7381_v3 = vadd.f32 %v16096_v8, %v6975_v41  ;;  %v6979_v2 = vcombine.high %v6975_v41, %v6975_v41  ;;  %11133 = vmatprep.mubr.bf16.mxu0 %v10027_v40  ;;  %12792 = vmatpush3.bf16.msra.mxu0 %v13610_v5  ;;  %v13615_v12 = vld [vmem:[%s14371_s13 + $0x288] sm:$0xff]   ;;  %v13616_v8 = vld [vmem:[%s14371_s13 + $0x250] sm:$0xff]   ;;  %v13621_v6 = vld [vmem:[%s14371_s13 + $0x2d8] sm:$0xff]  }
0x1163   : > { %12820 = vmatpush3.bf16.msra.mxu1 %v13611_v33  ;;  %12793 = vmatprep.subr.bf16.mxu0 %v13612_v62  ;;  %v12307_v22 = vcombine.low %v9333_v24, %v9347_v19  ;;  %v9299_v9 = vrot.slane %v12273_v52, %v14425_v1  ;;  %v16458_v16 = vrot.slane %v8603_v44, %v14425_v1  ;;  %v13622_v33 = vld [vmem:[%s14371_s13 + $0x218] sm:$0xff]   ;;  %v13629_v52 = vld [vmem:[%s14371_s13 + $0x2e8] sm:$0xff]  }
0x1164   : > { %v8096_v51 = vcombine.low %v7379_v4, %v7381_v3  ;;  %v7432_v59 = vadd.f32 %v16098_v56, %v6979_v2  ;;  %11181 = vmatprep.mubr.bf16.mxu1 %v10031_v58  ;;  %12821 = vmatprep.subr.bf16.mxu1 %v13613_v42  ;;  %v12309_v56 = vcombine.high %v9333_v24, %v9347_v19  ;;  %v13624_v3 = vld [vmem:[%s14371_s13 + $0x260] sm:$0xff]  }
0x1165   : > { %v16461_v57 = vrot.slane %v8604_v48, %v14425_v1  ;;  %v16465_v20 = vrot.slane %v12307_v22, %v14425_v1  ;;  %v10029_v63 = vcombine.high %v10013_v21, %v10013_v21  ;;  %v9313_v27 = vrot.slane %v12275_v39, %v14425_v1 }
0x1166   : > { %v8118_v60 = vrot.slane %v8096_v51, %v14425_v1  ;;  %v8097_v37 = vcombine.low %v7430_v49, %v7432_v59  ;;  %12794 = vmatpush3.bf16.msra.mxu0 %v13614_v35  ;;  %v16468_v55 = vrot.slane %v12309_v56, %v14425_v1  ;;  %v8143_v44 = vrot.slane %v8127_v13, %v14425_v1  ;;  %v13623_v49 = vld [vmem:[%s14371_s13 + $0x298] sm:$0xff]  }
0x1167   : > { %12822 = vmatpush3.bf16.msra.mxu1 %v13615_v12  ;;  %12795 = vmatprep.subr.bf16.mxu0 %v13616_v8  ;;  %v8637_v48 = vcombine.high %v16446_v29, %v16446_v29  ;;  %v9324_v10 = vcombine.low %v9299_v9, %v9313_v27  ;;  %v8634_v0 = vcombine.high %v16427_v25, %v16427_v25  ;;  %v13628_v8 = vld [vmem:[%s14371_s13 + $0x268] sm:$0xff]  }
0x1168   : > { %v8125_v43 = vrot.slane %v8097_v37, %v14425_v1  ;;  %12823 = vmatprep.subr.bf16.mxu1 %v13617_v31  ;;  %v9911_v5 = vcombine.low %v16465_v20, %v16468_v55  ;;  %v9912_v4 = vcombine.high %v16465_v20, %v16468_v55  ;;  %v8635_v13 = vcombine.high %v16458_v16, %v16458_v16 }
0x1169   : > { %11134 = vmatmul.mubr.bf16.gmra.mrb[88].mxu0 %v10013_v21  ;;  %11182 = vmatmul.mubr.bf16.gmra.mrb[80].mxu1 %v10029_v63  ;;  %v8636_v40 = vcombine.high %v16461_v57, %v16461_v57  ;;  %v9325_v62 = vcombine.high %v9299_v9, %v9313_v27  ;;  %v9354_v2 = vrot.slane %v9324_v10, %v14425_v1  ;;  %v13631_v63 = vld [vmem:[%s14371_s13 + $0x2a8] sm:$0xff]   ;;  %v13632_v27 = vld [vmem:[%s14371_s13 + $0x270] sm:$0xff]  }
0x116a   : > { %v8128_v23 = vcombine.low %v8118_v60, %v8125_v43  ;;  %v8129_v41 = vcombine.high %v8118_v60, %v8125_v43  ;;  %12796 = vmatpush3.bf16.msra.mxu0 %v13618_v50  ;;  %v16504_v58 = vrot.slane %v8778_v47, %v14425_v1  ;;  %v16510_v45 = vrot.slane %v8779_v61, %v14425_v1  ;;  %v13633_v10 = vld [vmem:[%s14371_s13 + $0x2f0] sm:$0xff]  }
0x116b   : > { %12824 = vmatpush3.bf16.msra.mxu1 %v13619_v11  ;;  %12797 = vmatprep.subr.bf16.mxu0 %v13620_v18  ;;  %v12276_v34 = vpack.c.bf16 %v8637_v48, %v8635_v13  ;;  %v9368_v35 = vrot.slane %v9325_v62, %v14425_v1  ;;  %v16518_v21 = vrot.slane %v8838_v38, %v14425_v1  ;;  %v13626_v38 = vld [vmem:[%s14371_s13 + $0x220] sm:$0xff]   ;;  %v13634_v62 = vld [vmem:[%s14371_s13 + $0x230] sm:$0xff]  }
0x116c   : > { %v8150_v42 = vrot.slane %v8128_v23, %v14425_v1  ;;  %v8157_v24 = vrot.slane %v8129_v41, %v14425_v1  ;;  %12825 = vmatprep.subr.bf16.mxu1 %v13621_v6  ;;  %v12270_v47 = vpack.c.bf16 %v16461_v57, %v16427_v25  ;;  %v16527_v32 = vrot.slane %v8839_v14, %v14425_v1  ;;  %v13627_v14 = vld [vmem:[%s14371_s13 + $0x2a0] sm:$0xff]  }
0x116d   : > { %v12274_v61 = vpack.c.bf16 %v16446_v29, %v16458_v16  ;;  %v12308_v51 = vcombine.low %v9354_v2, %v9368_v35  ;;  %v12310_v59 = vcombine.high %v9354_v2, %v9368_v35  ;;  %v16538_v25 = vpack.c.bf16 %v8636_v40, %v8634_v0  ;;  %v13636_v2 = vld [vmem:[%s14371_s13 + $0x278] sm:$0xff]  }
0x116e   : > { %v8158_v19 = vcombine.low %v16409_v26, %v8150_v42  ;;  %v8159_v7 = vcombine.low %v8143_v44, %v8157_v24  ;;  %12798 = vmatpush3.bf16.msra.mxu0 %v13622_v33  ;;  %v16536_v26 = vrot.slane %v8840_v54, %v14425_v1  ;;  %v16545_v12 = vrot.slane %v8841_v46, %v14425_v1  ;;  %v13630_v46 = vld [vmem:[%s14371_s13 + $0x228] sm:$0xff]   ;;  %v13637_v35 = vld [vmem:[%s14371_s13 + $0x2f8] sm:$0xff]  }
0x116f   : > { %12826 = vmatpush3.bf16.msra.mxu1 %v13623_v49  ;;  %12799 = vmatprep.subr.bf16.mxu0 %v13624_v3  ;;  %v9320_v54 = vrot.slane %v12276_v34, %v14425_v1  ;;  %v16551_v29 = vrot.slane %v12308_v51, %v14425_v1  ;;  %v16554_v31 = vrot.slane %v12310_v59, %v14425_v1  ;;  %v13635_v3 = vld [vmem:[%s14371_s13 + $0x2b0] sm:$0xff]  }
0x1170   : > { %v8229_v17 = vmax.f32 %v8158_v19, 0.0  ;;  %v8231_v36 = vmax.f32 %v8159_v7, 0.0  ;;  %12827 = vmatprep.subr.bf16.mxu1 %v13625_v15  ;;  %v16558_v53 = vrot.slane %v12270_v47, %v14425_v1  ;;  %v9306_v28 = vrot.slane %v12274_v61, %v14425_v1 }
0x1171   : > { %v9913_v39 = vcombine.low %v16551_v29, %v16554_v31  ;;  %v9914_v9 = vcombine.high %v16551_v29, %v16554_v31  ;;  %v9292_v11 = vrot.slane %v16538_v25, %v14425_v1  ;;  %v13644_v31 = vld [vmem:[%s14371_s13 + $0x348] sm:$0xff]  }
0x1172   : > { %v8780_v22 = vcombine.low %v8227_v30, %v8229_v17  ;;  %v8781_v56 = vcombine.high %v8227_v30, %v8229_v17  ;;  %v8959_v60 = vcombine.high %v8231_v36, %v8231_v36  ;;  %v8966_v37 = vrot.slane %v8231_v36, %v14425_v1  ;;  %12800 = vmatpush3.bf16.msra.mxu0 %v13626_v38  ;;  %v13638_v17 = vld [vmem:[%s14371_s13 + $0x238] sm:$0xff]  }
0x1173   : > { %12828 = vmatpush3.bf16.msra.mxu1 %v13627_v14  ;;  %12801 = vmatprep.subr.bf16.mxu0 %v13628_v8  ;;  %v16576_v44 = vcombine.low %v9306_v28, %v9320_v54  ;;  %v13639_v8 = vld [vmem:[%s14371_s13 + $0x2b8] sm:$0xff]   ;;  %v16658_v20 = vrot.slane %v9913_v39, %v14425_v1  ;;  %v13645_v39 = vld [vmem:[%s14371_s13 + $0x3c8] sm:$0xff]  }
0x1174   : > { %v8830_v16 = vrot.slane %v8780_v22, %v14425_v1  ;;  %v8837_v57 = vrot.slane %v8781_v56, %v14425_v1  ;;  %v8973_v50 = vrot.slane %v8959_v60, %v14425_v1  ;;  %v8974_v43 = vcombine.high %v8966_v37, %v8966_v37  ;;  %12829 = vmatprep.subr.bf16.mxu1 %v13629_v52  ;;  %v13640_v52 = vld [vmem:[%s14371_s13 + $0x340] sm:$0xff]  }
0x1175   : > { %v16573_v18 = vrot.slane %v8966_v37, %v14425_v1  ;;  %v9323_v60 = vcombine.low %v16558_v53, %v9292_v11 }
0x1176   : > { %v8842_v48 = vcombine.low %v16504_v58, %v8830_v16  ;;  %v8843_v6 = vcombine.high %v16504_v58, %v8830_v16  ;;  %v8844_v23 = vcombine.low %v16510_v45, %v8837_v57  ;;  %v8845_v41 = vcombine.high %v16510_v45, %v8837_v57  ;;  %12802 = vmatpush3.bf16.msra.mxu0 %v13630_v46 }
0x1177   : > { %v8975_v0 = vcombine.high %v8973_v50, %v8973_v50  ;;  %v8989_v13 = vrot.slane %v8973_v50, %v14425_v1  ;;  %v8996_v40 = vrot.slane %v8974_v43, %v14425_v1  ;;  %v9004_v33 = vcombine.high %v16573_v18, %v16573_v18  ;;  %12830 = vmatpush3.bf16.msra.mxu1 %v13631_v63 }
0x1178   : > { %v8880_v30 = vrot.slane %v8842_v48, %v14425_v1  ;;  %v8887_v42 = vrot.slane %v8844_v23, %v14425_v1  ;;  %v8894_v24 = vrot.slane %v8843_v6, %v14425_v1  ;;  %v8901_v49 = vrot.slane %v8845_v41, %v14425_v1  ;;  %12803 = vmatprep.subr.bf16.mxu0 %v13632_v27 }
0x1179   : > { %v9003_v58 = vrot.slane %v8975_v0, %v14425_v1  ;;  %v9005_v45 = vcombine.high %v8989_v13, %v8989_v13  ;;  %v9006_v34 = vcombine.high %v8996_v40, %v8996_v40  ;;  %v12286_v15 = vpack.c.bf16 %v8996_v40, %v16573_v18  ;;  %12831 = vmatprep.subr.bf16.mxu1 %v13633_v10 }
0x117a   : > { %v8902_v47 = vcombine.low %v16518_v21, %v8880_v30  ;;  %v8903_v19 = vcombine.high %v16518_v21, %v8880_v30  ;;  %v8904_v7 = vcombine.low %v16536_v26, %v8887_v42  ;;  %v8905_v61 = vcombine.high %v16536_v26, %v8887_v42  ;;  %12804 = vmatpush3.bf16.msra.mxu0 %v13634_v62 }
0x117b   : > { %v8906_v38 = vcombine.low %v16527_v32, %v8894_v24  ;;  %v8907_v51 = vcombine.high %v16527_v32, %v8894_v24  ;;  %v8908_v59 = vcombine.low %v16545_v12, %v8901_v49  ;;  %v8909_v25 = vcombine.high %v16545_v12, %v8901_v49  ;;  %12832 = vmatpush3.bf16.msra.mxu1 %v13635_v3  ;;  %v13641_v32 = vld [vmem:[%s14371_s13 + $0x3c0] sm:$0xff]  }
0x117c   : > { %v9007_v36 = vcombine.high %v9003_v58, %v9003_v58  ;;  %v12288_v14 = vpack.c.bf16 %v9006_v34, %v9004_v33  ;;  %v12290_v21 = vpack.c.bf16 %v9003_v58, %v8989_v13  ;;  %12805 = vmatprep.subr.bf16.mxu0 %v13636_v2  ;;  %12833 = vmatprep.subr.bf16.mxu1 %v13637_v35 }
0x117d   : > { %v12285_v26 = vpack.c.bf16 %v8906_v38, %v8902_v47  ;;  %v12287_v54 = vpack.c.bf16 %v8907_v51, %v8903_v19  ;;  %v12289_v22 = vpack.c.bf16 %v8908_v59, %v8904_v7  ;;  %v12291_v56 = vpack.c.bf16 %v8909_v25, %v8905_v61 }
0x117e   : > { %v9361_v12 = vrot.slane %v16576_v44, %v14425_v1  ;;  %v12292_v37 = vpack.c.bf16 %v9007_v36, %v9005_v45  ;;  %v9526_v28 = vrot.slane %v12288_v14, %v14425_v1  ;;  %12806 = vmatpush3.bf16.msra.mxu0 %v13638_v17  ;;  %v9512_v43 = vrot.slane %v12286_v15, %v14425_v1 }
0x117f   : > { %v9505_v46 = vrot.slane %v12285_v26, %v14425_v1  ;;  %v9519_v16 = vrot.slane %v12287_v54, %v14425_v1  ;;  %v9533_v57 = vrot.slane %v12289_v22, %v14425_v1  ;;  %v9547_v50 = vrot.slane %v12291_v56, %v14425_v1  ;;  %12834 = vmatpush3.bf16.msra.mxu1 %v13639_v8 }
0x1180   : > { %12847 = vmatprep.subr.bf16.mxu0 %v13640_v52  ;;  %v9540_v53 = vrot.slane %v12290_v21, %v14425_v1  ;;  %v9554_v63 = vrot.slane %v12292_v37, %v14425_v1  ;;  %12875 = vmatprep.subr.bf16.mxu1 %v13641_v32  ;;  %v9340_v48 = vrot.slane %v9323_v60, %v14425_v1 }
0x1181   : > { %v9555_v11 = vcombine.low %v9505_v46, %v9519_v16  ;;  %v9556_v18 = vcombine.high %v9505_v46, %v9519_v16  ;;  %v9558_v27 = vcombine.low %v9533_v57, %v9547_v50  ;;  %v9559_v44 = vcombine.high %v9533_v57, %v9547_v50  ;;  %v13642_v50 = vld [vmem:[%s14371_s13 + $0x300] sm:$0xff]  }
0x1182   : > { %v9557_v6 = vcombine.low %v9512_v43, %v9526_v28  ;;  %v9560_v23 = vcombine.low %v9540_v53, %v9554_v63  ;;  %v9371_v40 = vcombine.low %v9340_v48, %v9361_v12  ;;  %v9939_v56 = vrot.slane %v9912_v4, %v14425_v1  ;;  %v13643_v43 = vld [vmem:[%s14371_s13 + $0x380] sm:$0xff]   ;;  %v13649_v48 = vld [vmem:[%s14371_s13 + $0x3d0] sm:$0xff]  }
0x1183   : > { %v9567_v41 = vrot.slane %v9555_v11, %v14425_v1  ;;  %v9581_v10 = vrot.slane %v9556_v18, %v14425_v1  ;;  %v9588_v0 = vrot.slane %v9558_v27, %v14425_v1  ;;  %v9602_v13 = vrot.slane %v9559_v44, %v14425_v1  ;;  %v13646_v18 = vld [vmem:[%s14371_s13 + $0x308] sm:$0xff]   ;;  %v13648_v44 = vld [vmem:[%s14371_s13 + $0x350] sm:$0xff]  }
0x1184   : > { %v9595_v33 = vrot.slane %v9560_v23, %v14425_v1  ;;  %v9574_v49 = vrot.slane %v9557_v6, %v14425_v1  ;;  %v9925_v32 = vrot.slane %v9911_v5, %v14425_v1  ;;  %v9946_v4 = vrot.slane %v9914_v9, %v14425_v1  ;;  %v13647_v27 = vld [vmem:[%s14371_s13 + $0x388] sm:$0xff]   ;;  %v13650_v23 = vld [vmem:[%s14371_s13 + $0x310] sm:$0xff]  }
0x1185   : > { %v9603_v62 = vcombine.low %v9567_v41, %v9588_v0  ;;  %v9604_v30 = vcombine.high %v9567_v41, %v9588_v0  ;;  %v9606_v42 = vcombine.low %v9581_v10, %v9602_v13  ;;  %v9607_v24 = vcombine.high %v9581_v10, %v9602_v13  ;;  %v13651_v41 = vld [vmem:[%s14371_s13 + $0x390] sm:$0xff]   ;;  %v13652_v0 = vld [vmem:[%s14371_s13 + $0x358] sm:$0xff]  }
0x1186   : > { %v9605_v34 = vcombine.low %v9574_v49, %v9595_v33  ;;  %v13653_v13 = vld [vmem:[%s14371_s13 + $0x3d8] sm:$0xff]   ;;  %v13660_v49 = vld [vmem:[%s14371_s13 + $0x368] sm:$0xff]  }
0x1187   : > { %v9629_v3 = vunpack.i.h.s16 %v9603_v62  ;;  %v9633_v2 = vunpack.i.h.s16 %v9606_v42  ;;  %v9637_v58 = vunpack.i.h.s16 %v9604_v30  ;;  %v12294_v45 = vpack.i.b16 %v9603_v62, %v9371_v40  ;;  %v13654_v40 = vld [vmem:[%s14371_s13 + $0x318] sm:$0xff]   ;;  %v13656_v62 = vld [vmem:[%s14371_s13 + $0x360] sm:$0xff]  }
0x1188   : > { %v9641_v15 = vunpack.i.h.s16 %v9607_v24  ;;  %v13655_v33 = vld [vmem:[%s14371_s13 + $0x398] sm:$0xff]  }
0x1189   : > { %v12296_v35 = vpack.i.b16 %v9606_v42, %v9629_v3  ;;  %v12298_v47 = vpack.i.b16 %v9604_v30, %v9633_v2  ;;  %v12300_v19 = vpack.i.b16 %v9607_v24, %v9637_v58  ;;  %v13657_v30 = vld [vmem:[%s14371_s13 + $0x3e0] sm:$0xff]   ;;  %v13661_v3 = vld [vmem:[%s14371_s13 + $0x3e8] sm:$0xff]  }
0x118a   : > { %v16627_v7 = vpack.i.b16 %v9605_v34, %v9641_v15  ;;  %v13658_v42 = vld [vmem:[%s14371_s13 + $0x320] sm:$0xff]   ;;  %v13662_v58 = vld [vmem:[%s14371_s13 + $0x328] sm:$0xff]   ;;  %v13664_v34 = vld [vmem:[%s14371_s13 + $0x370] sm:$0xff]  }
0x118b   : > { %v9851_v61 = vcombine.low %v12294_v45, %v12296_v35  ;;  %v9853_v38 = vcombine.low %v12298_v47, %v12300_v19  ;;  %v9852_v51 = vcombine.high %v12294_v45, %v12296_v35  ;;  %v9854_v59 = vcombine.high %v12298_v47, %v12300_v19  ;;  %v13659_v24 = vld [vmem:[%s14371_s13 + $0x3a0] sm:$0xff]   ;;  %v13663_v45 = vld [vmem:[%s14371_s13 + $0x3a8] sm:$0xff]   ;;  %v13665_v15 = vld [vmem:[%s14371_s13 + $0x3f0] sm:$0xff]  }
0x118c   : > { %v10039_v25 = vrot.slane %v16627_v7, %v14425_v1  ;;  %v10032_v2 = vcombine.high %v16627_v7, %v16627_v7  ;;  %v13666_v47 = vld [vmem:[%s14371_s13 + $0x330] sm:$0xff]   ;;  %v13668_v7 = vld [vmem:[%s14371_s13 + $0x378] sm:$0xff]  }
0x118d   : > { %v9889_v17 = vrot.slane %v9851_v61, %v14425_v1  ;;  %v9903_v36 = vrot.slane %v9853_v38, %v14425_v1  ;;  %v9896_v14 = vrot.slane %v9852_v51, %v14425_v1  ;;  %v9910_v21 = vrot.slane %v9854_v59, %v14425_v1  ;;  %v13667_v19 = vld [vmem:[%s14371_s13 + $0x3b0] sm:$0xff]   ;;  %v13669_v61 = vld [vmem:[%s14371_s13 + $0x3f8] sm:$0xff]  }
0x118e   : > { %v10047_v8 = vcombine.high %v10039_v25, %v10039_v25  ;;  %v10055_v6 = vrot.slane %v10039_v25, %v14425_v1  ;;  %v10046_v35 = vrot.slane %v10032_v2, %v14425_v1  ;;  %v13670_v51 = vld [vmem:[%s14371_s13 + $0x338] sm:$0xff]  }
0x118f   : > { %v9915_v52 = vcombine.low %v9889_v17, %v9903_v36  ;;  %v9916_v26 = vcombine.high %v9889_v17, %v9903_v36  ;;  %v9917_v54 = vcombine.low %v9896_v14, %v9910_v21  ;;  %v9918_v22 = vcombine.high %v9896_v14, %v9910_v21  ;;  %v13671_v59 = vld [vmem:[%s14371_s13 + $0x3b8] sm:$0xff]   ;;  %v13757_v21 = vld [vmem:[%s14373_s12 + $0x8] sm:$0xff] }
0x1190   : > { %v10069_v46 = vrot.slane %v10047_v8, %v14425_v1  ;;  %v10077_v10 = vcombine.high %v10055_v6, %v10055_v6  ;;  %v10048_v38 = vcombine.high %v10046_v35, %v10046_v35  ;;  %v10062_v36 = vrot.slane %v10046_v35, %v14425_v1  ;;  %v16964_v8 = vld [vmem:[#allocation26_spill] sm:$0xff] }
0x1191   : > { %v9967_v60 = vrot.slane %v9916_v26, %v14425_v1  ;;  %v9953_v12 = vrot.slane %v9915_v52, %v14425_v1  ;;  %v9974_v37 = vrot.slane %v9918_v22, %v14425_v1  ;;  %v16647_v28 = vrot.slane %v9917_v54, %v14425_v1 }
0x1192   : > { %v10079_v11 = vcombine.high %v10069_v46, %v10069_v46  ;;  %v10076_v25 = vrot.slane %v10048_v38, %v14425_v1  ;;  %v10078_v14 = vcombine.high %v10062_v36, %v10062_v36  ;;  %v9107_v52 = vrot.slane %v13757_v21, %v16964_v8 }
0x1193   : > { %v9979_v55 = vcombine.low %v9939_v56, %v9967_v60  ;;  %v9980_v5 = vcombine.high %v9939_v56, %v9967_v60  ;;  %v9975_v16 = vcombine.low %v9925_v32, %v9953_v12  ;;  %v9976_v57 = vcombine.high %v9925_v32, %v9953_v12 }
0x1194   : > { %v9981_v53 = vcombine.low %v9946_v4, %v9974_v37  ;;  %v9982_v63 = vcombine.high %v9946_v4, %v9974_v37  ;;  %v9977_v9 = vcombine.low %v16658_v20, %v16647_v28  ;;  %v9978_v29 = vcombine.high %v16658_v20, %v16647_v28 }
0x1195   : > { %11221 = vmatprep.mubr.bf16.mxu0 %v9979_v55  ;;  %11269 = vmatprep.mubr.bf16.mxu1 %v9980_v5  ;;  %v10080_v17 = vcombine.high %v10076_v25, %v10076_v25  ;;  %v9644_v26 = vcombine.high %v9107_v52, %v9107_v52  ;;  %v9651_v54 = vrot.slane %v9107_v52, %v14425_v1 }
0x1196   : > { %11222 = vmatmul.mubr.bf16.vlgmr.msra.gmra.mrb[92].mxu0 %v9975_v16  ;;  %11270 = vmatmul.mubr.bf16.vlgmr.msra.gmra.mrb[84].mxu1 %v9976_v57 }
0x1197   : > { %12848 = vmatpush3.bf16.msra.mxu0 %v13642_v50  ;;  %12876 = vmatpush3.bf16.msra.mxu1 %v13643_v43  ;;  %v9658_v22 = vrot.slane %v9644_v26, %v14425_v1  ;;  %v9659_v56 = vcombine.high %v9651_v54, %v9651_v54  ;;  %v9667_v60 = vrot.slane %v9651_v54, %v14425_v1 }
0x1198   : > { %11229 = vmatprep.mubr.bf16.mxu0 %v10069_v46  ;;  %11277 = vmatprep.mubr.bf16.mxu1 %v10079_v11 }
0x1199   : > { %12849 = vmatprep.subr.bf16.mxu0 %v13644_v31  ;;  %12877 = vmatprep.subr.bf16.mxu1 %v13645_v39  ;;  %v9660_v32 = vcombine.high %v9658_v22, %v9658_v22  ;;  %v9674_v12 = vrot.slane %v9658_v22, %v14425_v1  ;;  %v9681_v37 = vrot.slane %v9659_v56, %v14425_v1 }
0x119a   : > { %v9689_v46 = vcombine.high %v9667_v60, %v9667_v60  ;;  %v10930_v50 = vcombine.low %v9667_v60, %v9667_v60 }
0x119b   : > { %12850 = vmatpush3.bf16.msra.mxu0 %v13646_v18  ;;  %12878 = vmatpush3.bf16.msra.mxu1 %v13647_v27  ;;  %v9688_v28 = vrot.slane %v9660_v32, %v14425_v1  ;;  %v9690_v4 = vcombine.high %v9674_v12, %v9674_v12  ;;  %v9691_v20 = vcombine.high %v9681_v37, %v9681_v37 }
0x119c   : > { %12851 = vmatprep.subr.bf16.mxu0 %v13648_v44  ;;  %12879 = vmatprep.subr.bf16.mxu1 %v13649_v48  ;;  %v10881_v55 = vcombine.low %v9667_v60, %v9681_v37  ;;  %v12439_v5 = vcombine.high %v9667_v60, %v9681_v37  ;;  %v10931_v43 = vcombine.low %v9681_v37, %v9689_v46 }
0x119d   : > { %v10883_v16 = vcombine.low %v9674_v12, %v9688_v28  ;;  %v12440_v57 = vcombine.high %v9674_v12, %v9688_v28  ;;  %v10940_v11 = vrot.slane %v10930_v50, %v14425_v1 }
0x119e   : > { %11230 = vmatmul.mubr.bf16.gmra.mrb[96].mxu0 %v10055_v6  ;;  %11278 = vmatmul.mubr.bf16.gmra.mrb[88].mxu1 %v10077_v10  ;;  %v10947_v18 = vrot.slane %v10931_v43, %v14425_v1 }
0x119f   : > { %12852 = vmatpush3.bf16.msra.mxu0 %v13650_v23  ;;  %12880 = vmatpush3.bf16.msra.mxu1 %v13651_v41  ;;  %v10905_v31 = vrot.slane %v10883_v16, %v14425_v1  ;;  %v10912_v39 = vrot.slane %v12440_v57, %v14425_v1 }
0x11a0   : > { %11317 = vmatprep.mubr.bf16.mxu0 %v9981_v53  ;;  %11365 = vmatprep.mubr.bf16.mxu1 %v9982_v63  ;;  %v10932_v53 = vcombine.low %v9691_v20, %v9674_v12  ;;  %v10933_v63 = vcombine.low %v9688_v28, %v9690_v4  ;;  %v10962_v23 = vcombine.low %v10940_v11, %v10947_v18 }
0x11a1   : > { %12853 = vmatprep.subr.bf16.mxu0 %v13652_v0  ;;  %12881 = vmatprep.subr.bf16.mxu1 %v13653_v13  ;;  %v10914_v6 = vcombine.low %v10905_v31, %v10912_v39 }
0x11a2   : > { %v10954_v27 = vrot.slane %v10932_v53, %v14425_v1  ;;  %v10961_v44 = vrot.slane %v10933_v63, %v14425_v1  ;;  %v10970_v13 = vrot.slane %v10962_v23, %v14425_v1 }
0x11a3   : > { %12854 = vmatpush3.bf16.msra.mxu0 %v13654_v40  ;;  %12882 = vmatpush3.bf16.msra.mxu1 %v13655_v33  ;;  %v10928_v0 = vrot.slane %v10914_v6, %v14425_v1 }
0x11a4   : > { %12855 = vmatprep.subr.bf16.mxu0 %v13656_v62  ;;  %12883 = vmatprep.subr.bf16.mxu1 %v13657_v30  ;;  %v10963_v41 = vcombine.low %v10954_v27, %v10961_v44 }
0x11a6   : > { %v10977_v40 = vrot.slane %v10963_v41, %v14425_v1 }
0x11a7   : > { %12856 = vmatpush3.bf16.msra.mxu0 %v13658_v42  ;;  %12884 = vmatpush3.bf16.msra.mxu1 %v13659_v24  ;;  %v9692_v42 = vcombine.high %v9688_v28, %v9688_v28 }
0x11a8   : > { %12857 = vmatprep.subr.bf16.mxu0 %v13660_v49  ;;  %12885 = vmatprep.subr.bf16.mxu1 %v13661_v3 }
0x11ab   : > { %12858 = vmatpush3.bf16.msra.mxu0 %v13662_v58  ;;  %12886 = vmatpush3.bf16.msra.mxu1 %v13663_v45 }
0x11ac   : > { %12859 = vmatprep.subr.bf16.mxu0 %v13664_v34  ;;  %12887 = vmatprep.subr.bf16.mxu1 %v13665_v15  ;;  %v10978_v34 = vcombine.low %v10970_v13, %v10977_v40 }
0x11af   : > { %12860 = vmatpush3.bf16.msra.mxu0 %v13666_v47  ;;  %12888 = vmatpush3.bf16.msra.mxu1 %v13667_v19 }
0x11b0   : > { %12861 = vmatprep.subr.bf16.mxu0 %v13668_v7  ;;  %12889 = vmatprep.subr.bf16.mxu1 %v13669_v61  ;;  %v10979_v61 = vcombine.low %v9692_v42, %v9667_v60 }
0x11b3   : > { %12862 = vmatpush3.bf16.msra.mxu0 %v13670_v51  ;;  %12890 = vmatpush3.bf16.msra.mxu1 %v13671_v59 }
0x11b6   : > { %11318 = vmatmul.mubr.bf16.vlgmr.msra.gmra.mrb[100].mxu0 %v9977_v9  ;;  %11366 = vmatmul.mubr.bf16.vlgmr.msra.gmra.mrb[92].mxu1 %v9978_v29  ;;  %v10891_v9 = vrot.slane %v10881_v55, %v14425_v1  ;;  %v10898_v29 = vrot.slane %v12439_v5, %v14425_v1 }
0x11b7   : > { %11325 = vmatprep.mubr.bf16.mxu0 %v10076_v25  ;;  %11373 = vmatprep.mubr.bf16.mxu1 %v10080_v17  ;;  %v10986_v17 = vrot.slane %v10979_v61, %v14425_v1 }
0x11b8   : > { %v10913_v48 = vcombine.low %v10891_v9, %v10898_v29 }
0x11b9   : > { %v10993_v26 = vrot.slane %v10986_v17, %v14425_v1 }
0x11ba   : > { %v10921_v10 = vrot.slane %v10913_v48, %v14425_v1 }
0x11bc   : > { %v10929_v30 = vcombine.low %v10921_v10, %v10928_v0 }
0x11be   : > { %11326 = vmatmul.mubr.bf16.gmra.mrb[104].mxu0 %v10062_v36  ;;  %11374 = vmatmul.mubr.bf16.gmra.mrb[96].mxu1 %v10078_v14 }
0x1209   : > { %v12695_v33 = vpop.f32.mrb[76].mxu0 }
0x120a   : > { %v12723_v62 = vpop.f32.mrb[68].mxu1  ;;  %v12696_v24 = vpop.f32.mrb[77].mxu0 }
0x120b   : > { %v12724_v49 = vpop.f32.mrb[69].mxu1  ;;  %v12697_v3 = vadd.f32 %v12696_v24, %v12695_v33  ;;  %v12698_v58 = vpop.f32.mrb[78].mxu0 }
0x120c   : > { %v12725_v2 = vadd.f32 %v12724_v49, %v12723_v62  ;;  %v12726_v45 = vpop.f32.mrb[70].mxu1  ;;  %v12699_v15 = vpop.f32.mrb[79].mxu0 }
0x120d   : > { %v12727_v35 = vpop.f32.mrb[71].mxu1  ;;  %v11032_v47 = vadd.f32 %v12697_v3, %v10929_v30  ;;  %v12700_v19 = vadd.f32 %v12699_v15, %v12698_v58 }
0x120e   : > { %v12728_v7 = vadd.f32 %v12727_v35, %v12726_v45 }
0x120f   : > { %v11080_v38 = vadd.f32 %v12725_v2, %v11032_v47  ;;  %v11035_v51 = vadd.f32 %v12700_v19, %v10978_v34 }
0x1211   : > { %v11083_v59 = vadd.f32 %v12728_v7, %v11035_v51 }
0x1212   : > { %v12701_v25 = vpop.f32.mrb[80].mxu0 }
0x1213   : > { %v12702_v36 = vpop.f32.mrb[81].mxu0 }
0x1214   : > { %v12703_v14 = vadd.f32 %v12702_v36, %v12701_v25  ;;  %v12704_v21 = vpop.f32.mrb[82].mxu0 }
0x1215   : > { %v12705_v52 = vpop.f32.mrb[83].mxu0 }
0x1216   : > { %v11040_v22 = vadd.f32 %v12703_v14, %v10993_v26 }
0x121b   : > { %v12729_v54 = vpop.f32.mrb[72].mxu1 }
0x121c   : > { %v12730_v56 = vpop.f32.mrb[73].mxu1 }
0x121d   : > { %v12731_v32 = vadd.f32 %v12730_v56, %v12729_v54  ;;  %v12732_v12 = vpop.f32.mrb[74].mxu1 }
0x121e   : > { %v12733_v37 = vpop.f32.mrb[75].mxu1 }
0x121f   : > { %v11088_v28 = vadd.f32 %v12731_v32, %v11040_v22 }
0x1234   : > { %v12751_v60 = vpop.f32.mrb[84].mxu0  ;;  %v12779_v46 = vpop.f32.mrb[76].mxu1 }
0x1235   : > { %v12752_v4 = vpop.f32.mrb[85].mxu0  ;;  %v12780_v20 = vpop.f32.mrb[77].mxu1 }
0x1236   : > { %v12753_v55 = vadd.f32 %v12752_v4, %v12751_v60  ;;  %v12781_v5 = vadd.f32 %v12780_v20, %v12779_v46  ;;  %v12754_v16 = vpop.f32.mrb[86].mxu0  ;;  %v12782_v57 = vpop.f32.mrb[78].mxu1 }
0x1237   : > { %v12755_v50 = vpop.f32.mrb[87].mxu0  ;;  %v12783_v43 = vpop.f32.mrb[79].mxu1 }
0x1238   : > { %v11128_v53 = vadd.f32 %v12753_v55, %v11080_v38  ;;  %v12756_v63 = vadd.f32 %v12755_v50, %v12754_v16  ;;  %v12784_v9 = vadd.f32 %v12783_v43, %v12782_v57 }
0x123a   : > { %v11176_v29 = vadd.f32 %v12781_v5, %v11128_v53  ;;  %v11131_v31 = vadd.f32 %v12756_v63, %v11083_v59 }
0x123c   : > { %v11179_v39 = vadd.f32 %v12784_v9, %v11131_v31  ;;  %v12757_v11 = vpop.f32.mrb[88].mxu0  ;;  %v12785_v18 = vpop.f32.mrb[80].mxu1 }
0x123d   : > { %v12758_v27 = vpop.f32.mrb[89].mxu0  ;;  %v12786_v44 = vpop.f32.mrb[81].mxu1 }
0x123e   : > { %v12759_v48 = vadd.f32 %v12758_v27, %v12757_v11  ;;  %v12787_v6 = vadd.f32 %v12786_v44, %v12785_v18  ;;  %v12760_v23 = vpop.f32.mrb[90].mxu0  ;;  %v12788_v41 = vpop.f32.mrb[82].mxu1 }
0x123f   : > { %v12761_v10 = vpop.f32.mrb[91].mxu0  ;;  %v12789_v0 = vpop.f32.mrb[83].mxu1 }
0x1240   : > { %v11136_v13 = vadd.f32 %v12759_v48, %v11088_v28 }
0x1242   : > { %v11184_v40 = vadd.f32 %v12787_v6, %v11136_v13 }
0x1269   : > { %v12807_v33 = vpop.f32.mrb[92].mxu0  ;;  %v12835_v62 = vpop.f32.mrb[84].mxu1 }
0x126a   : > { %v12808_v30 = vpop.f32.mrb[93].mxu0  ;;  %v12836_v42 = vpop.f32.mrb[85].mxu1 }
0x126b   : > { %v12809_v24 = vadd.f32 %v12808_v30, %v12807_v33  ;;  %v12837_v49 = vadd.f32 %v12836_v42, %v12835_v62  ;;  %v12810_v3 = vpop.f32.mrb[94].mxu0  ;;  %v12838_v2 = vpop.f32.mrb[86].mxu1 }
0x126c   : > { %v12811_v58 = vpop.f32.mrb[95].mxu0  ;;  %v12839_v45 = vpop.f32.mrb[87].mxu1 }
0x126d   : > { %v11224_v34 = vadd.f32 %v12809_v24, %v11176_v29  ;;  %v12812_v15 = vadd.f32 %v12811_v58, %v12810_v3  ;;  %v12840_v35 = vadd.f32 %v12839_v45, %v12838_v2 }
0x126f   : > { %v11272_v47 = vadd.f32 %v12837_v49, %v11224_v34  ;;  %v11227_v19 = vadd.f32 %v12812_v15, %v11179_v39 }
0x1271   : > { %v11275_v7 = vadd.f32 %v12840_v35, %v11227_v19  ;;  %v12813_v61 = vpop.f32.mrb[96].mxu0  ;;  %v12841_v38 = vpop.f32.mrb[88].mxu1 }
0x1272   : > { %v12814_v51 = vpop.f32.mrb[97].mxu0  ;;  %v12842_v59 = vpop.f32.mrb[89].mxu1 }
0x1273   : > { %v12815_v25 = vadd.f32 %v12814_v51, %v12813_v61  ;;  %v12843_v17 = vadd.f32 %v12842_v59, %v12841_v38  ;;  %v12816_v36 = vpop.f32.mrb[98].mxu0  ;;  %v12844_v14 = vpop.f32.mrb[90].mxu1 }
0x1274   : > { %v12817_v21 = vpop.f32.mrb[99].mxu0  ;;  %v12845_v52 = vpop.f32.mrb[91].mxu1 }
0x1275   : > { %v11232_v26 = vadd.f32 %v12815_v25, %v11184_v40 }
0x1277   : > { %v11280_v54 = vadd.f32 %v12843_v17, %v11232_v26 }
0x1289   : > { %v12863_v22 = vpop.f32.mrb[100].mxu0  ;;  %v12891_v56 = vpop.f32.mrb[92].mxu1 }
0x128a   : > { %v12864_v32 = vpop.f32.mrb[101].mxu0  ;;  %v12892_v12 = vpop.f32.mrb[93].mxu1 }
0x128b   : > { %v12865_v37 = vadd.f32 %v12864_v32, %v12863_v22  ;;  %v12893_v28 = vadd.f32 %v12892_v12, %v12891_v56  ;;  %v12866_v60 = vpop.f32.mrb[102].mxu0  ;;  %v12894_v46 = vpop.f32.mrb[94].mxu1  ;;  %v16965_v32 = vld [vmem:[#allocation27_spill] sm:$0xff] }
0x128c   : > { %v12867_v4 = vpop.f32.mrb[103].mxu0  ;;  %v12895_v20 = vpop.f32.mrb[95].mxu1 }
0x128d   : > { %v11320_v55 = vadd.f32 %v12865_v37, %v11272_v47  ;;  %v12868_v5 = vadd.f32 %v12867_v4, %v12866_v60  ;;  %v12896_v16 = vadd.f32 %v12895_v20, %v12894_v46 }
0x128f   : > { %v11368_v57 = vadd.f32 %v12893_v28, %v11320_v55  ;;  %v11323_v50 = vadd.f32 %v12868_v5, %v11275_v7 }
0x1291   : > { %v11384_v43 = vcombine.high %v11368_v57, %v11368_v57  ;;  %v11391_v53 = vrot.slane %v11368_v57, %v14425_v1  ;;  %v11371_v63 = vadd.f32 %v12896_v16, %v11323_v50  ;;  %v12869_v9 = vpop.f32.mrb[104].mxu0  ;;  %v12897_v29 = vpop.f32.mrb[96].mxu1 }
0x1292   : > { %v12870_v31 = vpop.f32.mrb[105].mxu0  ;;  %v12898_v39 = vpop.f32.mrb[97].mxu1 }
0x1293   : > { %v11398_v11 = vrot.slane %v11384_v43, %v14425_v1  ;;  %v11399_v18 = vcombine.high %v11391_v53, %v11391_v53  ;;  %v11433_v27 = vcombine.high %v11371_v63, %v11371_v63  ;;  %v12872_v44 = vpop.f32.mrb[106].mxu0  ;;  %v12900_v48 = vpop.f32.mrb[98].mxu1  ;;  %v11440_v6 = vrot.slane %v11371_v63, %v14425_v1 }
0x1294   : > { %v12871_v23 = vadd.f32 %v12870_v31, %v12869_v9  ;;  %v12899_v41 = vadd.f32 %v12898_v39, %v12897_v29  ;;  %v12873_v10 = vpop.f32.mrb[107].mxu0  ;;  %v12901_v0 = vpop.f32.mrb[99].mxu1  ;;  %v11407_v40 = vrot.slane %v11391_v53, %v14425_v1  ;;  %v16967_v48 = vld [vmem:[#allocation30_spill] sm:$0xff] }
0x1295   : > { %v11400_v13 = vcombine.high %v11398_v11, %v11398_v11  ;;  %v11421_v33 = vrot.slane %v11399_v18, %v14425_v1  ;;  %v11447_v62 = vrot.slane %v11433_v27, %v14425_v1  ;;  %v11414_v30 = vrot.slane %v11398_v11, %v14425_v1  ;;  %v16966_v11 = vld [vmem:[#allocation28_spill] sm:$0xff]  ;;  %v16968_v10 = vld [vmem:[#allocation29_spill] sm:$0xff] }
0x1296   : > { %v11448_v42 = vcombine.high %v11440_v6, %v11440_v6  ;;  %v11456_v24 = vrot.slane %v11440_v6, %v14425_v1  ;;  %v11328_v49 = vadd.f32 %v12871_v23, %v11280_v54 }
0x1297   : > { %v11428_v3 = vrot.slane %v11400_v13, %v14425_v1  ;;  %v11504_v2 = vcombine.low %v11407_v40, %v11421_v33  ;;  %v12441_v58 = vcombine.high %v11407_v40, %v11421_v33  ;;  %v11449_v45 = vcombine.high %v11447_v62, %v11447_v62 }
0x1298   : > { %v11463_v34 = vrot.slane %v11447_v62, %v14425_v1  ;;  %v11470_v15 = vrot.slane %v11448_v42, %v14425_v1  ;;  %v11478_v35 = vcombine.high %v11456_v24, %v11456_v24  ;;  %v11376_v47 = vadd.f32 %v12899_v41, %v11328_v49 }
0x1299   : > { %v11506_v19 = vcombine.low %v11414_v30, %v11428_v3  ;;  %v12442_v7 = vcombine.high %v11414_v30, %v11428_v3  ;;  %v11477_v61 = vrot.slane %v11449_v45, %v14425_v1  ;;  %v11559_v38 = vrot.slane %v11456_v24, %v14425_v1 }
0x129a   : > { %v11479_v51 = vcombine.high %v11463_v34, %v11463_v34  ;;  %v11480_v59 = vcombine.high %v11470_v15, %v11470_v15  ;;  %v11567_v25 = vcombine.low %v11470_v15, %v11478_v35  ;;  %v11488_v17 = vrot.slane %v11376_v47, %v14425_v1 }
0x129b   : > { %v11481_v36 = vcombine.high %v11477_v61, %v11477_v61  ;;  %v11566_v14 = vrot.slane %v11559_v38, %v14425_v1  ;;  %v11514_v21 = vrot.slane %v11504_v2, %v14425_v1  ;;  %v11521_v52 = vrot.slane %v12441_v58, %v14425_v1 }
0x129c   : > { %v11568_v26 = vcombine.low %v11480_v59, %v11463_v34  ;;  %v11489_v54 = vcombine.high %v11488_v17, %v11488_v17  ;;  %v11496_v22 = vrot.slane %v11488_v17, %v14425_v1  ;;  %v11528_v56 = vrot.slane %v11506_v19, %v14425_v1 }
0x129d   : > { %v11635_v12 = vadd.f32 %v11566_v14, %v16965_v32  ;;  %v11535_v37 = vrot.slane %v12442_v7, %v14425_v1  ;;  %v11536_v28 = vcombine.low %v11514_v21, %v11521_v52  ;;  %v11569_v60 = vcombine.low %v11477_v61, %v11479_v51  ;;  %v13758_v14 = vld [vmem:[%s14373_s12] sm:$0xff] }
0x129e   : > { %v11570_v46 = vcombine.low %v11481_v36, %v11496_v22  ;;  %v11503_v4 = vrot.slane %v11489_v54, %v14425_v1  ;;  %v11577_v20 = vrot.slane %v11567_v25, %v14425_v1  ;;  %v11584_v55 = vrot.slane %v11568_v26, %v14425_v1 }
0x129f   : > { %v11640_v5 = vsel %vm5109_vm8, %v11635_v12, 0.0  ;;  %v11537_v16 = vcombine.low %v11528_v56, %v11535_v37  ;;  %v11591_v50 = vrot.slane %v11569_v60, %v14425_v1  ;;  %v11544_v63 = vrot.slane %v11536_v28, %v14425_v1 }
0x12a0   : > { %11641 = vadd.xlane.f32.xlu0 %v11640_v5  ;;  %v11622_v57 = vrot.slane %v11503_v4, %v14425_v1  ;;  %v11598_v43 = vrot.slane %v11570_v46, %v14425_v1  ;;  %v11599_v53 = vcombine.low %v11577_v20, %v11584_v55  ;;  %v11686_v21 = vrot.slane %v13758_v14, 6 }
0x12a1   : > { %v11551_v9 = vrot.slane %v11537_v16, %v14425_v1  ;;  %v11696_v22 = vrot.slane %v13758_v14, 7 }
0x12a2   : > { %v11629_v29 = vrot.slane %v11622_v57, %v14425_v1  ;;  %v11600_v31 = vcombine.low %v11591_v50, %v11598_v43  ;;  %v11607_v27 = vrot.slane %v11599_v53, %v14425_v1  ;;  %v11690_v32 = vrot.slane %v11686_v21, %v16964_v8 }
0x12a3   : > { %v11552_v39 = vcombine.low %v11544_v63, %v11551_v9  ;;  %v11700_v37 = vrot.slane %v11696_v22, %v16964_v8 }
0x12a4   : > { %v11637_v18 = vadd.f32 %v11629_v29, %v16966_v11  ;;  %v11614_v44 = vrot.slane %v11600_v31, %v14425_v1 }
0x12a5   : > { %v11634_v6 = vadd.f32 %v11552_v39, %v16967_v48 }
0x12a6   : > { %v11645_v23 = vsel %vm5109_vm8, %v11637_v18, 0.0  ;;  %v11615_v41 = vcombine.low %v11607_v27, %v11614_v44 }
0x12a7   : > { %11638 = vadd.xlane.f32.xlu0 %v11634_v6  ;;  %11646 = vadd.xlane.f32.xlu1 %v11645_v23 }
0x12a8   : > { %v11636_v0 = vadd.f32 %v11615_v41, %v16968_v10 }
0x12ab   : > { %11643 = vadd.xlane.f32.xlu1 %v11636_v0 }
0x132d   : > { %v11642_v13 = vpop.xlane.xlu0 %11641 }
0x132e   : > { %v11649_v40 = vmul.f32 0.0078125, %v11642_v13 }
0x1330   : > { %v11653_v33 = vsub.f32 %v11635_v12, %v11649_v40 }
0x1332   : > { %v11657_v62 = vmul.f32 %v11653_v33, %v11653_v33 }
0x1334   : > { %v11639_v30 = vpop.xlane.xlu0 %11638  ;;  %v11647_v42 = vpop.xlane.xlu1 %11646  ;;  %v11662_v24 = vsel %vm5109_vm8, %v11657_v62, 0.0 }
0x1335   : > { %v11648_v49 = vmul.f32 0.0078125, %v11639_v30  ;;  %v11651_v1 = vmul.f32 0.0078125, %v11647_v42  ;;  %11663 = vadd.xlane.f32.xlu1 %v11662_v24 }
0x1337   : > { %v11652_v3 = vsub.f32 %v11634_v6, %v11648_v49  ;;  %v11655_v2 = vsub.f32 %v11637_v18, %v11651_v1 }
0x1338   : > { %v11644_v58 = vpop.xlane.xlu1 %11643 }
0x1339   : > { %v11650_v45 = vmul.f32 0.0078125, %v11644_v58  ;;  %v11656_v34 = vmul.f32 %v11652_v3, %v11652_v3  ;;  %v11659_v15 = vmul.f32 %v11655_v2, %v11655_v2 }
0x133b   : > { %v11654_v35 = vsub.f32 %v11636_v0, %v11650_v45  ;;  %11660 = vadd.xlane.f32.xlu0 %v11656_v34  ;;  %v11667_v47 = vsel %vm5109_vm8, %v11659_v15, 0.0 }
0x133c   : > { %11668 = vadd.xlane.f32.xlu1 %v11667_v47 }
0x133d   : > { %v11658_v19 = vmul.f32 %v11654_v35, %v11654_v35 }
0x133f   : > { %11665 = vadd.xlane.f32.xlu0 %v11658_v19 }
0x13c2   : > { %v11664_v7 = vpop.xlane.xlu1 %11663 }
0x13c3   : > { %v11671_v61 = vmul.f32 0.0078125, %v11664_v7 }
0x13c5   : > { %v11675_v38 = vadd.f32 1e-05, %v11671_v61 }
0x13c7   : > { %13744 = vrsqrt.f32 %v11675_v38 }
0x13c8   : > { %v11661_v51 = vpop.xlane.xlu0 %11660 }
0x13c9   : > { %v11670_v59 = vmul.f32 0.0078125, %v11661_v51  ;;  %v11669_v25 = vpop.xlane.xlu1 %11668 }
0x13ca   : > { %v11673_v17 = vmul.f32 0.0078125, %v11669_v25 }
0x13cb   : > { %v11674_v36 = vadd.f32 1e-05, %v11670_v59 }
0x13cc   : > { %v11677_v52 = vadd.f32 1e-05, %v11673_v17  ;;  %v11666_v26 = vpop.xlane.xlu0 %11665 }
0x13cd   : > { %13746 = vrsqrt.f32 %v11674_v36  ;;  %v11672_v54 = vmul.f32 0.0078125, %v11666_v26 }
0x13ce   : > { %13748 = vrsqrt.f32 %v11677_v52 }
0x13cf   : > { %v11676_v56 = vadd.f32 1e-05, %v11672_v54 }
0x13d1   : > { %v13745_v12 = vpop.eup %13744  ;;  %13750 = vrsqrt.f32 %v11676_v56 }
0x13d2   : > { %v11683_v28 = vmul.f32 %v13745_v12, %v11653_v33 }
0x13d4   : > { %v11693_v60 = vmul.f32 %v11690_v32, %v11683_v28 }
0x13d6   : > { %v11703_v46 = vadd.f32 %v11700_v37, %v11693_v60 }
0x13d7   : > { %v13747_v4 = vpop.eup %13746 }
0x13d8   : > { %v13749_v20 = vpop.eup %13748  ;;  %11707 = vst [vmem:[#allocation2 + $0x8] sm:$0x1] %v11703_v46  ;;  %v11682_v55 = vmul.f32 %v13747_v4, %v11652_v3 }
0x13d9   : > { %v11685_v5 = vmul.f32 %v13749_v20, %v11655_v2 }
0x13da   : > { %v11692_v16 = vmul.f32 %v11690_v32, %v11682_v55 }
0x13db   : > { %v13751_v57 = vpop.eup %13750  ;;  %v11695_v50 = vmul.f32 %v11690_v32, %v11685_v5 }
0x13dc   : > { %v11702_v43 = vadd.f32 %v11700_v37, %v11692_v16  ;;  %v11684_v53 = vmul.f32 %v13751_v57, %v11654_v35  ;;  %11713 = sbr.rel (%p12443_p1) target bundleno = 5091 (0x13e3), region = 80 }
0x13dd   : > { %v11705_v63 = vadd.f32 %v11700_v37, %v11695_v50 }
0x13de   : > { %11706 = vst [vmem:[#allocation2] sm:$0xff] %v11702_v43  ;;  %v11694_v9 = vmul.f32 %v11690_v32, %v11684_v53  ;;  %11714 = vst [vmem:[#allocation14] sm:$0x1] (!%p12443_p1), %v11702_v43 }
0x13df   : > { %11709 = vst [vmem:[#allocation2 + $0x18] sm:$0x1] %v11705_v63 }
0x13e0   : > { %v11704_v29 = vadd.f32 %v11700_v37, %v11694_v9 }
0x13e2   : > { %11708 = vst [vmem:[#allocation2 + $0x10] sm:$0xff] %v11704_v29  ;;  %11715 = vst [vmem:[#allocation14 + $0x1] sm:$0x1] (!%p12443_p1), %v11704_v29 }
0x13e3 PF: > { %p13098_p12 = scmp.eq.s32.totalorder %s14128_s9, 5  ;;  %s14060_s27 = smov [#allocation14]  }
0x13e4   : > { %s11722_s4 = sshll.u32 %s14060_s27, 4  ;;  %s11723_s4 = int_to_ptr.vmem [resolvable:$true] %s11722_s4 }
0x13e5   : > { %s13933_s22 = scalar_lea.vmem %s11723_s4, 32  ;;  %p13940_p4 = scmp.lt.s32.totalorder %s11723_s4, %s11723_s4 }
0x13e6   : > { %p13934_p7 = scmp.ne.s32.totalorder %s11723_s4, %s13933_s22  ;;  %p13941_p8 = scmp.lt.s32.totalorder %s13933_s22, %s13933_s22 }
0x13e8   : > { %p13935_p5 = pnand %p13934_p7, %p13098_p12  ;;  %p13942_p9 = por %p13941_p8, %p13940_p4 }
0x13ea   : > { %p13936_p11 = pneg %p13935_p5 }
0x13ec   : > { %p13943_p13 = pnand %p13942_p9, %p13936_p11 }
0x13ee   : > { %13946 = shalt.err (!%p13943_p13)
}
0x13ef   : > { %s13947_s16 = scalar_lea.hbm %s16836_s7, 32 }
0x13f0   : > { %p13948_p10 = scmp.ne.s32.totalorder %s16836_s7, %s13947_s16  ;;  %p13953_p6 = scmp.lt.u32.totalorder %s13947_s16, %s16836_s7 }
0x13f2   : > { %p13949_p2 = pnand %p13948_p10, %p13098_p12 }
0x13f4   : > { %p13950_p3 = pneg %p13949_p2 }
0x13f6   : > { %p13955_p0 = pnand %p13953_p6, %p13950_p3 }
0x13f8   : > { %13958 = shalt.err (!%p13955_p0)
}
0x13f9   : > { %s14061_s20 = smov 16   ;;  %s14062_s12 = smov 1  }
0x13fa   : > { %13064 = dma.vmem_to_hbm [thread:$0]  (%p13098_p12), %s11723_s4, 32, %s16836_s7, [#allocation5], %s14061_s20, %s14061_s20, %s14062_s12  }
0x13fb   : > { %s14063_s29 = smov [#allocation15]  }
0x13fc   : > { %s11736_s30 = sshll.u32 %s14063_s29, 4  ;;  %s11737_s30 = int_to_ptr.vmem [resolvable:$true] %s11736_s30 }
0x13fd   : > { %s13959_s14 = scalar_lea.vmem %s11737_s30, 32  ;;  %p13966_p11 = scmp.lt.s32.totalorder %s11737_s30, %s11737_s30 }
0x13fe   : > { %p13960_p1 = scmp.ne.s32.totalorder %s11737_s30, %s13959_s14  ;;  %p13967_p4 = scmp.lt.s32.totalorder %s13959_s14, %s13959_s14 }
0x1400   : > { %p13961_p7 = pnand %p13960_p1, %p13098_p12  ;;  %p13968_p8 = por %p13967_p4, %p13966_p11 }
0x1402   : > { %p13962_p5 = pneg %p13961_p7 }
0x1404   : > { %p13969_p9 = pnand %p13968_p8, %p13962_p5 }
0x1406   : > { %13972 = shalt.err (!%p13969_p9)
}
0x1407   : > { %s16969_s26 = sld [smem:[#allocation41_spill]] }
0x140d   : > { %s13973_s15 = scalar_lea.hbm %s16969_s26, 32 }
0x140e   : > { %p13974_p13 = scmp.ne.s32.totalorder %s16969_s26, %s13973_s15  ;;  %p13979_p3 = scmp.lt.u32.totalorder %s13973_s15, %s16969_s26 }
0x1410   : > { %p13975_p10 = pnand %p13974_p13, %p13098_p12 }
0x1412   : > { %p13976_p2 = pneg %p13975_p10 }
0x1414   : > { %p13981_p6 = pnand %p13979_p3, %p13976_p2 }
0x1416   : > { %13984 = shalt.err (!%p13981_p6)
}
0x1417   : > { %13066 = dma.vmem_to_hbm [thread:$0]  (%p13098_p12), %s11737_s30, 32, %s16969_s26, [#allocation16]  }
0x1418   : > { %14018 = dma.done.wait (%p13098_p12), [#allocation5], 32  }
0x1419   : > { %14020 = vsyncadd (%p13098_p12), [#allocation5], 4294967264 }
0x141a   : > { %14022 = dma.done.wait (%p13098_p12), [#allocation16], 32  }
0x141b   : > { %14024 = vsyncadd (%p13098_p12), [#allocation16], 4294967264 }
0x141c PF: > { %s16970_s30 = sld [smem:[#allocation24_spill]]  ;;  %s16971_s10 = sld [smem:[#allocation23_spill]] }
0x141d   : > { %s16972_s29 = sld [smem:[#allocation25_spill]]  ;;  %s16973_s27 = smov %s14031_s28 }
0x1422   : > { %p26_p0 = scmp.ge.s32.totalorder %s16970_s30, 8   ;;  %s16974_s28 = smov %s16971_s10 }
0x1424   :  { %28 = sbr.rel (!%p26_p0) target bundleno = 13 (0xd), region = 138 }
0x142b   :  { %11753 = vsyncpa [#allocation4], 1 }
0x142c   :  { %11755 = vsyncpa [#allocation4 + $0x1], 1 }
0x142d   :  { %11756 = vsyncpa [#allocation7], 1 }
0x142e   :  { %11757 = vsyncpa [#allocation10], 1 }
0x142f   :  { %11759 = vsyncpa [#allocation10 + $0x1], 1 }
0x1430   :  { %11760 = vsyncpa [#allocation13], 1 }
0x1431   :  { %11762 = vsyncpa [#allocation13 + $0x1], 1 }
0x1432   :  { %11763 = vsyncpa [#allocation5], 1 }
0x1433   :  { %11765 = vsyncpa [#allocation5 + $0x1], 1 }
0x1434   :  { %11766 = vsyncpa [#allocation16], 1 }

</bundles_post_ra>
